<compile_context>
chip_gen: v5e
topology: v5e:2x2
jax: 0.10.0
libtpu: 0.0.40
codegen_flags: <defaults>
</compile_context>

<pallas_src>
import functools

import jax
import jax.numpy as jnp
from jax import lax
from jax.experimental import pallas as pl
from jax.experimental.pallas import tpu as pltpu


# ------------------------- in-kernel helpers -------------------------

def _layernorm(x, w, b, eps=1e-5):
    # matches PyTorch LayerNorm: mean/var (unbiased=False) over last axis, f32 math
    mean = jnp.mean(x, axis=-1, keepdims=True)
    var = jnp.mean((x - mean) ** 2, axis=-1, keepdims=True)
    return (x - mean) * lax.rsqrt(var + eps) * w + b


def _gelu_tanh(x):
    # matches the custom GELU: 0.5*x*(1+tanh(sqrt(2/pi)*(x+0.044715*x^3)))
    return 0.5 * x * (1.0 + jnp.tanh(jnp.sqrt(2.0 / jnp.pi) * (x + 0.044715 * x ** 3)))


# ------------------------- the Pallas kernel -------------------------

def transformer_block_kernel(
    x_ref, mask_ref,
    ln1w_ref, ln1b_ref,
    wq_ref, wk_ref, wv_ref,
    wo_ref, bo_ref,
    ln2w_ref, ln2b_ref,
    w1_ref, b1_ref, w2_ref, b2_ref,
    o_ref,
    *, n_heads, ff_chunk,
):
    bf16 = jnp.bfloat16
    f32 = jnp.float32
    Bt, S, D = x_ref.shape
    hd = D // n_heads
    M = Bt * S

    # fused batch rows -> one big (M, D) operand for all row-major matmuls
    x = x_ref[...].reshape(M, D)

    # ---- shortcut 1: pre-LN + causal multi-head attention ----
    h = _layernorm(x, ln1w_ref[...], ln1b_ref[...])           # f32 stats
    h_bf = h.astype(bf16)

    # bf16 MXU operands, f32 accumulation; 1/sqrt(hd) already folded into Wq
    q = jnp.dot(h_bf, wq_ref[...], preferred_element_type=f32)
    k = jnp.dot(h_bf, wk_ref[...], preferred_element_type=f32)
    v = jnp.dot(h_bf, wv_ref[...], preferred_element_type=f32)

    add_mask = mask_ref[...]                                  # (S, S), 0 / -1e30

    attn_rows = []
    for b in range(Bt):
        r = slice(b * S, (b + 1) * S)
        acc_b = None                                          # per-head out-proj accumulation
        for hh in range(n_heads):
            c = slice(hh * hd, (hh + 1) * hd)
            qh = q[r, c].astype(bf16)
            kh = k[r, c].astype(bf16)
            vh = v[r, c].astype(bf16)
            s = jnp.einsum('qd,kd->qk', qh, kh,
                           preferred_element_type=f32)        # (S, S) f32
            s = s + add_mask
            m = jnp.max(s, axis=-1, keepdims=True)            # f32 softmax stats
            p = jnp.exp(s - m)
            l = jnp.sum(p, axis=-1, keepdims=True)
            ctx = jnp.dot(p.astype(bf16), vh,
                          preferred_element_type=f32)         # (S, hd) f32
            ctx = ctx * pl.reciprocal(l, approx=True)         # normalize on EUP
            part = jnp.dot(ctx.astype(bf16), wo_ref[c, :],
                           preferred_element_type=f32)        # (S, D) f32
            acc_b = part if acc_b is None else acc_b + part
        attn_rows.append(acc_b)
    attn_out = attn_rows[0] if Bt == 1 else jnp.concatenate(attn_rows, axis=0)
    x = x + attn_out + bo_ref[...]                            # residual (drop_shortcut = identity)

    # ---- shortcut 2: pre-LN + feed-forward, chunked over the 4D hidden axis ----
    # Register accumulation (no VMEM scratch); convert to lax.fori_loop(unroll=True)
    # if n_chunks grows large.
    h2 = _layernorm(x, ln2w_ref[...], ln2b_ref[...]).astype(bf16)
    H4 = w1_ref.shape[1]
    n_chunks = H4 // ff_chunk
    ff = None
    for cidx in range(n_chunks):
        sl = slice(cidx * ff_chunk, (cidx + 1) * ff_chunk)
        hid = jnp.dot(h2, w1_ref[:, sl],
                      preferred_element_type=f32) + b1_ref[:, sl]
        g = _gelu_tanh(hid).astype(bf16)                      # GELU in f32, cast for MXU
        part = jnp.dot(g, w2_ref[sl, :], preferred_element_type=f32)
        ff = part if ff is None else ff + part
    x = x + ff + b2_ref[...]                                  # residual add

    o_ref[...] = x.reshape(Bt, S, D).astype(o_ref.dtype)


# ------------------------- wrapper -------------------------

def transformer_block(x, params, n_heads, ff_chunk=512, batch_tile=None):
    (ln1w, ln1b, wq, wk, wv, wo, bo, ln2w, ln2b, w1, b1, w2, b2) = params
    B, S, D = x.shape
    H4 = w1.shape[1]
    assert D % n_heads == 0
    hd = D // n_heads
    ff_chunk = min(ff_chunk, H4)          # consider 256 on v5e if spills show up
    assert H4 % ff_chunk == 0, "4*D must be divisible by ff_chunk"

    if batch_tile is None:
        # Keep >= 2 grid steps when possible (v7x has 2 TensorCores); otherwise fuse all rows.
        batch_tile = B // 2 if (B % 2 == 0 and B > 1) else B
    assert B % batch_tile == 0
    n_steps = B // batch_tile

    bf16 = jnp.bfloat16
    # Fold the 1/sqrt(hd) attention scale into Wq (one-time weight transform), then cast
    # all matmul weights to bf16 (halves DMA/VMEM; matmuls accumulate in f32 on the MXU).
    wq = wq * (1.0 / (hd ** 0.5))
    wq, wk, wv, wo, w1, w2 = (t.astype(bf16) for t in (wq, wk, wv, wo, w1, w2))

    # Additive causal mask built once (grid-invariant tiny input); finite -1e30, not -inf.
    add_mask = jnp.triu(jnp.full((S, S), -1e30, jnp.float32), k=1)

    def full2d(shape):
        return pl.BlockSpec(shape, lambda b: (0, 0))

    in_specs = [
        pl.BlockSpec((batch_tile, S, D), lambda b: (b, 0, 0)),   # x
        full2d((S, S)),                                          # additive causal mask
        full2d((1, D)), full2d((1, D)),                          # ln1 w, b
        full2d((D, D)), full2d((D, D)), full2d((D, D)),          # Wq, Wk, Wv (bf16)
        full2d((D, D)), full2d((1, D)),                          # out_proj W (bf16), b
        full2d((1, D)), full2d((1, D)),                          # ln2 w, b
        full2d((D, H4)), full2d((1, H4)),                        # ff W1 (bf16), b1
        full2d((H4, D)), full2d((1, D)),                         # ff W2 (bf16), b2
    ]

    # Advisory cost estimate so XLA can schedule neighbouring ops around the custom call.
    flops = 24 * B * S * D * D + 4 * B * S * S * D
    transcendentals = B * n_heads * S * S + B * S * 4 * D
    bytes_accessed = 24 * D * D + 8 * B * S * D + 4 * S * S

    kernel = functools.partial(transformer_block_kernel,
                               n_heads=n_heads, ff_chunk=ff_chunk)
    return pl.pallas_call(
        kernel,
        out_shape=jax.ShapeDtypeStruct((B, S, D), x.dtype),
        grid=(n_steps,),
        in_specs=in_specs,
        out_specs=pl.BlockSpec((batch_tile, S, D), lambda b: (b, 0, 0)),
        compiler_params=pltpu.CompilerParams(
            dimension_semantics=("parallel",),
            vmem_limit_bytes=32 * 1024 * 1024,
        ),
        cost_estimate=pl.CostEstimate(
            flops=int(flops),
            transcendentals=int(transcendentals),
            bytes_accessed=int(bytes_accessed),
        ),
    )(x, add_mask, ln1w, ln1b, wq, wk, wv, wo, bo, ln2w, ln2b, w1, b1, w2, b2)


# ------------------------- pure-JAX reference (for sanity) -------------------------

def reference_block(x, params, n_heads):
    (ln1w, ln1b, wq, wk, wv, wo, bo, ln2w, ln2b, w1, b1, w2, b2) = params
    B, S, D = x.shape
    hd = D // n_heads

    def ln(t, w, b):
        m = t.mean(-1, keepdims=True)
        v = ((t - m) ** 2).mean(-1, keepdims=True)
        return w * (t - m) / jnp.sqrt(v + 1e-5) + b

    def gelu(t):
        return 0.5 * t * (1.0 + jnp.tanh(jnp.sqrt(2.0 / jnp.pi) * (t + 0.044715 * t ** 3)))

    h = ln(x, ln1w, ln1b)
    q = (h @ wq).reshape(B, S, n_heads, hd).transpose(0, 2, 1, 3)
    k = (h @ wk).reshape(B, S, n_heads, hd).transpose(0, 2, 1, 3)
    v = (h @ wv).reshape(B, S, n_heads, hd).transpose(0, 2, 1, 3)
    scores = jnp.einsum("bhqd,bhkd->bhqk", q, k) / (hd ** 0.5)
    mask = jnp.triu(jnp.ones((S, S), bool), k=1)
    scores = jnp.where(mask, -jnp.inf, scores)
    p = jax.nn.softmax(scores, axis=-1)
    ctx = jnp.einsum("bhqk,bhkd->bhqd", p, v).transpose(0, 2, 1, 3).reshape(B, S, D)
    x = x + (ctx @ wo + bo)
    h2 = ln(x, ln2w, ln2b)
    ff = gelu(h2 @ w1 + b1) @ w2 + b2
    return x + ff


# ------------------------- main -------------------------

if __name__ == "__main__":
    # small, TPU-tile-friendly shapes: hd = 128, fused rows Bt*S = 16 (bf16-aligned)
    B, S, D, n_heads = 4, 8, 256, 2
    H4 = 4 * D

    key = jax.random.PRNGKey(0)
    keys = jax.random.split(key, 8)

    x = jax.random.normal(keys[0], (B, S, D), dtype=jnp.float32)

    def w_init(k, shape):
        return (0.02 * jax.random.normal(k, shape)).astype(jnp.float32)

    params = (
        jnp.ones((1, D), jnp.float32),            # ln1 weight
        jnp.zeros((1, D), jnp.float32),           # ln1 bias
        w_init(keys[1], (D, D)),                  # Wq (in, out) — qkv_bias=False
        w_init(keys[2], (D, D)),                  # Wk
        w_init(keys[3], (D, D)),                  # Wv
        w_init(keys[4], (D, D)),                  # out_proj W
        jnp.zeros((1, D), jnp.float32),           # out_proj b
        jnp.ones((1, D), jnp.float32),            # ln2 weight
        jnp.zeros((1, D), jnp.float32),           # ln2 bias
        w_init(keys[5], (D, H4)),                 # ff W1
        jnp.zeros((1, H4), jnp.float32),          # ff b1
        w_init(keys[6], (H4, D)),                 # ff W2
        jnp.zeros((1, D), jnp.float32),           # ff b2
    )

    out = transformer_block(x, params, n_heads)
    out = jax.block_until_ready(out)

    ref = jax.block_until_ready(reference_block(x, params, n_heads))
    assert out.shape == (B, S, D)
    # Kernel uses bf16 MXU operands (f32 accumulate) and an approx reciprocal in the
    # softmax normalization, so compare against the f32 reference at a looser tolerance.
    assert jnp.allclose(out, ref, atol=2e-2, rtol=2e-2), "mismatch vs reference"

    print("KERNEL_OK")
</pallas_src>

<mosaic_0001>
module attributes {stable_mosaic.version = 11 : i64} {
  func.func @transformer_block_kernel(%arg0: i32, %arg1: memref<2x8x256xf32, #tpu.memory_space<vmem>>, %arg2: memref<8x8xf32, #tpu.memory_space<vmem>>, %arg3: memref<1x256xf32, #tpu.memory_space<vmem>>, %arg4: memref<1x256xf32, #tpu.memory_space<vmem>>, %arg5: memref<256x256xbf16, #tpu.memory_space<vmem>>, %arg6: memref<256x256xbf16, #tpu.memory_space<vmem>>, %arg7: memref<256x256xbf16, #tpu.memory_space<vmem>>, %arg8: memref<256x256xbf16, #tpu.memory_space<vmem>>, %arg9: memref<1x256xf32, #tpu.memory_space<vmem>>, %arg10: memref<1x256xf32, #tpu.memory_space<vmem>>, %arg11: memref<1x256xf32, #tpu.memory_space<vmem>>, %arg12: memref<256x1024xbf16, #tpu.memory_space<vmem>>, %arg13: memref<1x1024xf32, #tpu.memory_space<vmem>>, %arg14: memref<1024x256xbf16, #tpu.memory_space<vmem>>, %arg15: memref<1x256xf32, #tpu.memory_space<vmem>>, %arg16: memref<2x8x256xf32, #tpu.memory_space<vmem>>) attributes {dimension_semantics = [#tpu.dimension_semantics<parallel>], iteration_bounds = array<i64: 2>, scalar_prefetch = 0 : i64, scratch_operands = 0 : i64, tpu.core_type = #tpu.core_type<tc>, window_params = [{transform_indices = @transform_0, window_bounds = array<i64: 2, 8, 256>}, {pipeline_mode = #tpu.pipeline_mode<synchronous>, transform_indices = @transform_1, window_bounds = array<i64: 8, 8>}, {pipeline_mode = #tpu.pipeline_mode<synchronous>, transform_indices = @transform_2, window_bounds = array<i64: 1, 256>}, {pipeline_mode = #tpu.pipeline_mode<synchronous>, transform_indices = @transform_3, window_bounds = array<i64: 1, 256>}, {pipeline_mode = #tpu.pipeline_mode<synchronous>, transform_indices = @transform_4, window_bounds = array<i64: 256, 256>}, {pipeline_mode = #tpu.pipeline_mode<synchronous>, transform_indices = @transform_5, window_bounds = array<i64: 256, 256>}, {pipeline_mode = #tpu.pipeline_mode<synchronous>, transform_indices = @transform_6, window_bounds = array<i64: 256, 256>}, {pipeline_mode = #tpu.pipeline_mode<synchronous>, transform_indices = @transform_7, window_bounds = array<i64: 256, 256>}, {pipeline_mode = #tpu.pipeline_mode<synchronous>, transform_indices = @transform_8, window_bounds = array<i64: 1, 256>}, {pipeline_mode = #tpu.pipeline_mode<synchronous>, transform_indices = @transform_9, window_bounds = array<i64: 1, 256>}, {pipeline_mode = #tpu.pipeline_mode<synchronous>, transform_indices = @transform_10, window_bounds = array<i64: 1, 256>}, {pipeline_mode = #tpu.pipeline_mode<synchronous>, transform_indices = @transform_11, window_bounds = array<i64: 256, 1024>}, {pipeline_mode = #tpu.pipeline_mode<synchronous>, transform_indices = @transform_12, window_bounds = array<i64: 1, 1024>}, {pipeline_mode = #tpu.pipeline_mode<synchronous>, transform_indices = @transform_13, window_bounds = array<i64: 1024, 256>}, {pipeline_mode = #tpu.pipeline_mode<synchronous>, transform_indices = @transform_14, window_bounds = array<i64: 1, 256>}, {transform_indices = @transform_15, window_bounds = array<i64: 2, 8, 256>}]} {
    %c0 = arith.constant 0 : index
    %c0_0 = arith.constant 0 : index
    %c0_1 = arith.constant 0 : index
    %0 = vector.load %arg1[%c0, %c0_0, %c0_1] : memref<2x8x256xf32, #tpu.memory_space<vmem>>, vector<2x8x256xf32>
    %1 = vector.shape_cast %0 : vector<2x8x256xf32> to vector<16x256xf32>
    %c0_2 = arith.constant 0 : index
    %c0_3 = arith.constant 0 : index
    %2 = vector.load %arg3[%c0_2, %c0_3] : memref<1x256xf32, #tpu.memory_space<vmem>>, vector<1x256xf32>
    %c0_4 = arith.constant 0 : index
    %c0_5 = arith.constant 0 : index
    %3 = vector.load %arg4[%c0_4, %c0_5] : memref<1x256xf32, #tpu.memory_space<vmem>>, vector<1x256xf32>
    %cst = arith.constant dense<0.000000e+00> : vector<16xf32>
    %4 = vector.multi_reduction <add>, %1, %cst [1] : vector<16x256xf32> to vector<16xf32>
    %5 = vector.shape_cast %4 : vector<16xf32> to vector<16x1xf32>
    %cst_6 = arith.constant 2.560000e+02 : f32
    %6 = vector.broadcast %cst_6 : f32 to vector<16x1xf32>
    %7 = arith.divf %5, %6 : vector<16x1xf32>
    %8 = vector.broadcast %7 : vector<16x1xf32> to vector<16x256xf32>
    %9 = arith.subf %1, %8 : vector<16x256xf32>
    %10 = arith.mulf %9, %9 : vector<16x256xf32>
    %cst_7 = arith.constant dense<0.000000e+00> : vector<16xf32>
    %11 = vector.multi_reduction <add>, %10, %cst_7 [1] : vector<16x256xf32> to vector<16xf32>
    %12 = vector.shape_cast %11 : vector<16xf32> to vector<16x1xf32>
    %cst_8 = arith.constant 2.560000e+02 : f32
    %13 = vector.broadcast %cst_8 : f32 to vector<16x1xf32>
    %14 = arith.divf %12, %13 : vector<16x1xf32>
    %15 = vector.broadcast %7 : vector<16x1xf32> to vector<16x256xf32>
    %16 = arith.subf %1, %15 : vector<16x256xf32>
    %cst_9 = arith.constant 9.99999974E-6 : f32
    %17 = vector.broadcast %cst_9 : f32 to vector<16x1xf32>
    %18 = arith.addf %14, %17 : vector<16x1xf32>
    %19 = math.rsqrt %18 : vector<16x1xf32>
    %20 = vector.broadcast %19 : vector<16x1xf32> to vector<16x256xf32>
    %21 = arith.mulf %16, %20 : vector<16x256xf32>
    %22 = vector.broadcast %2 : vector<1x256xf32> to vector<16x256xf32>
    %23 = arith.mulf %21, %22 : vector<16x256xf32>
    %24 = vector.broadcast %3 : vector<1x256xf32> to vector<16x256xf32>
    %25 = arith.addf %23, %24 : vector<16x256xf32>
    %26 = arith.truncf %25 : vector<16x256xf32> to vector<16x256xbf16>
    %c0_10 = arith.constant 0 : index
    %c0_11 = arith.constant 0 : index
    %27 = vector.load %arg5[%c0_10, %c0_11] : memref<256x256xbf16, #tpu.memory_space<vmem>>, vector<256x256xbf16>
    %cst_12 = arith.constant dense<0.000000e+00> : vector<16x256xf32>
    %28 = tpu.matmul %26, %27, %cst_12 {dimension_numbers = #tpu.dot_dimension_numbers<[1], [0], [0], [1], [0, 0, 1, 1], [], []>} : vector<16x256xbf16>, vector<256x256xbf16>, vector<16x256xf32> -> vector<16x256xf32>
    %c0_13 = arith.constant 0 : index
    %c0_14 = arith.constant 0 : index
    %29 = vector.load %arg6[%c0_13, %c0_14] : memref<256x256xbf16, #tpu.memory_space<vmem>>, vector<256x256xbf16>
    %cst_15 = arith.constant dense<0.000000e+00> : vector<16x256xf32>
    %30 = tpu.matmul %26, %29, %cst_15 {dimension_numbers = #tpu.dot_dimension_numbers<[1], [0], [0], [1], [0, 0, 1, 1], [], []>} : vector<16x256xbf16>, vector<256x256xbf16>, vector<16x256xf32> -> vector<16x256xf32>
    %c0_16 = arith.constant 0 : index
    %c0_17 = arith.constant 0 : index
    %31 = vector.load %arg7[%c0_16, %c0_17] : memref<256x256xbf16, #tpu.memory_space<vmem>>, vector<256x256xbf16>
    %cst_18 = arith.constant dense<0.000000e+00> : vector<16x256xf32>
    %32 = tpu.matmul %26, %31, %cst_18 {dimension_numbers = #tpu.dot_dimension_numbers<[1], [0], [0], [1], [0, 0, 1, 1], [], []>} : vector<16x256xbf16>, vector<256x256xbf16>, vector<16x256xf32> -> vector<16x256xf32>
    %c0_19 = arith.constant 0 : index
    %c0_20 = arith.constant 0 : index
    %33 = vector.load %arg2[%c0_19, %c0_20] : memref<8x8xf32, #tpu.memory_space<vmem>>, vector<8x8xf32>
    %34 = vector.extract_strided_slice %28 {offsets = [0, 0], sizes = [8, 128], strides = [1, 1]} : vector<16x256xf32> to vector<8x128xf32>
    %35 = arith.truncf %34 : vector<8x128xf32> to vector<8x128xbf16>
    %36 = vector.extract_strided_slice %30 {offsets = [0, 0], sizes = [8, 128], strides = [1, 1]} : vector<16x256xf32> to vector<8x128xf32>
    %37 = arith.truncf %36 : vector<8x128xf32> to vector<8x128xbf16>
    %38 = vector.extract_strided_slice %32 {offsets = [0, 0], sizes = [8, 128], strides = [1, 1]} : vector<16x256xf32> to vector<8x128xf32>
    %39 = arith.truncf %38 : vector<8x128xf32> to vector<8x128xbf16>
    "tpu.trace_start"() <{level = 10 : i32, message = "qd,kd->qk"}> : () -> ()
    %cst_21 = arith.constant dense<0.000000e+00> : vector<8x8xf32>
    %40 = tpu.matmul %35, %37, %cst_21 {dimension_numbers = #tpu.dot_dimension_numbers<[1], [1], [0], [0], [0, 0, 1, 0], [], []>} : vector<8x128xbf16>, vector<8x128xbf16>, vector<8x8xf32> -> vector<8x8xf32>
    "tpu.trace_stop"() : () -> ()
    %41 = arith.addf %40, %33 : vector<8x8xf32>
    %cst_22 = arith.constant dense<0xFF800000> : vector<8xf32>
    %42 = vector.multi_reduction <maximumf>, %41, %cst_22 [1] : vector<8x8xf32> to vector<8xf32>
    %43 = vector.shape_cast %42 : vector<8xf32> to vector<8x1xf32>
    %44 = vector.broadcast %43 : vector<8x1xf32> to vector<8x8xf32>
    %45 = arith.subf %41, %44 : vector<8x8xf32>
    %46 = math.exp %45 : vector<8x8xf32>
    %cst_23 = arith.constant dense<0.000000e+00> : vector<8xf32>
    %47 = vector.multi_reduction <add>, %46, %cst_23 [1] : vector<8x8xf32> to vector<8xf32>
    %48 = vector.shape_cast %47 : vector<8xf32> to vector<8x1xf32>
    %49 = arith.truncf %46 : vector<8x8xf32> to vector<8x8xbf16>
    %cst_24 = arith.constant dense<0.000000e+00> : vector<8x128xf32>
    %50 = tpu.matmul %49, %39, %cst_24 {dimension_numbers = #tpu.dot_dimension_numbers<[1], [0], [0], [1], [0, 0, 1, 1], [], []>} : vector<8x8xbf16>, vector<8x128xbf16>, vector<8x128xf32> -> vector<8x128xf32>
    %51 = tpu.reciprocal %48 {approx = true} : vector<8x1xf32> -> vector<8x1xf32>
    %52 = vector.broadcast %51 : vector<8x1xf32> to vector<8x128xf32>
    %53 = arith.mulf %50, %52 : vector<8x128xf32>
    %54 = arith.truncf %53 : vector<8x128xf32> to vector<8x128xbf16>
    %c0_25 = arith.constant 0 : index
    %c0_26 = arith.constant 0 : index
    %55 = vector.load %arg8[%c0_25, %c0_26] : memref<256x256xbf16, #tpu.memory_space<vmem>>, vector<128x256xbf16>
    %cst_27 = arith.constant dense<0.000000e+00> : vector<8x256xf32>
    %56 = tpu.matmul %54, %55, %cst_27 {dimension_numbers = #tpu.dot_dimension_numbers<[1], [0], [0], [1], [0, 0, 1, 1], [], []>} : vector<8x128xbf16>, vector<128x256xbf16>, vector<8x256xf32> -> vector<8x256xf32>
    %57 = vector.extract_strided_slice %28 {offsets = [0, 128], sizes = [8, 128], strides = [1, 1]} : vector<16x256xf32> to vector<8x128xf32>
    %58 = arith.truncf %57 : vector<8x128xf32> to vector<8x128xbf16>
    %59 = vector.extract_strided_slice %30 {offsets = [0, 128], sizes = [8, 128], strides = [1, 1]} : vector<16x256xf32> to vector<8x128xf32>
    %60 = arith.truncf %59 : vector<8x128xf32> to vector<8x128xbf16>
    %61 = vector.extract_strided_slice %32 {offsets = [0, 128], sizes = [8, 128], strides = [1, 1]} : vector<16x256xf32> to vector<8x128xf32>
    %62 = arith.truncf %61 : vector<8x128xf32> to vector<8x128xbf16>
    "tpu.trace_start"() <{level = 10 : i32, message = "qd,kd->qk"}> : () -> ()
    %cst_28 = arith.constant dense<0.000000e+00> : vector<8x8xf32>
    %63 = tpu.matmul %58, %60, %cst_28 {dimension_numbers = #tpu.dot_dimension_numbers<[1], [1], [0], [0], [0, 0, 1, 0], [], []>} : vector<8x128xbf16>, vector<8x128xbf16>, vector<8x8xf32> -> vector<8x8xf32>
    "tpu.trace_stop"() : () -> ()
    %64 = arith.addf %63, %33 : vector<8x8xf32>
    %cst_29 = arith.constant dense<0xFF800000> : vector<8xf32>
    %65 = vector.multi_reduction <maximumf>, %64, %cst_29 [1] : vector<8x8xf32> to vector<8xf32>
    %66 = vector.shape_cast %65 : vector<8xf32> to vector<8x1xf32>
    %67 = vector.broadcast %66 : vector<8x1xf32> to vector<8x8xf32>
    %68 = arith.subf %64, %67 : vector<8x8xf32>
    %69 = math.exp %68 : vector<8x8xf32>
    %cst_30 = arith.constant dense<0.000000e+00> : vector<8xf32>
    %70 = vector.multi_reduction <add>, %69, %cst_30 [1] : vector<8x8xf32> to vector<8xf32>
    %71 = vector.shape_cast %70 : vector<8xf32> to vector<8x1xf32>
    %72 = arith.truncf %69 : vector<8x8xf32> to vector<8x8xbf16>
    %cst_31 = arith.constant dense<0.000000e+00> : vector<8x128xf32>
    %73 = tpu.matmul %72, %62, %cst_31 {dimension_numbers = #tpu.dot_dimension_numbers<[1], [0], [0], [1], [0, 0, 1, 1], [], []>} : vector<8x8xbf16>, vector<8x128xbf16>, vector<8x128xf32> -> vector<8x128xf32>
    %74 = tpu.reciprocal %71 {approx = true} : vector<8x1xf32> -> vector<8x1xf32>
    %75 = vector.broadcast %74 : vector<8x1xf32> to vector<8x128xf32>
    %76 = arith.mulf %73, %75 : vector<8x128xf32>
    %77 = arith.truncf %76 : vector<8x128xf32> to vector<8x128xbf16>
    %c128 = arith.constant 128 : index
    %c0_32 = arith.constant 0 : index
    %78 = vector.load %arg8[%c128, %c0_32] : memref<256x256xbf16, #tpu.memory_space<vmem>>, vector<128x256xbf16>
    %cst_33 = arith.constant dense<0.000000e+00> : vector<8x256xf32>
    %79 = tpu.matmul %77, %78, %cst_33 {dimension_numbers = #tpu.dot_dimension_numbers<[1], [0], [0], [1], [0, 0, 1, 1], [], []>} : vector<8x128xbf16>, vector<128x256xbf16>, vector<8x256xf32> -> vector<8x256xf32>
    %80 = arith.addf %56, %79 : vector<8x256xf32>
    %81 = vector.extract_strided_slice %28 {offsets = [8, 0], sizes = [8, 128], strides = [1, 1]} : vector<16x256xf32> to vector<8x128xf32>
    %82 = arith.truncf %81 : vector<8x128xf32> to vector<8x128xbf16>
    %83 = vector.extract_strided_slice %30 {offsets = [8, 0], sizes = [8, 128], strides = [1, 1]} : vector<16x256xf32> to vector<8x128xf32>
    %84 = arith.truncf %83 : vector<8x128xf32> to vector<8x128xbf16>
    %85 = vector.extract_strided_slice %32 {offsets = [8, 0], sizes = [8, 128], strides = [1, 1]} : vector<16x256xf32> to vector<8x128xf32>
    %86 = arith.truncf %85 : vector<8x128xf32> to vector<8x128xbf16>
    "tpu.trace_start"() <{level = 10 : i32, message = "qd,kd->qk"}> : () -> ()
    %cst_34 = arith.constant dense<0.000000e+00> : vector<8x8xf32>
    %87 = tpu.matmul %82, %84, %cst_34 {dimension_numbers = #tpu.dot_dimension_numbers<[1], [1], [0], [0], [0, 0, 1, 0], [], []>} : vector<8x128xbf16>, vector<8x128xbf16>, vector<8x8xf32> -> vector<8x8xf32>
    "tpu.trace_stop"() : () -> ()
    %88 = arith.addf %87, %33 : vector<8x8xf32>
    %cst_35 = arith.constant dense<0xFF800000> : vector<8xf32>
    %89 = vector.multi_reduction <maximumf>, %88, %cst_35 [1] : vector<8x8xf32> to vector<8xf32>
    %90 = vector.shape_cast %89 : vector<8xf32> to vector<8x1xf32>
    %91 = vector.broadcast %90 : vector<8x1xf32> to vector<8x8xf32>
    %92 = arith.subf %88, %91 : vector<8x8xf32>
    %93 = math.exp %92 : vector<8x8xf32>
    %cst_36 = arith.constant dense<0.000000e+00> : vector<8xf32>
    %94 = vector.multi_reduction <add>, %93, %cst_36 [1] : vector<8x8xf32> to vector<8xf32>
    %95 = vector.shape_cast %94 : vector<8xf32> to vector<8x1xf32>
    %96 = arith.truncf %93 : vector<8x8xf32> to vector<8x8xbf16>
    %cst_37 = arith.constant dense<0.000000e+00> : vector<8x128xf32>
    %97 = tpu.matmul %96, %86, %cst_37 {dimension_numbers = #tpu.dot_dimension_numbers<[1], [0], [0], [1], [0, 0, 1, 1], [], []>} : vector<8x8xbf16>, vector<8x128xbf16>, vector<8x128xf32> -> vector<8x128xf32>
    %98 = tpu.reciprocal %95 {approx = true} : vector<8x1xf32> -> vector<8x1xf32>
    %99 = vector.broadcast %98 : vector<8x1xf32> to vector<8x128xf32>
    %100 = arith.mulf %97, %99 : vector<8x128xf32>
    %101 = arith.truncf %100 : vector<8x128xf32> to vector<8x128xbf16>
    %c0_38 = arith.constant 0 : index
    %c0_39 = arith.constant 0 : index
    %102 = vector.load %arg8[%c0_38, %c0_39] : memref<256x256xbf16, #tpu.memory_space<vmem>>, vector<128x256xbf16>
    %cst_40 = arith.constant dense<0.000000e+00> : vector<8x256xf32>
    %103 = tpu.matmul %101, %102, %cst_40 {dimension_numbers = #tpu.dot_dimension_numbers<[1], [0], [0], [1], [0, 0, 1, 1], [], []>} : vector<8x128xbf16>, vector<128x256xbf16>, vector<8x256xf32> -> vector<8x256xf32>
    %104 = vector.extract_strided_slice %28 {offsets = [8, 128], sizes = [8, 128], strides = [1, 1]} : vector<16x256xf32> to vector<8x128xf32>
    %105 = arith.truncf %104 : vector<8x128xf32> to vector<8x128xbf16>
    %106 = vector.extract_strided_slice %30 {offsets = [8, 128], sizes = [8, 128], strides = [1, 1]} : vector<16x256xf32> to vector<8x128xf32>
    %107 = arith.truncf %106 : vector<8x128xf32> to vector<8x128xbf16>
    %108 = vector.extract_strided_slice %32 {offsets = [8, 128], sizes = [8, 128], strides = [1, 1]} : vector<16x256xf32> to vector<8x128xf32>
    %109 = arith.truncf %108 : vector<8x128xf32> to vector<8x128xbf16>
    "tpu.trace_start"() <{level = 10 : i32, message = "qd,kd->qk"}> : () -> ()
    %cst_41 = arith.constant dense<0.000000e+00> : vector<8x8xf32>
    %110 = tpu.matmul %105, %107, %cst_41 {dimension_numbers = #tpu.dot_dimension_numbers<[1], [1], [0], [0], [0, 0, 1, 0], [], []>} : vector<8x128xbf16>, vector<8x128xbf16>, vector<8x8xf32> -> vector<8x8xf32>
    "tpu.trace_stop"() : () -> ()
    %111 = arith.addf %110, %33 : vector<8x8xf32>
    %cst_42 = arith.constant dense<0xFF800000> : vector<8xf32>
    %112 = vector.multi_reduction <maximumf>, %111, %cst_42 [1] : vector<8x8xf32> to vector<8xf32>
    %113 = vector.shape_cast %112 : vector<8xf32> to vector<8x1xf32>
    %114 = vector.broadcast %113 : vector<8x1xf32> to vector<8x8xf32>
    %115 = arith.subf %111, %114 : vector<8x8xf32>
    %116 = math.exp %115 : vector<8x8xf32>
    %cst_43 = arith.constant dense<0.000000e+00> : vector<8xf32>
    %117 = vector.multi_reduction <add>, %116, %cst_43 [1] : vector<8x8xf32> to vector<8xf32>
    %118 = vector.shape_cast %117 : vector<8xf32> to vector<8x1xf32>
    %119 = arith.truncf %116 : vector<8x8xf32> to vector<8x8xbf16>
    %cst_44 = arith.constant dense<0.000000e+00> : vector<8x128xf32>
    %120 = tpu.matmul %119, %109, %cst_44 {dimension_numbers = #tpu.dot_dimension_numbers<[1], [0], [0], [1], [0, 0, 1, 1], [], []>} : vector<8x8xbf16>, vector<8x128xbf16>, vector<8x128xf32> -> vector<8x128xf32>
    %121 = tpu.reciprocal %118 {approx = true} : vector<8x1xf32> -> vector<8x1xf32>
    %122 = vector.broadcast %121 : vector<8x1xf32> to vector<8x128xf32>
    %123 = arith.mulf %120, %122 : vector<8x128xf32>
    %124 = arith.truncf %123 : vector<8x128xf32> to vector<8x128xbf16>
    %c128_45 = arith.constant 128 : index
    %c0_46 = arith.constant 0 : index
    %125 = vector.load %arg8[%c128_45, %c0_46] : memref<256x256xbf16, #tpu.memory_space<vmem>>, vector<128x256xbf16>
    %cst_47 = arith.constant dense<0.000000e+00> : vector<8x256xf32>
    %126 = tpu.matmul %124, %125, %cst_47 {dimension_numbers = #tpu.dot_dimension_numbers<[1], [0], [0], [1], [0, 0, 1, 1], [], []>} : vector<8x128xbf16>, vector<128x256xbf16>, vector<8x256xf32> -> vector<8x256xf32>
    %127 = arith.addf %103, %126 : vector<8x256xf32>
    %128 = tpu.concatenate %80, %127 in 0 : vector<8x256xf32>, vector<8x256xf32> -> vector<16x256xf32>
    %129 = arith.addf %1, %128 : vector<16x256xf32>
    %c0_48 = arith.constant 0 : index
    %c0_49 = arith.constant 0 : index
    %130 = vector.load %arg9[%c0_48, %c0_49] : memref<1x256xf32, #tpu.memory_space<vmem>>, vector<1x256xf32>
    %131 = vector.broadcast %130 : vector<1x256xf32> to vector<16x256xf32>
    %132 = arith.addf %129, %131 : vector<16x256xf32>
    %c0_50 = arith.constant 0 : index
    %c0_51 = arith.constant 0 : index
    %133 = vector.load %arg10[%c0_50, %c0_51] : memref<1x256xf32, #tpu.memory_space<vmem>>, vector<1x256xf32>
    %c0_52 = arith.constant 0 : index
    %c0_53 = arith.constant 0 : index
    %134 = vector.load %arg11[%c0_52, %c0_53] : memref<1x256xf32, #tpu.memory_space<vmem>>, vector<1x256xf32>
    %cst_54 = arith.constant dense<0.000000e+00> : vector<16xf32>
    %135 = vector.multi_reduction <add>, %132, %cst_54 [1] : vector<16x256xf32> to vector<16xf32>
    %136 = vector.shape_cast %135 : vector<16xf32> to vector<16x1xf32>
    %cst_55 = arith.constant 2.560000e+02 : f32
    %137 = vector.broadcast %cst_55 : f32 to vector<16x1xf32>
    %138 = arith.divf %136, %137 : vector<16x1xf32>
    %139 = vector.broadcast %138 : vector<16x1xf32> to vector<16x256xf32>
    %140 = arith.subf %132, %139 : vector<16x256xf32>
    %141 = arith.mulf %140, %140 : vector<16x256xf32>
    %cst_56 = arith.constant dense<0.000000e+00> : vector<16xf32>
    %142 = vector.multi_reduction <add>, %141, %cst_56 [1] : vector<16x256xf32> to vector<16xf32>
    %143 = vector.shape_cast %142 : vector<16xf32> to vector<16x1xf32>
    %cst_57 = arith.constant 2.560000e+02 : f32
    %144 = vector.broadcast %cst_57 : f32 to vector<16x1xf32>
    %145 = arith.divf %143, %144 : vector<16x1xf32>
    %146 = vector.broadcast %138 : vector<16x1xf32> to vector<16x256xf32>
    %147 = arith.subf %132, %146 : vector<16x256xf32>
    %cst_58 = arith.constant 9.99999974E-6 : f32
    %148 = vector.broadcast %cst_58 : f32 to vector<16x1xf32>
    %149 = arith.addf %145, %148 : vector<16x1xf32>
    %150 = math.rsqrt %149 : vector<16x1xf32>
    %151 = vector.broadcast %150 : vector<16x1xf32> to vector<16x256xf32>
    %152 = arith.mulf %147, %151 : vector<16x256xf32>
    %153 = vector.broadcast %133 : vector<1x256xf32> to vector<16x256xf32>
    %154 = arith.mulf %152, %153 : vector<16x256xf32>
    %155 = vector.broadcast %134 : vector<1x256xf32> to vector<16x256xf32>
    %156 = arith.addf %154, %155 : vector<16x256xf32>
    %157 = arith.truncf %156 : vector<16x256xf32> to vector<16x256xbf16>
    %c0_59 = arith.constant 0 : index
    %c0_60 = arith.constant 0 : index
    %158 = vector.load %arg12[%c0_59, %c0_60] : memref<256x1024xbf16, #tpu.memory_space<vmem>>, vector<256x512xbf16>
    %cst_61 = arith.constant dense<0.000000e+00> : vector<16x512xf32>
    %159 = tpu.matmul %157, %158, %cst_61 {dimension_numbers = #tpu.dot_dimension_numbers<[1], [0], [0], [1], [0, 0, 1, 1], [], []>} : vector<16x256xbf16>, vector<256x512xbf16>, vector<16x512xf32> -> vector<16x512xf32>
    %c0_62 = arith.constant 0 : index
    %c0_63 = arith.constant 0 : index
    %160 = vector.load %arg13[%c0_62, %c0_63] : memref<1x1024xf32, #tpu.memory_space<vmem>>, vector<1x512xf32>
    %161 = vector.broadcast %160 : vector<1x512xf32> to vector<16x512xf32>
    %162 = arith.addf %159, %161 : vector<16x512xf32>
    %cst_64 = arith.constant 5.000000e-01 : f32
    %163 = vector.broadcast %cst_64 : f32 to vector<16x512xf32>
    %164 = arith.mulf %163, %162 : vector<16x512xf32>
    %cst_65 = arith.constant 0.636619746 : f32
    %165 = math.sqrt %cst_65 : f32
    %166 = arith.mulf %162, %162 : vector<16x512xf32>
    %167 = arith.mulf %162, %166 : vector<16x512xf32>
    %cst_66 = arith.constant 4.471500e-02 : f32
    %168 = vector.broadcast %cst_66 : f32 to vector<16x512xf32>
    %169 = arith.mulf %168, %167 : vector<16x512xf32>
    %170 = arith.addf %162, %169 : vector<16x512xf32>
    %171 = vector.broadcast %165 : f32 to vector<16x512xf32>
    %172 = arith.mulf %171, %170 : vector<16x512xf32>
    %173 = math.tanh %172 : vector<16x512xf32>
    %cst_67 = arith.constant 1.000000e+00 : f32
    %174 = vector.broadcast %cst_67 : f32 to vector<16x512xf32>
    %175 = arith.addf %174, %173 : vector<16x512xf32>
    %176 = arith.mulf %164, %175 : vector<16x512xf32>
    %177 = arith.truncf %176 : vector<16x512xf32> to vector<16x512xbf16>
    %c0_68 = arith.constant 0 : index
    %c0_69 = arith.constant 0 : index
    %178 = vector.load %arg14[%c0_68, %c0_69] : memref<1024x256xbf16, #tpu.memory_space<vmem>>, vector<512x256xbf16>
    %cst_70 = arith.constant dense<0.000000e+00> : vector<16x256xf32>
    %179 = tpu.matmul %177, %178, %cst_70 {dimension_numbers = #tpu.dot_dimension_numbers<[1], [0], [0], [1], [0, 0, 1, 1], [], []>} : vector<16x512xbf16>, vector<512x256xbf16>, vector<16x256xf32> -> vector<16x256xf32>
    %c0_71 = arith.constant 0 : index
    %c512 = arith.constant 512 : index
    %180 = vector.load %arg12[%c0_71, %c512] : memref<256x1024xbf16, #tpu.memory_space<vmem>>, vector<256x512xbf16>
    %cst_72 = arith.constant dense<0.000000e+00> : vector<16x512xf32>
    %181 = tpu.matmul %157, %180, %cst_72 {dimension_numbers = #tpu.dot_dimension_numbers<[1], [0], [0], [1], [0, 0, 1, 1], [], []>} : vector<16x256xbf16>, vector<256x512xbf16>, vector<16x512xf32> -> vector<16x512xf32>
    %c0_73 = arith.constant 0 : index
    %c512_74 = arith.constant 512 : index
    %182 = vector.load %arg13[%c0_73, %c512_74] : memref<1x1024xf32, #tpu.memory_space<vmem>>, vector<1x512xf32>
    %183 = vector.broadcast %182 : vector<1x512xf32> to vector<16x512xf32>
    %184 = arith.addf %181, %183 : vector<16x512xf32>
    %cst_75 = arith.constant 5.000000e-01 : f32
    %185 = vector.broadcast %cst_75 : f32 to vector<16x512xf32>
    %186 = arith.mulf %185, %184 : vector<16x512xf32>
    %cst_76 = arith.constant 0.636619746 : f32
    %187 = math.sqrt %cst_76 : f32
    %188 = arith.mulf %184, %184 : vector<16x512xf32>
    %189 = arith.mulf %184, %188 : vector<16x512xf32>
    %cst_77 = arith.constant 4.471500e-02 : f32
    %190 = vector.broadcast %cst_77 : f32 to vector<16x512xf32>
    %191 = arith.mulf %190, %189 : vector<16x512xf32>
    %192 = arith.addf %184, %191 : vector<16x512xf32>
    %193 = vector.broadcast %187 : f32 to vector<16x512xf32>
    %194 = arith.mulf %193, %192 : vector<16x512xf32>
    %195 = math.tanh %194 : vector<16x512xf32>
    %cst_78 = arith.constant 1.000000e+00 : f32
    %196 = vector.broadcast %cst_78 : f32 to vector<16x512xf32>
    %197 = arith.addf %196, %195 : vector<16x512xf32>
    %198 = arith.mulf %186, %197 : vector<16x512xf32>
    %199 = arith.truncf %198 : vector<16x512xf32> to vector<16x512xbf16>
    %c512_79 = arith.constant 512 : index
    %c0_80 = arith.constant 0 : index
    %200 = vector.load %arg14[%c512_79, %c0_80] : memref<1024x256xbf16, #tpu.memory_space<vmem>>, vector<512x256xbf16>
    %cst_81 = arith.constant dense<0.000000e+00> : vector<16x256xf32>
    %201 = tpu.matmul %199, %200, %cst_81 {dimension_numbers = #tpu.dot_dimension_numbers<[1], [0], [0], [1], [0, 0, 1, 1], [], []>} : vector<16x512xbf16>, vector<512x256xbf16>, vector<16x256xf32> -> vector<16x256xf32>
    %202 = arith.addf %179, %201 : vector<16x256xf32>
    %203 = arith.addf %132, %202 : vector<16x256xf32>
    %c0_82 = arith.constant 0 : index
    %c0_83 = arith.constant 0 : index
    %204 = vector.load %arg15[%c0_82, %c0_83] : memref<1x256xf32, #tpu.memory_space<vmem>>, vector<1x256xf32>
    %205 = vector.broadcast %204 : vector<1x256xf32> to vector<16x256xf32>
    %206 = arith.addf %203, %205 : vector<16x256xf32>
    %207 = vector.shape_cast %206 : vector<16x256xf32> to vector<2x8x256xf32>
    %c0_84 = arith.constant 0 : index
    %c0_85 = arith.constant 0 : index
    %c0_86 = arith.constant 0 : index
    %208 = vector.load %arg16[%c0_84, %c0_85, %c0_86] : memref<2x8x256xf32, #tpu.memory_space<vmem>>, vector<2x8x256xf32>
    tpu.vector_store %arg16[%c0_84, %c0_85, %c0_86], %207 {strides = array<i32>} : memref<2x8x256xf32, #tpu.memory_space<vmem>>, vector<2x8x256xf32>,
    return
  }
  func.func @transform_0(%arg0: i32) -> (i32, i32, i32) {
    %c0_i32 = arith.constant 0 : i32
    %c0_i32_0 = arith.constant 0 : i32
    %c0_i32_1 = arith.constant 0 : i32
    return %arg0, %c0_i32, %c0_i32_0 : i32, i32, i32
  }
  func.func @transform_1(%arg0: i32) -> (i32, i32) {
    %c0_i32 = arith.constant 0 : i32
    %c0_i32_0 = arith.constant 0 : i32
    %c0_i32_1 = arith.constant 0 : i32
    return %c0_i32, %c0_i32_0 : i32, i32
  }
  func.func @transform_2(%arg0: i32) -> (i32, i32) {
    %c0_i32 = arith.constant 0 : i32
    %c0_i32_0 = arith.constant 0 : i32
    %c0_i32_1 = arith.constant 0 : i32
    return %c0_i32, %c0_i32_0 : i32, i32
  }
  func.func @transform_3(%arg0: i32) -> (i32, i32) {
    %c0_i32 = arith.constant 0 : i32
    %c0_i32_0 = arith.constant 0 : i32
    %c0_i32_1 = arith.constant 0 : i32
    return %c0_i32, %c0_i32_0 : i32, i32
  }
  func.func @transform_4(%arg0: i32) -> (i32, i32) {
    %c0_i32 = arith.constant 0 : i32
    %c0_i32_0 = arith.constant 0 : i32
    %c0_i32_1 = arith.constant 0 : i32
    return %c0_i32, %c0_i32_0 : i32, i32
  }
  func.func @transform_5(%arg0: i32) -> (i32, i32) {
    %c0_i32 = arith.constant 0 : i32
    %c0_i32_0 = arith.constant 0 : i32
    %c0_i32_1 = arith.constant 0 : i32
    return %c0_i32, %c0_i32_0 : i32, i32
  }
  func.func @transform_6(%arg0: i32) -> (i32, i32) {
    %c0_i32 = arith.constant 0 : i32
    %c0_i32_0 = arith.constant 0 : i32
    %c0_i32_1 = arith.constant 0 : i32
    return %c0_i32, %c0_i32_0 : i32, i32
  }
  func.func @transform_7(%arg0: i32) -> (i32, i32) {
    %c0_i32 = arith.constant 0 : i32
    %c0_i32_0 = arith.constant 0 : i32
    %c0_i32_1 = arith.constant 0 : i32
    return %c0_i32, %c0_i32_0 : i32, i32
  }
  func.func @transform_8(%arg0: i32) -> (i32, i32) {
    %c0_i32 = arith.constant 0 : i32
    %c0_i32_0 = arith.constant 0 : i32
    %c0_i32_1 = arith.constant 0 : i32
    return %c0_i32, %c0_i32_0 : i32, i32
  }
  func.func @transform_9(%arg0: i32) -> (i32, i32) {
    %c0_i32 = arith.constant 0 : i32
    %c0_i32_0 = arith.constant 0 : i32
    %c0_i32_1 = arith.constant 0 : i32
    return %c0_i32, %c0_i32_0 : i32, i32
  }
  func.func @transform_10(%arg0: i32) -> (i32, i32) {
    %c0_i32 = arith.constant 0 : i32
    %c0_i32_0 = arith.constant 0 : i32
    %c0_i32_1 = arith.constant 0 : i32
    return %c0_i32, %c0_i32_0 : i32, i32
  }
  func.func @transform_11(%arg0: i32) -> (i32, i32) {
    %c0_i32 = arith.constant 0 : i32
    %c0_i32_0 = arith.constant 0 : i32
    %c0_i32_1 = arith.constant 0 : i32
    return %c0_i32, %c0_i32_0 : i32, i32
  }
  func.func @transform_12(%arg0: i32) -> (i32, i32) {
    %c0_i32 = arith.constant 0 : i32
    %c0_i32_0 = arith.constant 0 : i32
    %c0_i32_1 = arith.constant 0 : i32
    return %c0_i32, %c0_i32_0 : i32, i32
  }
  func.func @transform_13(%arg0: i32) -> (i32, i32) {
    %c0_i32 = arith.constant 0 : i32
    %c0_i32_0 = arith.constant 0 : i32
    %c0_i32_1 = arith.constant 0 : i32
    return %c0_i32, %c0_i32_0 : i32, i32
  }
  func.func @transform_14(%arg0: i32) -> (i32, i32) {
    %c0_i32 = arith.constant 0 : i32
    %c0_i32_0 = arith.constant 0 : i32
    %c0_i32_1 = arith.constant 0 : i32
    return %c0_i32, %c0_i32_0 : i32, i32
  }
  func.func @transform_15(%arg0: i32) -> (i32, i32, i32) {
    %c0_i32 = arith.constant 0 : i32
    %c0_i32_0 = arith.constant 0 : i32
    %c0_i32_1 = arith.constant 0 : i32
    return %arg0, %c0_i32, %c0_i32_0 : i32, i32, i32
  }
}

</mosaic_0001>

<bundles_post_ra>
// kernel: tpu_custom_call.1
= control target key start
LH: loop header
LB: loop body
LE: loop exit
PB: predicated region body
PF: predicated region fallthrough
CT: control target
= control target key end

     0   :  { %s8193_s0 = inlined_call_operand.hbm [shape: f32[4,8,256], index: 0, kind: input, shape index: {}]   ;;  %s8194_s1 = inlined_call_operand.hbm [shape: f32[8,8], index: 1, kind: input, shape index: {}]   ;;  %s8195_s2 = inlined_call_operand.hbm [shape: f32[1,256], index: 2, kind: input, shape index: {}]   ;;  %s8196_s3 = inlined_call_operand.vmem [shape: f32[1,256], index: 3, kind: input, shape index: {}]   ;;  %s8197_s4 = inlined_call_operand.hbm [shape: bf16[256,256], index: 4, kind: input, shape index: {}]   ;;  %s8198_s5 = inlined_call_operand.hbm [shape: bf16[256,256], index: 5, kind: input, shape index: {}]   ;;  %s8199_s6 = inlined_call_operand.hbm [shape: bf16[256,256], index: 6, kind: input, shape index: {}]   ;;  %s8200_s7 = inlined_call_operand.hbm [shape: bf16[256,256], index: 7, kind: input, shape index: {}]   ;;  %s8201_s8 = inlined_call_operand.hbm [shape: f32[1,256], index: 8, kind: input, shape index: {}]   ;;  %s8202_s9 = inlined_call_operand.hbm [shape: f32[1,256], index: 9, kind: input, shape index: {}]   ;;  %s8203_s10 = inlined_call_operand.hbm [shape: f32[1,256], index: 10, kind: input, shape index: {}]   ;;  %s8204_s11 = inlined_call_operand.hbm [shape: bf16[256,1024], index: 11, kind: input, shape index: {}]   ;;  %s8205_s12 = inlined_call_operand.vmem [shape: f32[1,1024], index: 12, kind: input, shape index: {}]   ;;  %s8206_s13 = inlined_call_operand.hbm [shape: bf16[1024,256], index: 13, kind: input, shape index: {}]   ;;  %s8207_s14 = inlined_call_operand.vmem [shape: f32[1,256], index: 14, kind: input, shape index: {}]   ;;  %s8208_s15 = inlined_call_operand.hbm [shape: f32[4,8,256], index: 15, kind: output, shape index: {}]  }
   0x1   :  { %8211 = sst [smem:[#allocation31_spill]] %s8194_s1 }
   0x2   :  { %8212 = sst [smem:[#allocation32_spill]] %s8195_s2 }
   0x3   :  { %8213 = sst [smem:[#allocation33_spill]] %s8197_s4 }
   0x4   :  { %8214 = sst [smem:[#allocation34_spill]] %s8198_s5 }
   0x5   :  { %8215 = sst [smem:[#allocation35_spill]] %s8199_s6 }
   0x6   :  { %8216 = sst [smem:[#allocation36_spill]] %s8200_s7 }
   0x7   :  { %8217 = sst [smem:[#allocation37_spill]] %s8201_s8 }
   0x8   :  { %8218 = sst [smem:[#allocation38_spill]] %s8205_s12 }
   0x9   :  { %8219 = sst [smem:[#allocation39_spill]] %s8207_s14 }
   0xa   :  { %8220 = sst [smem:[#allocation40_spill]] %s8208_s15 }
   0xb   :  { %20 = vsyncpa [#allocation3], 0 }
   0xc   :  { %22 = vsyncpa [#allocation3 + $0x1], 0 }
   0xd   :  { %23 = vsyncpa [#allocation6], 0 }
   0xe   :  { %24 = vsyncpa [#allocation9], 0 }
   0xf   :  { %25 = vsyncpa [#allocation12], 0 }
  0x10   :  { %26 = vsyncpa [#allocation15], 0 }
  0x11   :  { %27 = vsyncpa [#allocation18], 0 }
  0x12   :  { %28 = vsyncpa [#allocation21], 0 }
  0x13   :  { %29 = vsyncpa [#allocation4], 0 }
  0x14   :  { %31 = vsyncpa [#allocation4 + $0x1], 0  ;;  %s7562_s18 = smov 0   ;;  %s7564_s19 = smov 0  }
  0x15   :  { %s7566_s20 = smov 0   ;;  %s7568_s21 = smov 0  }
  0x16 LB: > { %s8221_s1 = sld [smem:[#allocation31_spill]]  ;;  %s7586_s25 = sadd.s32 4294967295, %s7460_s21   ;;  %s7460_s21 = sphi %s7568_s21, %s8242_s21   ;;  %s7456_s20 = sphi %s7566_s20, %s8241_s20   ;;  %s7452_s19 = sphi %s7564_s19, %s8240_s19   ;;  %s7448_s18 = sphi %s7562_s18, %s8239_s18  }
  0x17   : > { %p4657_p0 = scmp.ge.s32.totalorder %s7460_s21, 1  ;;  %p58_p1 = scmp.eq.s32.totalorder %s7586_s25, 0 }
  0x18   : > { %p388_p2 = scmp.lt.s32.totalorder %s7460_s21, 3  ;;  %s7462_s27 = smov [#allocation5]  }
  0x19   : > { %s402_s28 = sshll.u32 %s7462_s27, 4  ;;  %s8223_s4 = sld [smem:[#allocation33_spill]]  ;;  %s403_s28 = int_to_ptr.vmem [resolvable:$true] %s402_s28 }
  0x1a   : > { %p7591_p3 = pnand %p4657_p0, %p388_p2  ;;  %s7463_s22 = smov [#allocation8]  }
  0x1b   : > { %s428_s23 = sshll.u32 %s7463_s22, 4  ;;  %s7464_s27 = smov 128   ;;  %s429_s23 = int_to_ptr.vmem [resolvable:$true] %s428_s23 }
  0x1c   : > { %s400_s24 = sshll.u32 %s8221_s1, 4  ;;  %p6830_p5 = pneg %p7591_p3  ;;  %s401_s24 = int_to_ptr.hbm [resolvable:$true] %s400_s24 }
  0x1d   : > { %s7465_s1 = smov 8   ;;  %s8225_s6 = sld [smem:[#allocation35_spill]] }
  0x1e   : > { %p7603_p6 = pnand %p6830_p5, %p58_p1  ;;  %s7466_s15 = smov [#allocation11]  }
  0x1f   : > { %s426_s16 = sshll.u32 %s8223_s4, 4  ;;  %s456_s14 = sshll.u32 %s7466_s15, 4  ;;  %s427_s16 = int_to_ptr.hbm [resolvable:$true] %s426_s16  ;;  %s457_s14 = int_to_ptr.vmem [resolvable:$true] %s456_s14 }
  0x20   : > { %6833 = dma.hbm_to_vmem [thread:$0]  (!%p7603_p6), %s401_s24, 128, %s403_s28, [#allocation6]  }
  0x21   : > { %6839 = dma.hbm_to_vmem [thread:$0]  (!%p7603_p6), %s427_s16, 4096, %s429_s23, [#allocation9], %s7464_s27, %s7464_s27, %s7465_s1  }
  0x22   : > { %s8226_s8 = sld [smem:[#allocation37_spill]]  ;;  %s7467_s28 = smov [#allocation14]  }
  0x23   : > { %s454_s4 = sshll.u32 %s8225_s6, 4  ;;  %s485_s16 = sshll.u32 %s7467_s28, 4  ;;  %s455_s4 = int_to_ptr.hbm [resolvable:$true] %s454_s4  ;;  %s486_s16 = int_to_ptr.vmem [resolvable:$true] %s485_s16 }
  0x24   : > { %6845 = dma.hbm_to_vmem [thread:$0]  (!%p7603_p6), %s455_s4, 4096, %s457_s14, [#allocation12], %s7464_s27, %s7464_s27, %s7465_s1  }
  0x25   : > { %s507_s30 = sshll.u32 %s8203_s10, 4  ;;  %s8227_s2 = sld [smem:[#allocation32_spill]]  ;;  %s508_s30 = int_to_ptr.hbm [resolvable:$true] %s507_s30 }
  0x26   : > { %s7468_s6 = smov [#allocation17]   ;;  %s7469_s4 = smov [#allocation7]  }
  0x27   : > { %s414_s14 = sshll.u32 %s7469_s4, 4  ;;  %s8228_s5 = sld [smem:[#allocation34_spill]]  ;;  %s415_s14 = int_to_ptr.vmem [resolvable:$true] %s414_s14 }
  0x28   : > { %s483_s24 = sshll.u32 %s8226_s8, 4  ;;  %s509_s8 = sshll.u32 %s7468_s6, 4  ;;  %s484_s24 = int_to_ptr.hbm [resolvable:$true] %s483_s24  ;;  %s510_s8 = int_to_ptr.vmem [resolvable:$true] %s509_s8 }
  0x29   : > { %6851 = dma.hbm_to_vmem [thread:$0]  (!%p7603_p6), %s484_s24, 32, %s486_s16, [#allocation15]  }
  0x2a   : > { %6857 = dma.hbm_to_vmem [thread:$0]  (!%p7603_p6), %s508_s30, 32, %s510_s8, [#allocation18]  }
  0x2b   : > { %s412_s22 = sshll.u32 %s8227_s2, 4  ;;  %s8229_s7 = sld [smem:[#allocation36_spill]]  ;;  %s413_s22 = int_to_ptr.hbm [resolvable:$true] %s412_s22 }
  0x2c   : > { %6836 = dma.hbm_to_vmem [thread:$0]  (!%p7603_p6), %s413_s22, 32, %s415_s14, [#allocation6]  }
  0x2d   : > { %s440_s29 = sshll.u32 %s8228_s5, 4  ;;  %s7470_s6 = smov [#allocation10]   ;;  %s441_s29 = int_to_ptr.hbm [resolvable:$true] %s440_s29 }
  0x2e   : > { %s442_s12 = sshll.u32 %s7470_s6, 4  ;;  %s7471_s8 = smov [#allocation13]   ;;  %s443_s12 = int_to_ptr.vmem [resolvable:$true] %s442_s12 }
  0x2f   : > { %6842 = dma.hbm_to_vmem [thread:$0]  (!%p7603_p6), %s441_s29, 4096, %s443_s12, [#allocation9], %s7464_s27, %s7464_s27, %s7465_s1  }
  0x30   : > { %s470_s30 = sshll.u32 %s7471_s8, 4  ;;  %s495_s22 = sshll.u32 %s8202_s9, 4  ;;  %s471_s30 = int_to_ptr.vmem [resolvable:$true] %s470_s30  ;;  %s496_s22 = int_to_ptr.hbm [resolvable:$true] %s495_s22 }
  0x31   : > { %s468_s15 = sshll.u32 %s8229_s7, 4  ;;  %s518_s24 = sshll.u32 %s8204_s11, 4  ;;  %s469_s15 = int_to_ptr.hbm [resolvable:$true] %s468_s15  ;;  %s519_s24 = int_to_ptr.hbm [resolvable:$true] %s518_s24 }
  0x32   : > { %6848 = dma.hbm_to_vmem [thread:$0]  (!%p7603_p6), %s469_s15, 4096, %s471_s30, [#allocation12], %s7464_s27, %s7464_s27, %s7465_s1  }
  0x33   : > { %s7472_s16 = smov [#allocation16]   ;;  %s7473_s6 = smov [#allocation19]  }
  0x34   : > { %s497_s29 = sshll.u32 %s7472_s16, 4  ;;  %s520_s12 = sshll.u32 %s7473_s6, 4  ;;  %s498_s29 = int_to_ptr.vmem [resolvable:$true] %s497_s29  ;;  %s521_s12 = int_to_ptr.vmem [resolvable:$true] %s520_s12 }
  0x35   : > { %6854 = dma.hbm_to_vmem [thread:$0]  (!%p7603_p6), %s496_s22, 32, %s498_s29, [#allocation15]  }
  0x36   : > { %s7474_s15 = smov 512   ;;  %s7475_s8 = smov 32  }
  0x37   : > { %6860 = dma.hbm_to_vmem [thread:$0]  (!%p7603_p6), %s519_s24, 16384, %s521_s12, [#allocation18], %s7474_s15, %s7474_s15, %s7475_s8  }
  0x38   : > { %s535_s28 = sshll.u32 %s8206_s13, 4  ;;  %s7476_s22 = smov [#allocation20]   ;;  %s536_s28 = int_to_ptr.hbm [resolvable:$true] %s535_s28 }
  0x39   : > { %s537_s14 = sshll.u32 %s7476_s22, 4  ;;  %s4656_s23 = sadd.s32 4294967294, %s7460_s21   ;;  %s538_s14 = int_to_ptr.vmem [resolvable:$true] %s537_s14 }
  0x3a   : > { %6863 = dma.hbm_to_vmem [thread:$0]  (!%p7603_p6), %s536_s28, 16384, %s538_s14, [#allocation21], %s7464_s27, %s7464_s27, %s7465_s1  }
  0x3b   : > { %s7673_s16 = sadd.s32 1, %s7460_s21   ;;  %s44_s24 = sadd.s32 1, %s7456_s20 }
  0x3c   : > { %s41_s29 = ssub.s32 %s7460_s21, %s7673_s16  ;;  %p51_p7 = scmp.ne.s32.totalorder %s7456_s20, %s7452_s19 }
  0x3d   : > { %p42_p8 = scmp.eq.s32.totalorder %s41_s29, 0  ;;  %p52_p9 = scmp.eq.s32.totalorder %s7460_s21, 0 }
  0x3e   : > { %p57_p10 = scmp.ne.s32.totalorder %s7452_s19, %s7448_s18  ;;  %p375_p11 = scmp.eq.s32.totalorder %s7586_s25, 1 }
  0x3f   : > { %s7685_s6 = scalar_select %p42_p8, %s7456_s20, %s44_s24  }
  0x40   : > { %p7687_p12 = por %p52_p9, %p51_p7  ;;  %p7693_p13 = por %p58_p1, %p57_p10 }
  0x41   : > { %p7697_p0 = por %p375_p11, %p51_p7  ;;  %p381_p2 = scmp.eq.s32.totalorder %s4656_s23, 1 }
  0x42   : > { %p6883_p5 = scmp.lt.s32.totalorder %s7460_s21, 2  ;;  %s554_s12 = sand.u32 1, %s7456_s20  }
  0x43   : > { %p7703_p6 = por %p381_p2, %p57_p10  ;;  %s4670_s8 = sshll.u32 %s554_s12, 5 }
  0x44   : > { %s6363_s30 = sshll.u32 %s7460_s21, 5  ;;  %s558_s24 = scalar_lea.vmem [#allocation2], %s4670_s8 }
  0x45   : > { %s564_s22 = scalar_lea.hbm %s8193_s0, %s6363_s30  ;;  %s567_s29 = sshll.u32 %s558_s24, 4  ;;  %s568_s29 = int_to_ptr.vmem [resolvable:$true] %s567_s29 }
  0x46   : > { %s565_s14 = sshll.u32 %s564_s22, 4  ;;  %p7713_p7 = pnand %p6883_p5, %p7687_p12  ;;  %s566_s14 = int_to_ptr.hbm [resolvable:$true] %s565_s14 }
  0x47   : > { %s555_s2 = scalar_lea.sflag [#allocation3], %s554_s12  ;;  %s7340_s5 = sshra.s32 %s566_s14, 4  ;;  %s7341_s5 = int_to_ptr.hbm [resolvable:$true] %s7340_s5 }
  0x48   : > { %s7342_s7 = scalar_lea.hbm %s7341_s5, 32  ;;  %p7344_p9 = pneg %p7713_p7 }
  0x49   : > { %p7343_p8 = scmp.ne.s32.totalorder %s7341_s5, %s7342_s7  ;;  %s7347_s4 = scalar_lea.hbm %s8193_s0, 64 }
  0x4a   : > { %p7348_p12 = scmp.lt.s32.totalorder %s7341_s5, %s8193_s0  ;;  %p7349_p2 = scmp.lt.s32.totalorder %s7347_s4, %s7342_s7 }
  0x4b   : > { %p7345_p10 = pnand %p7344_p9, %p7343_p8 }
  0x4c   : > { %p7350_p5 = por %p7349_p2, %p7348_p12 }
  0x4d   : > { %p7346_p11 = pneg %p7345_p10 }
  0x4f   : > { %p7351_p4 = pnand %p7350_p5, %p7346_p11 }
  0x51   : > { %7354 = shalt.err (!%p7351_p4)
}
  0x52   : > { %s7477_s12 = smov 256   ;;  %s7478_s22 = smov 16  }
  0x53   : > { %6867 = dma.hbm_to_vmem [thread:$0]  (!%p7713_p7), %s566_s14, 512, %s568_s29, %s555_s2, %s7477_s12, %s7477_s12, %s7478_s22  }
  0x54   : > { %579 = sbr.rel (%p7591_p3) target bundleno = 2204 (0x89c), region = 80  ;;  %s7730_s24 = sand.u32 (!%p7591_p3), 1, %s7452_s19  }
  0x55   : > { %s4675_s5 = sshll.u32 (!%p7591_p3), %s7730_s24, 5  ;;  %s582_s7 = scalar_lea.sflag (!%p7591_p3), [#allocation3], %s7730_s24 }
  0x56   : > { %s7736_s30 = scalar_lea.vmem (!%p7591_p3), [#allocation2], %s4675_s5 }
  0x59   : > { %7415 = dma.done.wait (%p7693_p13), %s582_s7, 512  }
  0x5a   : > { %7417 = vsyncadd (%p7693_p13), %s582_s7, 4294966784 }
  0x5b   : > { %7419 = dma.done.wait (%p58_p1), [#allocation6], 160  }
  0x5c   : > { %7421 = vsyncadd (%p58_p1), [#allocation6], 4294967136 }
  0x5d   : > { %7423 = dma.done.wait (%p58_p1), [#allocation9], 8192  }
  0x5e   : > { %7425 = vsyncadd (%p58_p1), [#allocation9], 4294959104 }
  0x5f   : > { %7427 = dma.done.wait (%p58_p1), [#allocation12], 8192  }
  0x60   : > { %7429 = vsyncadd (%p58_p1), [#allocation12], 4294959104 }
  0x61   : > { %7431 = dma.done.wait (%p58_p1), [#allocation15], 64  }
  0x62   : > { %7433 = vsyncadd (%p58_p1), [#allocation15], 4294967232 }
  0x63   : > { %7435 = dma.done.wait (%p58_p1), [#allocation18], 16416  }
  0x64   : > { %7437 = vsyncadd (%p58_p1), [#allocation18], 4294950880 }
  0x65   : > { %7439 = dma.done.wait (%p58_p1), [#allocation21], 16384  }
  0x66   : > { %7441 = vsyncadd (%p58_p1), [#allocation21], 4294950912  ;;  %v7767_v0 = vld [vmem:[%s7736_s30] sm:$0xff]  ;;  %v7770_v1 = vld [vmem:[%s7736_s30 + $0x8] sm:$0xff]  ;;  %v7479_v6 = vmov 256.0   ;;  %vm1549_vm7 = vcmask 1043456  }
  0x67   : > { %v697_v2 = vadd.f32 %v7770_v1, %v7767_v0  ;;  %v7775_v3 = vld [vmem:[%s7736_s30 + $0x10] sm:$0xff]  ;;  %v7778_v4 = vld [vmem:[%s7736_s30 + $0x18] sm:$0xff]  ;;  %6948 = vrcp.f32 %v7479_v6  ;;  %v6379_v11 = vld [vmem:[#allocation8 + $0x74] sm:$0xf0]  ;;  %vm1535_vm8 = vcmask 64512   ;;  %s8235_s29 = sld [smem:[#allocation38_spill]] }
  0x68   : > { %v700_v5 = vadd.f32 %v7778_v4, %v7775_v3  ;;  %v4746_v10 = vld [vmem:[#allocation8 + $0x70] sm:$0xf]  ;;  %v6395_v14 = vld [vmem:[#allocation8 + $0xf4] sm:$0xf0]  ;;  %v6378_v15 = vld [vmem:[#allocation8 + $0x74] sm:$0xf] }
  0x69   : > { %698 = vadd.xlane.f32.xlu0 %v697_v2  ;;  %v4810_v12 = vld [vmem:[#allocation8 + $0xf0] sm:$0xf]  ;;  %v4747_v13 = vor.u32 %v6379_v11, %v4746_v10  ;;  %v4748_v16 = vld [vmem:[#allocation8 + $0x78] sm:$0xf0]  ;;  %v6394_v19 = vld [vmem:[#allocation8 + $0xf4] sm:$0xf] }
  0x6a   : > { %v4811_v17 = vor.u32 %v6395_v14, %v4810_v12  ;;  %v4751_v18 = vor.u32 %v6378_v15, %v4748_v16  ;;  %v4812_v20 = vld [vmem:[#allocation8 + $0xf8] sm:$0xf0]  ;;  %v4738_v21 = vld [vmem:[#allocation8 + $0x60] sm:$0xf]  ;;  %v6377_v23 = vld [vmem:[#allocation8 + $0x64] sm:$0xf0] }
  0x6b   : > { %966 = vmatpush.bf16.msra.mxu0 %v4747_v13  ;;  %v4815_v22 = vor.u32 %v6394_v19, %v4812_v20  ;;  %v4802_v24 = vld [vmem:[#allocation8 + $0xe0] sm:$0xf]  ;;  %v6393_v25 = vld [vmem:[#allocation8 + $0xe4] sm:$0xf0]  ;;  %v4739_v26 = vor.u32 %v6377_v23, %v4738_v21  ;;  %v6376_v28 = vld [vmem:[#allocation8 + $0x64] sm:$0xf] }
  0x6c   : > { %980 = vmatpush.bf16.msra.mxu1 %v4811_v17  ;;  %994 = vmatpush.bf16.msra.mxu2 %v4751_v18  ;;  %v4803_v27 = vor.u32 %v6393_v25, %v4802_v24  ;;  %v4740_v29 = vld [vmem:[#allocation8 + $0x68] sm:$0xf0]  ;;  %v6392_v30 = vld [vmem:[#allocation8 + $0xe4] sm:$0xf]  ;;  %v4730_v34 = vld [vmem:[#allocation8 + $0x50] sm:$0xf] }
  0x6d   : > { %v7782_v7 = vpop.eup %6948  ;;  %1008 = vmatpush.bf16.msra.mxu3 %v4815_v22  ;;  %v4743_v32 = vor.u32 %v6376_v28, %v4740_v29  ;;  %v4804_v33 = vld [vmem:[#allocation8 + $0xe8] sm:$0xf0]  ;;  %v6375_v35 = vld [vmem:[#allocation8 + $0x54] sm:$0xf0]  ;;  %v4794_v37 = vld [vmem:[#allocation8 + $0xd0] sm:$0xf] }
  0x6e   : > { %v704_v8 = vmul.f32 256.0, %v7782_v7  ;;  %v4807_v36 = vor.u32 %v6392_v30, %v4804_v33  ;;  %v6391_v38 = vld [vmem:[#allocation8 + $0xd4] sm:$0xf0]  ;;  %v6374_v39 = vld [vmem:[#allocation8 + $0x54] sm:$0xf]  ;;  %v4731_v40 = vor.u32 %v6375_v35, %v4730_v34  ;;  %vm708_vm0 = vweird.f32 %v7782_v7  ;;  %s8236_s17 = sld [smem:[#allocation39_spill]] }
  0x6f   : > { %967 = vmatpush.bf16.msra.mxu0 %v4739_v26  ;;  %v4732_v41 = vld [vmem:[#allocation8 + $0x58] sm:$0xf0]  ;;  %v6390_v42 = vld [vmem:[#allocation8 + $0xd4] sm:$0xf]  ;;  %v4795_v44 = vor.u32 %v6391_v38, %v4794_v37  ;;  %v4722_v46 = vld [vmem:[#allocation8 + $0x40] sm:$0xf] }
  0x70   : > { %v705_v9 = vsub.f32 1.0, %v704_v8  ;;  %v4796_v43 = vld [vmem:[#allocation8 + $0xd8] sm:$0xf0]  ;;  %981 = vmatpush.bf16.msra.mxu1 %v4803_v27  ;;  %995 = vmatpush.bf16.msra.mxu2 %v4743_v32  ;;  %v4735_v45 = vor.u32 %v6374_v39, %v4732_v41  ;;  %v6373_v47 = vld [vmem:[#allocation8 + $0x44] sm:$0xf0]  ;;  %s8150_s12 = scalar_lea.vmem [#allocation22], %s4675_s5 }
  0x71   : > { %701 = vadd.xlane.f32.xlu0 %v700_v5  ;;  %v4786_v48 = vld [vmem:[#allocation8 + $0xc0] sm:$0xf]  ;;  %1009 = vmatpush.bf16.msra.mxu3 %v4807_v36  ;;  %v4799_v50 = vor.u32 %v6390_v42, %v4796_v43  ;;  %v6389_v51 = vld [vmem:[#allocation8 + $0xc4] sm:$0xf0]  ;;  %v6372_v52 = vld [vmem:[#allocation8 + $0x44] sm:$0xf]  ;;  %v4723_v56 = vor.u32 %v6373_v47, %v4722_v46 }
  0x72   : > { %v706_v31 = vmul.f32 %v7782_v7, %v705_v9  ;;  %v4724_v53 = vld [vmem:[#allocation8 + $0x48] sm:$0xf0]  ;;  %v6388_v54 = vld [vmem:[#allocation8 + $0xc4] sm:$0xf]  ;;  %v4787_v57 = vor.u32 %v6389_v51, %v4786_v48  ;;  %v4714_v59 = vld [vmem:[#allocation8 + $0x30] sm:$0xf] }
  0x73   : > { %v4788_v55 = vld [vmem:[#allocation8 + $0xc8] sm:$0xf0]  ;;  %968 = vmatpush.bf16.msra.mxu0 %v4731_v40  ;;  %v4727_v58 = vor.u32 %v6372_v52, %v4724_v53  ;;  %v6371_v60 = vld [vmem:[#allocation8 + $0x34] sm:$0xf0]  ;;  %v4778_v61 = vld [vmem:[#allocation8 + $0xb0] sm:$0xf] }
  0x74   : > { %v707_v49 = vadd.f32 %v7782_v7, %v706_v31  ;;  %982 = vmatpush.bf16.msra.mxu1 %v4795_v44  ;;  %996 = vmatpush.bf16.msra.mxu2 %v4735_v45  ;;  %v4791_v63 = vor.u32 %v6388_v54, %v4788_v55  ;;  %v6387_v2 = vld [vmem:[#allocation8 + $0xb4] sm:$0xf0]  ;;  %v6370_v5 = vld [vmem:[#allocation8 + $0x34] sm:$0xf]  ;;  %v4716_v6 = vld [vmem:[#allocation8 + $0x38] sm:$0xf0]  ;;  %v4715_v11 = vor.u32 %v6371_v60, %v4714_v59 }
  0x75   : > { %1010 = vmatpush.bf16.msra.mxu3 %v4799_v50  ;;  %v6386_v8 = vld [vmem:[#allocation8 + $0xb4] sm:$0xf]  ;;  %v4780_v9 = vld [vmem:[#allocation8 + $0xb8] sm:$0xf0]  ;;  %v4779_v13 = vor.u32 %v6387_v2, %v4778_v61  ;;  %v4719_v14 = vor.u32 %v6370_v5, %v4716_v6  ;;  %v4706_v25 = vld [vmem:[#allocation8 + $0x20] sm:$0xf] }
  0x76   : > { %v7789_v62 = vsel %vm708_vm0, %v7782_v7, %v707_v49  ;;  %v4783_v15 = vor.u32 %v6386_v8, %v4780_v9  ;;  %v6369_v26 = vld [vmem:[#allocation8 + $0x24] sm:$0xf0]  ;;  %v4770_v27 = vld [vmem:[#allocation8 + $0xa0] sm:$0xf]  ;;  %v6368_v30 = vld [vmem:[#allocation8 + $0x24] sm:$0xf] }
  0x77   : > { %969 = vmatpush.bf16.msra.mxu0 %v4723_v56  ;;  %v4707_v28 = vor.u32 %v6369_v26, %v4706_v25  ;;  %v6385_v29 = vld [vmem:[#allocation8 + $0xa4] sm:$0xf0]  ;;  %v4708_v31 = vld [vmem:[#allocation8 + $0x28] sm:$0xf0]  ;;  %v6384_v33 = vld [vmem:[#allocation8 + $0xa4] sm:$0xf] }
  0x78   : > { %983 = vmatpush.bf16.msra.mxu1 %v4787_v57  ;;  %997 = vmatpush.bf16.msra.mxu2 %v4727_v58  ;;  %v4711_v32 = vor.u32 %v6368_v30, %v4708_v31  ;;  %v4698_v35 = vld [vmem:[#allocation8 + $0x10] sm:$0xf]  ;;  %v6367_v36 = vld [vmem:[#allocation8 + $0x14] sm:$0xf0]  ;;  %v6366_v40 = vld [vmem:[#allocation8 + $0x14] sm:$0xf] }
  0x79   : > { %1011 = vmatpush.bf16.msra.mxu3 %v4791_v63  ;;  %v4762_v37 = vld [vmem:[#allocation8 + $0x90] sm:$0xf]  ;;  %v4699_v38 = vor.u32 %v6367_v36, %v4698_v35  ;;  %v6383_v39 = vld [vmem:[#allocation8 + $0x94] sm:$0xf0]  ;;  %v4700_v41 = vld [vmem:[#allocation8 + $0x18] sm:$0xf0] }
  0x7a   : > { %v4763_v42 = vor.u32 %v6383_v39, %v4762_v37  ;;  %v4703_v43 = vor.u32 %v6366_v40, %v4700_v41  ;;  %v6382_v44 = vld [vmem:[#allocation8 + $0x94] sm:$0xf]  ;;  %v4764_v45 = vld [vmem:[#allocation8 + $0x98] sm:$0xf0]  ;;  %v4690_v47 = vld [vmem:[#allocation8] sm:$0xf] }
  0x7b   : > { %970 = vmatpush.bf16.msra.mxu0 %v4715_v11  ;;  %v4767_v46 = vor.u32 %v6382_v44, %v4764_v45  ;;  %v6365_v48 = vld [vmem:[#allocation8 + $0x4] sm:$0xf0]  ;;  %v4754_v49 = vld [vmem:[#allocation8 + $0x80] sm:$0xf]  ;;  %v6364_v52 = vld [vmem:[#allocation8 + $0x4] sm:$0xf] }
  0x7c   : > { %984 = vmatpush.bf16.msra.mxu1 %v4779_v13  ;;  %998 = vmatpush.bf16.msra.mxu2 %v4719_v14  ;;  %v4691_v50 = vor.u32 %v6365_v48, %v4690_v47  ;;  %v6381_v51 = vld [vmem:[#allocation8 + $0x84] sm:$0xf0]  ;;  %v4692_v53 = vld [vmem:[#allocation8 + $0x8] sm:$0xf0]  ;;  %v6380_v56 = vld [vmem:[#allocation8 + $0x84] sm:$0xf] }
  0x7d   : > { %1012 = vmatpush.bf16.msra.mxu3 %v4783_v15  ;;  %v4755_v54 = vor.u32 %v6381_v51, %v4754_v49  ;;  %v4695_v55 = vor.u32 %v6364_v52, %v4692_v53  ;;  %v4756_v57 = vld [vmem:[#allocation8 + $0x88] sm:$0xf0]  ;;  %v4874_v58 = vld [vmem:[#allocation10 + $0x70] sm:$0xf]  ;;  %v6411_v60 = vld [vmem:[#allocation10 + $0x74] sm:$0xf0] }
  0x7e   : > { %v4759_v59 = vor.u32 %v6380_v56, %v4756_v57  ;;  %v4938_v61 = vld [vmem:[#allocation10 + $0xf0] sm:$0xf]  ;;  %v6427_v63 = vld [vmem:[#allocation10 + $0xf4] sm:$0xf0]  ;;  %v4875_v2 = vor.u32 %v6411_v60, %v4874_v58  ;;  %v6410_v6 = vld [vmem:[#allocation10 + $0x74] sm:$0xf] }
  0x7f   : > { %971 = vmatpush.bf16.msra.mxu0 %v4707_v28  ;;  %v4939_v5 = vor.u32 %v6427_v63, %v4938_v61  ;;  %v4876_v8 = vld [vmem:[#allocation10 + $0x78] sm:$0xf0]  ;;  %v6426_v9 = vld [vmem:[#allocation10 + $0xf4] sm:$0xf]  ;;  %v6409_v13 = vld [vmem:[#allocation10 + $0x64] sm:$0xf0] }
  0x80   : > { %999 = vmatpush.bf16.msra.mxu2 %v4711_v32  ;;  %v4940_v11 = vld [vmem:[#allocation10 + $0xf8] sm:$0xf0]  ;;  %v4858_v26 = vld [vmem:[#allocation10 + $0x50] sm:$0xf]  ;;  %v6423_v30 = vld [vmem:[#allocation10 + $0xd4] sm:$0xf0] }
  0x81   : > { %v4943_v14 = vor.u32 %v6426_v9, %v4940_v11  ;;  %v4922_v28 = vld [vmem:[#allocation10 + $0xd0] sm:$0xf]  ;;  %v6406_v31 = vld [vmem:[#allocation10 + $0x54] sm:$0xf]  ;;  %v4850_v36 = vld [vmem:[#allocation10 + $0x40] sm:$0xf] }
  0x82   : > { %v4923_v32 = vor.u32 %v6423_v30, %v4922_v28  ;;  %v6405_v37 = vld [vmem:[#allocation10 + $0x44] sm:$0xf0]  ;;  %v6404_v41 = vld [vmem:[#allocation10 + $0x44] sm:$0xf]  ;;  %v4842_v48 = vld [vmem:[#allocation10 + $0x30] sm:$0xf] }
  0x83   : > { %972 = vmatpush.bf16.msra.mxu0 %v4699_v38  ;;  %v4914_v38 = vld [vmem:[#allocation10 + $0xc0] sm:$0xf]  ;;  %v4851_v39 = vor.u32 %v6405_v37, %v4850_v36  ;;  %v6421_v40 = vld [vmem:[#allocation10 + $0xc4] sm:$0xf0]  ;;  %v6420_v45 = vld [vmem:[#allocation10 + $0xc4] sm:$0xf] }
  0x84   : > { %1000 = vmatpush.bf16.msra.mxu2 %v4703_v43  ;;  %v4915_v43 = vor.u32 %v6421_v40, %v4914_v38  ;;  %v6403_v49 = vld [vmem:[#allocation10 + $0x34] sm:$0xf0]  ;;  %v6402_v53 = vld [vmem:[#allocation10 + $0x34] sm:$0xf]  ;;  %v4908_v58 = vld [vmem:[#allocation10 + $0xb8] sm:$0xf0] }
  0x85   : > { %v4843_v51 = vor.u32 %v6403_v49, %v4842_v48  ;;  %v6419_v52 = vld [vmem:[#allocation10 + $0xb4] sm:$0xf0]  ;;  %v6418_v57 = vld [vmem:[#allocation10 + $0xb4] sm:$0xf]  ;;  %v4834_v60 = vld [vmem:[#allocation10 + $0x20] sm:$0xf] }
  0x86   : > { %v6401_v61 = vld [vmem:[#allocation10 + $0x24] sm:$0xf0]  ;;  %v4898_v63 = vld [vmem:[#allocation10 + $0xa0] sm:$0xf]  ;;  %v6416_v11 = vld [vmem:[#allocation10 + $0xa4] sm:$0xf] }
  0x87   : > { %973 = vmatpush.bf16.msra.mxu0 %v4691_v50  ;;  %v4906_v50 = vld [vmem:[#allocation10 + $0xb0] sm:$0xf]  ;;  %v4818_v30 = vld [vmem:[#allocation10] sm:$0xf]  ;;  %v6412_v37 = vld [vmem:[#allocation10 + $0x84] sm:$0xf] }
  0x88   : > { %1001 = vmatpush.bf16.msra.mxu2 %v4695_v55  ;;  %v4907_v55 = vor.u32 %v6419_v52, %v4906_v50  ;;  %v4884_v38 = vld [vmem:[#allocation10 + $0x88] sm:$0xf0]  ;;  %v695_v52 = vld [vmem:[#allocation7] sm:$0x3]  ;;  %s6781_s22 = sshll.u32 %s7586_s25, 5  ;;  %s4475_s26 = sshll.u32 %s8150_s12, 4  ;;  %s4476_s26 = int_to_ptr.vmem [resolvable:$true] %s4475_s26 }
  0x89   : > { %v4887_v40 = vor.u32 %v6412_v37, %v4884_v38  ;;  %v6439_v37 = vld [vmem:[#allocation11 + $0x54] sm:$0xf0]  ;;  %s4462_s25 = scalar_lea.sflag [#allocation4], %s7730_s24 }
  0x8b   : > { %1214 = vmatpush.bf16.msrb.mxu0 %v4875_v2  ;;  %v4835_v2 = vor.u32 %v6401_v61, %v4834_v60 }
  0xdc   : > { %v699_v10 = vpop.xlane.xlu0 %698 }
  0xdd   : > { %v710_v12 = vmul.f32 %v7789_v62, %v699_v10  ;;  %v4879_v10 = vor.u32 %v6410_v6, %v4876_v8  ;;  %v6400_v6 = vld [vmem:[#allocation10 + $0x24] sm:$0xf]  ;;  %v4836_v8 = vld [vmem:[#allocation10 + $0x28] sm:$0xf0] }
  0xdf   : > { %v7793_v7 = vsub.f32 %v7767_v0, %v710_v12  ;;  %v7796_v16 = vsub.f32 %v7770_v1, %v710_v12  ;;  %v4866_v12 = vld [vmem:[#allocation10 + $0x60] sm:$0xf]  ;;  %1242 = vmatpush.bf16.msrb.mxu2 %v4879_v10  ;;  %v4839_v10 = vor.u32 %v6400_v6, %v4836_v8 }
  0xe0   : > { %v4867_v15 = vor.u32 %v6409_v13, %v4866_v12  ;;  %v4900_v12 = vld [vmem:[#allocation10 + $0xa8] sm:$0xf0] }
  0xe1   : > { %v716_v17 = vmul.f32 %v7793_v7, %v7793_v7  ;;  %v717_v18 = vmul.f32 %v7796_v16, %v7796_v16  ;;  %v4903_v13 = vor.u32 %v6416_v11, %v4900_v12 }
  0xe2   : > { %1215 = vmatpush.bf16.msrb.mxu0 %v4867_v15  ;;  %v4826_v15 = vld [vmem:[#allocation10 + $0x10] sm:$0xf] }
  0xe3   : > { %v720_v19 = vadd.f32 %v717_v18, %v716_v17  ;;  %v4930_v17 = vld [vmem:[#allocation10 + $0xe0] sm:$0xf]  ;;  %v6425_v18 = vld [vmem:[#allocation10 + $0xe4] sm:$0xf0] }
  0xe4   : > { %v702_v20 = vpop.xlane.xlu0 %701 }
  0xe5   : > { %v711_v21 = vmul.f32 %v7789_v62, %v702_v20  ;;  %721 = vadd.xlane.f32.xlu1 %v720_v19  ;;  %v6408_v19 = vld [vmem:[#allocation10 + $0x64] sm:$0xf]  ;;  %v4931_v20 = vor.u32 %v6425_v18, %v4930_v17  ;;  %v6399_v17 = vld [vmem:[#allocation10 + $0x14] sm:$0xf0]  ;;  %v4890_v18 = vld [vmem:[#allocation10 + $0x90] sm:$0xf] }
  0xe7   : > { %v7804_v0 = vsub.f32 %v7775_v3, %v711_v21  ;;  %v7807_v1 = vsub.f32 %v7778_v4, %v711_v21  ;;  %v4771_v3 = vor.u32 %v6385_v29, %v4770_v27  ;;  %v4772_v4 = vld [vmem:[#allocation8 + $0xa8] sm:$0xf0]  ;;  %v6407_v27 = vld [vmem:[#allocation10 + $0x54] sm:$0xf0] }
  0xe8   : > { %v4775_v34 = vor.u32 %v6384_v33, %v4772_v4  ;;  %v4868_v21 = vld [vmem:[#allocation10 + $0x68] sm:$0xf0]  ;;  %v4859_v29 = vor.u32 %v6407_v27, %v4858_v26  ;;  %v6422_v4 = vld [vmem:[#allocation10 + $0xd4] sm:$0xf]  ;;  %v4892_v27 = vld [vmem:[#allocation10 + $0x98] sm:$0xf0] }
  0xe9   : > { %v718_v22 = vmul.f32 %v7804_v0, %v7804_v0  ;;  %v719_v23 = vmul.f32 %v7807_v1, %v7807_v1  ;;  %985 = vmatpush.bf16.msra.mxu1 %v4771_v3  ;;  %v4860_v3 = vld [vmem:[#allocation10 + $0x58] sm:$0xf0]  ;;  %v6414_v26 = vld [vmem:[#allocation10 + $0x94] sm:$0xf] }
  0xea   : > { %1013 = vmatpush.bf16.msra.mxu3 %v4775_v34  ;;  %v4863_v33 = vor.u32 %v6406_v31, %v4860_v3  ;;  %v4924_v34 = vld [vmem:[#allocation10 + $0xd8] sm:$0xf0]  ;;  %1216 = vmatpush.bf16.msrb.mxu0 %v4859_v29  ;;  %v4895_v29 = vor.u32 %v6414_v26, %v4892_v27  ;;  %v6397_v31 = vld [vmem:[#allocation10 + $0x4] sm:$0xf0]  ;;  %v4882_v3 = vld [vmem:[#allocation10 + $0x80] sm:$0xf] }
  0xeb   : > { %v723_v24 = vadd.f32 %v719_v23, %v718_v22  ;;  %v6424_v22 = vld [vmem:[#allocation10 + $0xe4] sm:$0xf]  ;;  %v4932_v23 = vld [vmem:[#allocation10 + $0xe8] sm:$0xf0]  ;;  %v4927_v35 = vor.u32 %v6422_v4, %v4924_v34  ;;  %v4994_v26 = vld [vmem:[#allocation11 + $0x60] sm:$0xf] }
  0xec   : > { %v4935_v25 = vor.u32 %v6424_v22, %v4932_v23  ;;  %v6398_v22 = vld [vmem:[#allocation10 + $0x14] sm:$0xf]  ;;  %v4828_v23 = vld [vmem:[#allocation10 + $0x18] sm:$0xf0]  ;;  %v6396_v4 = vld [vmem:[#allocation10 + $0x4] sm:$0xf] }
  0xed   : > { %724 = vadd.xlane.f32.xlu1 %v723_v24  ;;  %986 = vmatpush.bf16.msra.mxu1 %v4763_v42  ;;  %v4871_v24 = vor.u32 %v6408_v19, %v4868_v21  ;;  %v4852_v42 = vld [vmem:[#allocation10 + $0x48] sm:$0xf0]  ;;  %v6415_v21 = vld [vmem:[#allocation10 + $0x94] sm:$0xf0]  ;;  %v6441_v27 = vld [vmem:[#allocation11 + $0x64] sm:$0xf0] }
  0xee   : > { %1014 = vmatpush.bf16.msra.mxu3 %v4767_v46  ;;  %v4855_v44 = vor.u32 %v6404_v41, %v4852_v42  ;;  %v4916_v46 = vld [vmem:[#allocation10 + $0xc8] sm:$0xf0]  ;;  %1217 = vmatpush.bf16.msrb.mxu0 %v4851_v39 }
  0xef   : > { %1243 = vmatpush.bf16.msrb.mxu2 %v4871_v24  ;;  %v4919_v47 = vor.u32 %v6420_v45, %v4916_v46  ;;  %v4891_v24 = vor.u32 %v6415_v21, %v4890_v18  ;;  %v4820_v34 = vld [vmem:[#allocation10 + $0x8] sm:$0xf0]  ;;  %v5004_v21 = vld [vmem:[#allocation11 + $0x78] sm:$0xf0] }
  0xf0   : > { %v4823_v36 = vor.u32 %v6396_v4, %v4820_v34  ;;  %v5060_v4 = vld [vmem:[#allocation11 + $0xe8] sm:$0xf0]  ;;  %v4995_v34 = vor.u32 %v6441_v27, %v4994_v26  ;;  %v6431_v26 = vld [vmem:[#allocation11 + $0x14] sm:$0xf0] }
  0xf1   : > { %987 = vmatpush.bf16.msra.mxu1 %v4755_v54  ;;  %v4844_v54 = vld [vmem:[#allocation10 + $0x38] sm:$0xf0] }
  0xf2   : > { %1015 = vmatpush.bf16.msra.mxu3 %v4759_v59  ;;  %v4847_v56 = vor.u32 %v6402_v53, %v4844_v54  ;;  %v4911_v59 = vor.u32 %v6418_v57, %v4908_v58  ;;  %1218 = vmatpush.bf16.msrb.mxu0 %v4843_v51  ;;  %v755_v57 = vperm.slane %v695_v52, 0  ;;  %v756_v58 = vperm.slane %v695_v52, 1  ;;  %v5042_v52 = vld [vmem:[#allocation11 + $0xc0] sm:$0xf] }
  0xf3   : > { %1244 = vmatpush.bf16.msrb.mxu2 %v4863_v33  ;;  %v6413_v33 = vld [vmem:[#allocation10 + $0x84] sm:$0xf0] }
  0xf5   : > { %1228 = vmatpush.bf16.msrb.mxu1 %v4939_v5  ;;  %v6417_v5 = vld [vmem:[#allocation10 + $0xa4] sm:$0xf0] }
  0xf6   : > { %1256 = vmatpush.bf16.msrb.mxu3 %v4943_v14  ;;  %v4899_v9 = vor.u32 %v6417_v5, %v4898_v63  ;;  %1219 = vmatpush.bf16.msrb.mxu0 %v4835_v2 }
  0xf7   : > { %1245 = vmatpush.bf16.msrb.mxu2 %v4855_v44 }
  0xf9   : > { %1229 = vmatpush.bf16.msrb.mxu1 %v4931_v20  ;;  %v4827_v20 = vor.u32 %v6399_v17, %v4826_v15  ;;  %v5066_v15 = vld [vmem:[#allocation11 + $0xf0] sm:$0xf]  ;;  %v6442_v17 = vld [vmem:[#allocation11 + $0x74] sm:$0xf] }
  0xfa   : > { %1257 = vmatpush.bf16.msrb.mxu3 %v4935_v25  ;;  %v4831_v25 = vor.u32 %v6398_v22, %v4828_v23  ;;  %v6458_v22 = vld [vmem:[#allocation11 + $0xf4] sm:$0xf]  ;;  %v5068_v23 = vld [vmem:[#allocation11 + $0xf8] sm:$0xf0] }
  0xfb   : > { %1246 = vmatpush.bf16.msrb.mxu2 %v4847_v56  ;;  %1220 = vmatpush.bf16.msrb.mxu0 %v4827_v20  ;;  %v696_v56 = vld [vmem:[%s8196_s3] sm:$0x3] }
  0xfc   : > { %v764_v63 = vperm.slane %v696_v56, 0  ;;  %v765_v2 = vperm.slane %v696_v56, 1  ;;  %v6452_v56 = vld [vmem:[#allocation11 + $0xc4] sm:$0xf] }
  0xfd   : > { %1230 = vmatpush.bf16.msrb.mxu1 %v4923_v32  ;;  %v4819_v32 = vor.u32 %v6397_v31, %v4818_v30  ;;  %v5058_v30 = vld [vmem:[#allocation11 + $0xe0] sm:$0xf]  ;;  %v6457_v31 = vld [vmem:[#allocation11 + $0xe4] sm:$0xf0] }
  0xfe   : > { %1258 = vmatpush.bf16.msrb.mxu3 %v4927_v35  ;;  %v4883_v35 = vor.u32 %v6413_v33, %v4882_v3  ;;  %v6440_v3 = vld [vmem:[#allocation11 + $0x64] sm:$0xf] }
  0xff   : > { %1247 = vmatpush.bf16.msrb.mxu2 %v4839_v10  ;;  %1221 = vmatpush.bf16.msrb.mxu0 %v4819_v32  ;;  %v4996_v32 = vld [vmem:[#allocation11 + $0x68] sm:$0xf0]  ;;  %v6456_v33 = vld [vmem:[#allocation11 + $0xe4] sm:$0xf] }
 0x100   : > { %v4999_v38 = vor.u32 %v6440_v3, %v4996_v32  ;;  %v4956_v3 = vld [vmem:[#allocation11 + $0x18] sm:$0xf0]  ;;  %v6446_v32 = vld [vmem:[#allocation11 + $0x94] sm:$0xf] }
 0x101   : > { %1231 = vmatpush.bf16.msrb.mxu1 %v4915_v43 }
 0x102   : > { %1259 = vmatpush.bf16.msrb.mxu3 %v4919_v47 }
 0x103   : > { %1248 = vmatpush.bf16.msrb.mxu2 %v4831_v25 }
 0x105   : > { %1232 = vmatpush.bf16.msrb.mxu1 %v4907_v55 }
 0x106   : > { %1260 = vmatpush.bf16.msrb.mxu3 %v4911_v59 }
 0x107   : > { %1249 = vmatpush.bf16.msrb.mxu2 %v4823_v36  ;;  %v4986_v36 = vld [vmem:[#allocation11 + $0x50] sm:$0xf] }
 0x109   : > { %1233 = vmatpush.bf16.msrb.mxu1 %v4899_v9 }
 0x10a   : > { %1261 = vmatpush.bf16.msrb.mxu3 %v4903_v13  ;;  %v5002_v13 = vld [vmem:[#allocation11 + $0x70] sm:$0xf] }
 0x10d   : > { %1234 = vmatpush.bf16.msrb.mxu1 %v4891_v24 }
 0x10e   : > { %1262 = vmatpush.bf16.msrb.mxu3 %v4895_v29  ;;  %v5071_v29 = vor.u32 %v6458_v22, %v5068_v23  ;;  %v5028_v22 = vld [vmem:[#allocation11 + $0xa8] sm:$0xf0] }
 0x111   : > { %1235 = vmatpush.bf16.msrb.mxu1 %v4883_v35  ;;  %v5059_v35 = vor.u32 %v6457_v31, %v5058_v30  ;;  %v6447_v30 = vld [vmem:[#allocation11 + $0x94] sm:$0xf0]  ;;  %v6430_v31 = vld [vmem:[#allocation11 + $0x14] sm:$0xf] }
 0x112   : > { %1263 = vmatpush.bf16.msrb.mxu3 %v4887_v40  ;;  %v5050_v40 = vld [vmem:[#allocation11 + $0xd0] sm:$0xf] }
 0x158   : > { %v722_v14 = vpop.xlane.xlu1 %721 }
 0x159   : > { %v726_v19 = vmul.f32 %v722_v14, %v7789_v62  ;;  %v6443_v14 = vld [vmem:[#allocation11 + $0x74] sm:$0xf0] }
 0x15b   : > { %v728_v28 = vadd.f32 1e-05, %v726_v19 }
 0x15d   : > { %6950 = vrsqrt.f32 %v728_v28  ;;  %vm736_vm2 = vweird.f32 %v728_v28 }
 0x160   : > { %v725_v39 = vpop.xlane.xlu1 %724 }
 0x161   : > { %v727_v41 = vmul.f32 %v725_v39, %v7789_v62  ;;  %v5063_v39 = vor.u32 %v6456_v33, %v5060_v4  ;;  %v5020_v33 = vld [vmem:[#allocation11 + $0x98] sm:$0xf0] }
 0x163   : > { %v6951_v42 = vpop.eup %6950  ;;  %v729_v43 = vadd.f32 1e-05, %v727_v41  ;;  %v6455_v41 = vld [vmem:[#allocation11 + $0xd4] sm:$0xf0] }
 0x164   : > { %v731_v44 = vmul.f32 %v6951_v42, %v728_v28  ;;  %vm737_vm1 = vweird.f32 %v6951_v42  ;;  %v5007_v28 = vor.u32 %v6442_v17, %v5004_v21  ;;  %v6448_v21 = vld [vmem:[#allocation11 + $0xa4] sm:$0xf] }
 0x165   : > { %6952 = vrsqrt.f32 %v729_v43  ;;  %vm738_vm3 = vmor %vm736_vm2, %vm737_vm1  ;;  %vm746_vm5 = vweird.f32 %v729_v43 }
 0x166   : > { %v732_v45 = vmul.f32 %v6951_v42, %v731_v44  ;;  %v6454_v44 = vld [vmem:[#allocation11 + $0xd4] sm:$0xf] }
 0x168   : > { %v733_v46 = vmul.f32 0.5, %v732_v45  ;;  %v5052_v45 = vld [vmem:[#allocation11 + $0xd8] sm:$0xf0] }
 0x16a   : > { %v734_v47 = vsub.f32 1.5, %v733_v46  ;;  %v4987_v46 = vor.u32 %v6439_v37, %v4986_v36  ;;  %v6429_v36 = vld [vmem:[#allocation11 + $0x4] sm:$0xf0]  ;;  %v4959_v37 = vor.u32 %v6430_v31, %v4956_v3  ;;  %v5100_v31 = vld [vmem:[#allocation13 + $0xb0] sm:$0xf] }
 0x16b   : > { %v6953_v48 = vpop.eup %6952  ;;  %v6483_v3 = vld [vmem:[#allocation13 + $0xb4] sm:$0xf0] }
 0x16c   : > { %v735_v49 = vmul.f32 %v6951_v42, %v734_v47  ;;  %v741_v50 = vmul.f32 %v6953_v48, %v729_v43  ;;  %vm747_vm4 = vweird.f32 %v6953_v48  ;;  %v4988_v43 = vld [vmem:[#allocation11 + $0x58] sm:$0xf0]  ;;  %v5051_v47 = vor.u32 %v6455_v41, %v5050_v40  ;;  %v6445_v40 = vld [vmem:[#allocation11 + $0x84] sm:$0xf0]  ;;  %v6428_v41 = vld [vmem:[#allocation11 + $0x4] sm:$0xf] }
 0x16d   : > { %vm748_vm6 = vmor %vm746_vm5, %vm747_vm4 }
 0x16e   : > { %v742_v51 = vmul.f32 %v6953_v48, %v741_v50  ;;  %v739_v53 = vsel %vm738_vm3, %v6951_v42, %v735_v49  ;;  %v6438_v42 = vld [vmem:[#allocation11 + $0x54] sm:$0xf]  ;;  %v6437_v49 = vld [vmem:[#allocation11 + $0x44] sm:$0xf0] }
 0x16f   : > { %v750_v59 = vmul.f32 %v739_v53, %v7793_v7  ;;  %v751_v60 = vmul.f32 %v739_v53, %v7796_v16  ;;  %v6459_v7 = vld [vmem:[#allocation11 + $0xf4] sm:$0xf0]  ;;  %v4991_v50 = vor.u32 %v6438_v42, %v4988_v43  ;;  %v6453_v53 = vld [vmem:[#allocation11 + $0xc4] sm:$0xf0]  ;;  %v4948_v42 = vld [vmem:[#allocation11 + $0x8] sm:$0xf0] }
 0x170   : > { %v743_v54 = vmul.f32 0.5, %v742_v51  ;;  %v5055_v51 = vor.u32 %v6454_v44, %v5052_v45  ;;  %v6444_v43 = vld [vmem:[#allocation11 + $0x84] sm:$0xf]  ;;  %v5012_v44 = vld [vmem:[#allocation11 + $0x88] sm:$0xf0] }
 0x171   : > { %v759_v6 = vmul.f32 %v755_v57, %v750_v59  ;;  %v760_v8 = vmul.f32 %v756_v58, %v751_v60  ;;  %v5043_v59 = vor.u32 %v6453_v53, %v5042_v52  ;;  %v4970_v60 = vld [vmem:[#allocation11 + $0x30] sm:$0xf] }
 0x172   : > { %v744_v55 = vsub.f32 1.5, %v743_v54  ;;  %v6436_v54 = vld [vmem:[#allocation11 + $0x44] sm:$0xf] }
 0x173   : > { %v768_v16 = vadd.f32 %v764_v63, %v759_v6  ;;  %v769_v18 = vadd.f32 %v765_v2, %v760_v8  ;;  %v6451_v6 = vld [vmem:[#allocation11 + $0xb4] sm:$0xf0]  ;;  %v6434_v8 = vld [vmem:[#allocation11 + $0x34] sm:$0xf] }
 0x174   : > { %v745_v61 = vmul.f32 %v6953_v48, %v744_v55  ;;  %v4980_v55 = vld [vmem:[#allocation11 + $0x48] sm:$0xf0] }
 0x176   : > { %v749_v5 = vsel %vm748_vm6, %v6953_v48, %v745_v61  ;;  %v4978_v48 = vld [vmem:[#allocation11 + $0x40] sm:$0xf]  ;;  %v6435_v61 = vld [vmem:[#allocation11 + $0x34] sm:$0xf0] }
 0x177   : > { %v752_v9 = vmul.f32 %v749_v5, %v7804_v0  ;;  %v753_v10 = vmul.f32 %v749_v5, %v7807_v1  ;;  %v5003_v0 = vor.u32 %v6443_v14, %v5002_v13  ;;  %v5067_v1 = vor.u32 %v6459_v7, %v5066_v15  ;;  %v5034_v5 = vld [vmem:[#allocation11 + $0xb0] sm:$0xf]  ;;  %v4962_v14 = vld [vmem:[#allocation11 + $0x20] sm:$0xf]  ;;  %v6433_v15 = vld [vmem:[#allocation11 + $0x24] sm:$0xf0] }
 0x178   : > { %v5035_v13 = vor.u32 %v6451_v6, %v5034_v5  ;;  %v4963_v23 = vor.u32 %v6433_v15, %v4962_v14 }
 0x179   : > { %v761_v11 = vmul.f32 %v755_v57, %v752_v9  ;;  %v762_v12 = vmul.f32 %v756_v58, %v753_v10  ;;  %v5044_v57 = vld [vmem:[#allocation11 + $0xc8] sm:$0xf0]  ;;  %v4979_v58 = vor.u32 %v6437_v49, %v4978_v48  ;;  %v4972_v9 = vld [vmem:[#allocation11 + $0x38] sm:$0xf0]  ;;  %v6450_v10 = vld [vmem:[#allocation11 + $0xb4] sm:$0xf]  ;;  %v5015_v48 = vor.u32 %v6444_v43, %v5012_v44 }
 0x17a   : > { %v4975_v7 = vor.u32 %v6434_v8, %v4972_v9  ;;  %v5196_v8 = vld [vmem:[#allocation13 + $0x70] sm:$0xf]  ;;  %v6475_v9 = vld [vmem:[#allocation13 + $0x74] sm:$0xf0] }
 0x17b   : > { %v770_v19 = vadd.f32 %v764_v63, %v761_v11  ;;  %v771_v20 = vadd.f32 %v765_v2, %v762_v12  ;;  %v4983_v63 = vor.u32 %v6436_v54, %v4980_v55  ;;  %v5047_v2 = vor.u32 %v6452_v56, %v5044_v57  ;;  %v5036_v11 = vld [vmem:[#allocation11 + $0xb8] sm:$0xf0]  ;;  %v5132_v57 = vld [vmem:[#allocation13 + $0xf0] sm:$0xf] }
 0x17c   : > { %v4971_v12 = vor.u32 %v6435_v61, %v4970_v60  ;;  %v5039_v17 = vor.u32 %v6450_v10, %v5036_v11 }
 0x17d   : > { %v7822_v24 = vpack.c.bf16 %v770_v19, %v768_v16  ;;  %v7824_v25 = vpack.c.bf16 %v771_v20, %v769_v18  ;;  %v5026_v16 = vld [vmem:[#allocation11 + $0xa0] sm:$0xf]  ;;  %v6449_v18 = vld [vmem:[#allocation11 + $0xa4] sm:$0xf0]  ;;  %v6432_v19 = vld [vmem:[#allocation11 + $0x24] sm:$0xf] }
 0x17e   : > { %v4964_v20 = vld [vmem:[#allocation11 + $0x28] sm:$0xf0] }
 0x17f   : > { %974 = vmatmul.bf16.vlgmr.msra.gmra.mxu0 %v7822_v24  ;;  %988 = vmatmul.bf16.vlgmr.msra.gmra.mxu1 %v7824_v25  ;;  %v4967_v27 = vor.u32 %v6432_v19, %v4964_v20  ;;  %v5188_v20 = vld [vmem:[#allocation13 + $0x60] sm:$0xf] }
 0x180   : > { %1002 = vmatmul.bf16.vlgmr.msra.gmra.mxu2 %v7822_v24  ;;  %1016 = vmatmul.bf16.vlgmr.msra.gmra.mxu3 %v7824_v25 }
 0x181   : > { %1462 = vmatpush.bf16.msra.mxu0 %v5003_v0  ;;  %1476 = vmatpush.bf16.msra.mxu1 %v5067_v1  ;;  %v5027_v0 = vor.u32 %v6449_v18, %v5026_v16  ;;  %v4954_v1 = vld [vmem:[#allocation11 + $0x10] sm:$0xf] }
 0x182   : > { %1490 = vmatpush.bf16.msra.mxu2 %v5007_v28  ;;  %1504 = vmatpush.bf16.msra.mxu3 %v5071_v29  ;;  %v5031_v28 = vor.u32 %v6448_v21, %v5028_v22  ;;  %v5018_v29 = vld [vmem:[#allocation11 + $0x90] sm:$0xf]  ;;  %v4955_v4 = vor.u32 %v6431_v26, %v4954_v1  ;;  %v6473_v21 = vld [vmem:[#allocation13 + $0x64] sm:$0xf0]  ;;  %v5108_v22 = vld [vmem:[#allocation13 + $0xc0] sm:$0xf] }
 0x183   : > { %v5189_v1 = vor.u32 %v6473_v21, %v5188_v20  ;;  %v6474_v20 = vld [vmem:[#allocation13 + $0x74] sm:$0xf] }
 0x185   : > { %1463 = vmatpush.bf16.msra.mxu0 %v4995_v34  ;;  %1477 = vmatpush.bf16.msra.mxu1 %v5059_v35  ;;  %v5019_v34 = vor.u32 %v6447_v30, %v5018_v29  ;;  %v4946_v35 = vld [vmem:[#allocation11] sm:$0xf] }
 0x186   : > { %1491 = vmatpush.bf16.msra.mxu2 %v4999_v38  ;;  %1505 = vmatpush.bf16.msra.mxu3 %v5063_v39  ;;  %v5023_v38 = vor.u32 %v6446_v32, %v5020_v33  ;;  %v5010_v39 = vld [vmem:[#allocation11 + $0x80] sm:$0xf]  ;;  %v4947_v45 = vor.u32 %v6429_v36, %v4946_v35  ;;  %v5101_v36 = vor.u32 %v6483_v3, %v5100_v31 }
 0x189   : > { %1464 = vmatpush.bf16.msra.mxu0 %v4987_v46  ;;  %1478 = vmatpush.bf16.msra.mxu1 %v5051_v47  ;;  %v5011_v46 = vor.u32 %v6445_v40, %v5010_v39  ;;  %v4951_v47 = vor.u32 %v6428_v41, %v4948_v42  ;;  %v5092_v39 = vld [vmem:[#allocation13 + $0xa0] sm:$0xf]  ;;  %v6481_v40 = vld [vmem:[#allocation13 + $0xa4] sm:$0xf0] }
 0x18a   : > { %1492 = vmatpush.bf16.msra.mxu2 %v4991_v50  ;;  %1506 = vmatpush.bf16.msra.mxu3 %v5055_v51  ;;  %v5093_v44 = vor.u32 %v6481_v40, %v5092_v39  ;;  %v6482_v39 = vld [vmem:[#allocation13 + $0xb4] sm:$0xf]  ;;  %v5102_v40 = vld [vmem:[#allocation13 + $0xb8] sm:$0xf0] }
 0x18d   : > { %1465 = vmatpush.bf16.msra.mxu0 %v4979_v58  ;;  %1479 = vmatpush.bf16.msra.mxu1 %v5043_v59  ;;  %v6491_v58 = vld [vmem:[#allocation13 + $0xf4] sm:$0xf0] }
 0x18e   : > { %1493 = vmatpush.bf16.msra.mxu2 %v4983_v63  ;;  %1507 = vmatpush.bf16.msra.mxu3 %v5047_v2  ;;  %v6489_v2 = vld [vmem:[#allocation13 + $0xe4] sm:$0xf0] }
 0x18f   : > { %1222 = vmatmul.bf16.vlgmr.msrb.gmra.mxu0 %v7822_v24  ;;  %1236 = vmatmul.bf16.vlgmr.msrb.gmra.mxu1 %v7824_v25 }
 0x190   : > { %1250 = vmatmul.bf16.vlgmr.msrb.gmra.mxu2 %v7822_v24  ;;  %1264 = vmatmul.bf16.vlgmr.msrb.gmra.mxu3 %v7824_v25 }
 0x191   : > { %1466 = vmatpush.bf16.msra.mxu0 %v4971_v12  ;;  %1480 = vmatpush.bf16.msra.mxu1 %v5035_v13  ;;  %v5116_v12 = vld [vmem:[#allocation13 + $0xd0] sm:$0xf]  ;;  %v6487_v13 = vld [vmem:[#allocation13 + $0xd4] sm:$0xf0] }
 0x192   : > { %1494 = vmatpush.bf16.msra.mxu2 %v4975_v7  ;;  %1508 = vmatpush.bf16.msra.mxu3 %v5039_v17  ;;  %v5197_v17 = vor.u32 %v6475_v9, %v5196_v8  ;;  %v5117_v19 = vor.u32 %v6487_v13, %v5116_v12  ;;  %v6463_v8 = vld [vmem:[#allocation13 + $0x14] sm:$0xf0]  ;;  %v6461_v12 = vld [vmem:[#allocation13 + $0x4] sm:$0xf0] }
 0x195   : > { %1467 = vmatpush.bf16.msra.mxu0 %v4963_v23  ;;  %1481 = vmatpush.bf16.msra.mxu1 %v5027_v0  ;;  %v6485_v23 = vld [vmem:[#allocation13 + $0xc4] sm:$0xf0] }
 0x196   : > { %1495 = vmatpush.bf16.msra.mxu2 %v4967_v27  ;;  %1509 = vmatpush.bf16.msra.mxu3 %v5031_v28  ;;  %v5109_v26 = vor.u32 %v6485_v23, %v5108_v22  ;;  %v5180_v27 = vld [vmem:[#allocation13 + $0x50] sm:$0xf]  ;;  %v6471_v28 = vld [vmem:[#allocation13 + $0x54] sm:$0xf0]  ;;  %v5198_v23 = vld [vmem:[#allocation13 + $0x78] sm:$0xf0] }
 0x199   : > { %1468 = vmatpush.bf16.msra.mxu0 %v4955_v4  ;;  %1482 = vmatpush.bf16.msra.mxu1 %v5019_v34  ;;  %v5181_v34 = vor.u32 %v6471_v28, %v5180_v27  ;;  %v6484_v28 = vld [vmem:[#allocation13 + $0xc4] sm:$0xf] }
 0x19a   : > { %1496 = vmatpush.bf16.msra.mxu2 %v4959_v37  ;;  %1510 = vmatpush.bf16.msra.mxu3 %v5023_v38  ;;  %v5172_v37 = vld [vmem:[#allocation13 + $0x40] sm:$0xf]  ;;  %v6469_v38 = vld [vmem:[#allocation13 + $0x44] sm:$0xf0] }
 0x19b   : > { %v5173_v42 = vor.u32 %v6469_v38, %v5172_v37 }
 0x19d   : > { %1469 = vmatpush.bf16.msra.mxu0 %v4947_v45  ;;  %1483 = vmatpush.bf16.msra.mxu1 %v5011_v46  ;;  %v5164_v45 = vld [vmem:[#allocation13 + $0x30] sm:$0xf]  ;;  %v6467_v46 = vld [vmem:[#allocation13 + $0x34] sm:$0xf0] }
 0x19e   : > { %1497 = vmatpush.bf16.msra.mxu2 %v4951_v47  ;;  %1511 = vmatpush.bf16.msra.mxu3 %v5015_v48  ;;  %v5084_v47 = vld [vmem:[#allocation13 + $0x90] sm:$0xf]  ;;  %v6479_v48 = vld [vmem:[#allocation13 + $0x94] sm:$0xf0] }
 0x1a0   : > { %1470 = vmatmul.bf16.vlgmr.msra.gmra.mxu0 %v7822_v24  ;;  %1484 = vmatmul.bf16.vlgmr.msra.gmra.mxu1 %v7824_v25 }
 0x1a1   : > { %1498 = vmatmul.bf16.vlgmr.msra.gmra.mxu2 %v7822_v24  ;;  %1512 = vmatmul.bf16.vlgmr.msra.gmra.mxu3 %v7824_v25  ;;  %v5133_v24 = vor.u32 %v6491_v58, %v5132_v57  ;;  %v5124_v25 = vld [vmem:[#allocation13 + $0xe0] sm:$0xf]  ;;  %v5085_v57 = vor.u32 %v6479_v48, %v5084_v47  ;;  %v6470_v47 = vld [vmem:[#allocation13 + $0x54] sm:$0xf] }
 0x1a2   : > { %v5125_v6 = vor.u32 %v6489_v2, %v5124_v25  ;;  %v5156_v58 = vld [vmem:[#allocation13 + $0x20] sm:$0xf] }
 0x1fc   : > { %v975_v49 = vpop.f32.mrf.mxu0  ;;  %v989_v50 = vpop.f32.mrf.mxu1 }
 0x1fd   : > { %v990_v5 = vadd.f32 %v989_v50, %v975_v49 }
 0x1ff   : > { %v1519_v16 = vpack.c.bf16 %v990_v5, %v990_v5 }
 0x203   : > { %v1003_v51 = vpop.f32.mrf.mxu2  ;;  %v1017_v52 = vpop.f32.mrf.mxu3 }
 0x204   : > { %v7838_v53 = vpop.f32.mrf.mxu0  ;;  %v7840_v54 = vpop.f32.mrf.mxu1  ;;  %v1018_v0 = vadd.f32 %v1017_v52, %v1003_v51  ;;  %v5165_v52 = vor.u32 %v6467_v46, %v5164_v45  ;;  %v6480_v45 = vld [vmem:[#allocation13 + $0xa4] sm:$0xf]  ;;  %v5094_v46 = vld [vmem:[#allocation13 + $0xa8] sm:$0xf0] }
 0x205   : > { %v5097_v48 = vor.u32 %v6480_v45, %v5094_v46 }
 0x206   : > { %v1585_v32 = vpack.c.bf16 %v1018_v0, %v1018_v0  ;;  %v6486_v0 = vld [vmem:[#allocation13 + $0xd4] sm:$0xf] }
 0x20b   : > { %v7842_v55 = vpop.f32.mrf.mxu2  ;;  %v7844_v56 = vpop.f32.mrf.mxu3 }
 0x20c   : > { %v1223_v59 = vpop.f32.mrf.mxu0  ;;  %v1237_v60 = vpop.f32.mrf.mxu1 }
 0x20d   : > { %v1238_v61 = vadd.f32 %v1237_v60, %v1223_v59  ;;  %v6465_v59 = vld [vmem:[#allocation13 + $0x24] sm:$0xf0] }
 0x20e   : > { %v5157_v2 = vor.u32 %v6465_v59, %v5156_v58  ;;  %v5174_v59 = vld [vmem:[#allocation13 + $0x48] sm:$0xf0] }
 0x20f   : > { %v1520_v63 = vpack.c.bf16 %v1238_v61, %v1238_v61  ;;  %v5076_v61 = vld [vmem:[#allocation13 + $0x80] sm:$0xf] }
 0x211   : > { %1529 = vmatpush.bf16.xpose.msrb.mxu0 %v1520_v63 }
 0x213   : > { %v1251_v10 = vpop.f32.mrf.mxu2  ;;  %v1265_v11 = vpop.f32.mrf.mxu3 }
 0x214   : > { %v1266_v14 = vadd.f32 %v1265_v11, %v1251_v10  ;;  %v1225_v15 = vpop.f32.mrf.mxu0  ;;  %v1239_v7 = vpop.f32.mrf.mxu1  ;;  %v5140_v11 = vld [vmem:[#allocation13] sm:$0xf] }
 0x215   : > { %v1240_v63 = vadd.f32 %v1239_v7, %v1225_v15  ;;  %v6490_v7 = vld [vmem:[#allocation13 + $0xf4] sm:$0xf] }
 0x216   : > { %v1586_v18 = vpack.c.bf16 %v1266_v14, %v1266_v14  ;;  %v5141_v14 = vor.u32 %v6461_v12, %v5140_v11  ;;  %v5150_v11 = vld [vmem:[#allocation13 + $0x18] sm:$0xf0] }
 0x217   : > { %v1862_v9 = vpack.c.bf16 %v1240_v63, %v1240_v63  ;;  %v6466_v63 = vld [vmem:[#allocation13 + $0x34] sm:$0xf] }
 0x218   : > { %1595 = vmatpush.bf16.xpose.msrb.mxu2 %v1586_v18  ;;  %1530 = vmatmul.bf16.vlgmr.msrb.gmra.mxu0 %v1519_v16  ;;  %v6488_v16 = vld [vmem:[#allocation13 + $0xe4] sm:$0xf] }
 0x219   : > { %1729 = vmatpush.bf16.msra.mxu0 %v5133_v24  ;;  %v6477_v24 = vld [vmem:[#allocation13 + $0x84] sm:$0xf0] }
 0x21a   : > { %v5077_v5 = vor.u32 %v6477_v24, %v5076_v61  ;;  %v6476_v61 = vld [vmem:[#allocation13 + $0x84] sm:$0xf]  ;;  %v5078_v24 = vld [vmem:[#allocation13 + $0x88] sm:$0xf0] }
 0x21b   : > { %v1253_v29 = vpop.f32.mrf.mxu2  ;;  %v1267_v30 = vpop.f32.mrf.mxu3 }
 0x21c   : > { %v1268_v13 = vadd.f32 %v1267_v30, %v1253_v29  ;;  %v5110_v29 = vld [vmem:[#allocation13 + $0xc8] sm:$0xf0]  ;;  %v7850_v30 = vld [vmem:[#allocation5] sm:$0xff] }
 0x21d   : > { %1730 = vmatpush.bf16.msra.mxu0 %v5125_v6  ;;  %v1471_v33 = vpop.f32.mrf.mxu0  ;;  %v1485_v4 = vpop.f32.mrf.mxu1  ;;  %v5148_v6 = vld [vmem:[#allocation13 + $0x10] sm:$0xf]  ;;  %v5113_v3 = vor.u32 %v6484_v28, %v5110_v29 }
 0x21e   : > { %v1486_v35 = vadd.f32 %v1485_v4, %v1471_v33  ;;  %v5149_v10 = vor.u32 %v6463_v8, %v5148_v6  ;;  %v1926_v15 = vpack.c.bf16 %v1268_v13, %v1268_v13  ;;  %v6464_v6 = vld [vmem:[#allocation13 + $0x24] sm:$0xf]  ;;  %v5158_v8 = vld [vmem:[#allocation13 + $0x28] sm:$0xf0] }
 0x21f   : > { %1596 = vmatmul.bf16.vlgmr.msrb.gmra.mxu2 %v1585_v32  ;;  %v6460_v13 = vld [vmem:[#allocation13 + $0x4] sm:$0xf] }
 0x220   : > { %1835 = vmatpush.bf16.msra.mxu2 %v5197_v17  ;;  %v1521_v41 = vpack.c.bf16 %v1486_v35, %v1486_v35  ;;  %v5134_v17 = vld [vmem:[#allocation13 + $0xf8] sm:$0xf0] }
 0x221   : > { %1731 = vmatpush.bf16.msra.mxu0 %v5117_v19  ;;  %v5137_v18 = vor.u32 %v6490_v7, %v5134_v17  ;;  %v5126_v19 = vld [vmem:[#allocation13 + $0xe8] sm:$0xf0] }
 0x222   : > { %v1551_v43 = vsel %vm1549_vm7, %v1521_v41, 0  ;;  %v5129_v22 = vor.u32 %v6488_v16, %v5126_v19  ;;  %v6472_v41 = vld [vmem:[#allocation13 + $0x64] sm:$0xf] }
 0x223   : > { %1560 = vmatpush.bf16.msrb.mxu1 %v1551_v43  ;;  %v5190_v43 = vld [vmem:[#allocation13 + $0x68] sm:$0xf0] }
 0x224   : > { %1836 = vmatpush.bf16.msra.mxu2 %v5189_v1  ;;  %v1499_v49 = vpop.f32.mrf.mxu2  ;;  %v1513_v50 = vpop.f32.mrf.mxu3  ;;  %v5118_v1 = vld [vmem:[#allocation13 + $0xd8] sm:$0xf0] }
 0x225   : > { %1732 = vmatpush.bf16.msra.mxu0 %v5109_v26  ;;  %v1514_v51 = vadd.f32 %v1513_v50, %v1499_v49  ;;  %v7848_v21 = vpop.f32.mrf.mxu0  ;;  %v5201_v26 = vor.u32 %v6474_v20, %v5198_v23  ;;  %v5121_v27 = vor.u32 %v6486_v0, %v5118_v1  ;;  %v5182_v49 = vld [vmem:[#allocation13 + $0x58] sm:$0xf0]  ;;  %v1487_v16 = vpop.f32.mrf.mxu1 }
 0x226   : > { %v5185_v50 = vor.u32 %v6470_v47, %v5182_v49  ;;  %v1488_v19 = vadd.f32 %v1487_v16, %v7848_v21  ;;  %v5262_v16 = vld [vmem:[#allocation13 + $0xf0] sm:$0xf] }
 0x227   : > { %v1587_v60 = vpack.c.bf16 %v1514_v51, %v1514_v51  ;;  %1742 = vmatpush.bf16.msra.mxu1 %v5137_v18  ;;  %v6478_v51 = vld [vmem:[#allocation13 + $0x94] sm:$0xf] }
 0x228   : > { %1837 = vmatpush.bf16.msra.mxu2 %v5181_v34  ;;  %v1863_v20 = vpack.c.bf16 %v1488_v19, %v1488_v19  ;;  %v6522_v19 = vld [vmem:[#allocation13 + $0xf4] sm:$0xf] }
 0x229   : > { %1733 = vmatpush.bf16.msra.mxu0 %v5101_v36  ;;  %v1615_v25 = vsel %vm1549_vm7, %v1587_v60, 0 }
 0x22a   : > { %1624 = vmatpush.bf16.msrb.mxu3 %v1615_v25  ;;  %v5081_v25 = vor.u32 %v6476_v61, %v5078_v24 }
 0x22b   : > { %1743 = vmatpush.bf16.msra.mxu1 %v5129_v22 }
 0x22c   : > { %1838 = vmatpush.bf16.msra.mxu2 %v5173_v42  ;;  %v7854_v4 = vpop.f32.mrf.mxu2  ;;  %v5105_v42 = vor.u32 %v6482_v39, %v5102_v40  ;;  %v1515_v28 = vpop.f32.mrf.mxu3 }
 0x22d   : > { %1734 = vmatpush.bf16.msra.mxu0 %v5093_v44  ;;  %v5193_v44 = vor.u32 %v6472_v41, %v5190_v43  ;;  %v1020_v41 = vadd.f32 %v7844_v56, %v7842_v55 }
 0x22e   : > { %1848 = vmatpush.bf16.msra.mxu3 %v5201_v26 }
 0x22f   : > { %1744 = vmatpush.bf16.msra.mxu1 %v5121_v27  ;;  %v1891_v27 = vsel %vm1549_vm7, %v1863_v20, 0  ;;  %v1925_v43 = vpack.c.bf16 %v1020_v41, %v1020_v41 }
 0x230   : > { %1839 = vmatpush.bf16.msra.mxu2 %v5165_v52  ;;  %v5086_v52 = vld [vmem:[#allocation13 + $0x98] sm:$0xf0] }
 0x231   : > { %1735 = vmatpush.bf16.msra.mxu0 %v5085_v57  ;;  %v6468_v57 = vld [vmem:[#allocation13 + $0x44] sm:$0xf]  ;;  %v5089_v58 = vor.u32 %v6478_v51, %v5086_v52 }
 0x232   : > { %1849 = vmatpush.bf16.msra.mxu3 %v5193_v44  ;;  %v5177_v60 = vor.u32 %v6468_v57, %v5174_v59 }
 0x233   : > { %1745 = vmatpush.bf16.msra.mxu1 %v5113_v3 }
 0x234   : > { %1840 = vmatpush.bf16.msra.mxu2 %v5157_v2  ;;  %v5166_v2 = vld [vmem:[#allocation13 + $0x38] sm:$0xf0] }
 0x235   : > { %1736 = vmatpush.bf16.msra.mxu0 %v5077_v5  ;;  %v5169_v5 = vor.u32 %v6466_v63, %v5166_v2  ;;  %v7006_v63 = vld [vmem:[%s7736_s30] sm:$0xff] }
 0x236   : > { %1850 = vmatpush.bf16.msra.mxu3 %v5185_v50 }
 0x237   : > { %1746 = vmatpush.bf16.msra.mxu1 %v5105_v42 }
 0x238   : > { %1841 = vmatpush.bf16.msra.mxu2 %v5149_v10  ;;  %v6462_v10 = vld [vmem:[#allocation13 + $0x14] sm:$0xf] }
 0x239   : > { %1871 = vmatpush.bf16.xpose.msrb.mxu0 %v1862_v9  ;;  %v5161_v9 = vor.u32 %v6464_v6, %v5158_v8  ;;  %v5153_v12 = vor.u32 %v6462_v10, %v5150_v11 }
 0x23a   : > { %1851 = vmatpush.bf16.msra.mxu3 %v5177_v60  ;;  %v7874_v60 = vld [vmem:[#allocation14] sm:$0x3] }
 0x23b   : > { %1747 = vmatpush.bf16.msra.mxu1 %v5097_v48  ;;  %v992_v48 = vadd.f32 %v7840_v54, %v7838_v53  ;;  %v2207_v53 = vperm.slane %v7874_v60, 0  ;;  %v7007_v54 = vld [vmem:[%s7736_s30 + $0x8] sm:$0xff] }
 0x23c   : > { %1842 = vmatpush.bf16.msra.mxu2 %v5141_v14  ;;  %v5142_v14 = vld [vmem:[#allocation13 + $0x8] sm:$0xf0] }
 0x23d   : > { %v1861_v49 = vpack.c.bf16 %v992_v48, %v992_v48 }
 0x23e   : > { %1852 = vmatpush.bf16.msra.mxu3 %v5169_v5  ;;  %v2208_v5 = vperm.slane %v7874_v60, 1  ;;  %v5430_v60 = vld [vmem:[#allocation19 + $0x180] sm:$0xf] }
 0x23f   : > { %1748 = vmatpush.bf16.msra.mxu1 %v5089_v58 }
 0x240   : > { %1935 = vmatpush.bf16.xpose.msrb.mxu2 %v1926_v15  ;;  %v5145_v15 = vor.u32 %v6460_v13, %v5142_v14 }
 0x242   : > { %1853 = vmatpush.bf16.msra.mxu3 %v5161_v9 }
 0x243   : > { %1749 = vmatpush.bf16.msra.mxu1 %v5081_v25 }
 0x246   : > { %1854 = vmatpush.bf16.msra.mxu3 %v5153_v12 }
 0x24a   : > { %1855 = vmatpush.bf16.msra.mxu3 %v5145_v15 }
 0x295   : > { %v1531_v31 = vpop.f32.mrf.mxu0 }
 0x296   : > { %v1532_v32 = vadd.f32 %v1531_v31, %v7850_v30  ;;  %v1516_v31 = vadd.f32 %v1515_v28, %v7854_v4  ;;  %v5326_v28 = vld [vmem:[#allocation13 + $0x70] sm:$0xf] }
 0x298   : > { %v1536_v33 = vsel %vm1535_vm8, %v1532_v32, -inf  ;;  %v1927_v21 = vpack.c.bf16 %v1516_v31, %v1516_v31  ;;  %v6507_v31 = vld [vmem:[#allocation13 + $0x74] sm:$0xf0] }
 0x299   : > { %1537 = vmax.xlane.f32.xlu2 %v1536_v33 }
 0x29d   : > { %v1533_v34 = vpop.f32.mrf.mxu0 }
 0x29e   : > { %v1955_v34 = vsel %vm1549_vm7, %v1927_v21, 0  ;;  %v6506_v21 = vld [vmem:[#allocation13 + $0x74] sm:$0xf] }
 0x2a2   : > { %v1597_v35 = vpop.f32.mrf.mxu2 }
 0x2a3   : > { %v7857_v36 = vadd.f32 %v1597_v35, %v7850_v30 }
 0x2a5   : > { %v1601_v37 = vsel %vm1535_vm8, %v7857_v36, -inf }
 0x2a6   : > { %1602 = vmax.xlane.f32.xlu2 %v1601_v37 }
 0x2aa   : > { %v1599_v38 = vpop.f32.mrf.mxu2 }
 0x30c   : > { %v1538_v7 = vpop.xlane.xlu2 %1537 }
 0x30d   : > { %v1539_v17 = vsub.f32 %v1532_v32, %v1538_v7 }
 0x30f   : > { %v1540_v18 = vmul.f32 1.442695, %v1539_v17 }
 0x311   : > { %6954 = vpow2.f32 %v1540_v18  ;;  %v6523_v18 = vld [vmem:[#allocation13 + $0xf4] sm:$0xf0] }
 0x312   : > { %v5263_v20 = vor.u32 %v6523_v18, %v5262_v16  ;;  %v5312_v16 = vld [vmem:[#allocation13 + $0x58] sm:$0xf0] }
 0x317   : > { %v6955_v22 = vpop.eup %6954 }
 0x318   : > { %v1545_v23 = vpack.c.bf16 %v6955_v22, %v6955_v22  ;;  %v1542_v0 = vsel %vm1535_vm8, %v6955_v22, 0.0  ;;  %v5264_v22 = vld [vmem:[#allocation13 + $0xf8] sm:$0xf0] }
 0x319   : > { %v1603_v1 = vpop.xlane.xlu2 %1602  ;;  %1543 = vadd.xlane.f32.xlu0 %v1542_v0  ;;  %v6521_v0 = vld [vmem:[#allocation13 + $0xe4] sm:$0xf0] }
 0x31a   : > { %v1604_v26 = vsub.f32 %v7857_v36, %v1603_v1  ;;  %5072 = vmatmul.msk.bf16.vlgmr.msrb.gmra.mxu1 %vm1535_vm8, %v1545_v23  ;;  %v5254_v23 = vld [vmem:[#allocation13 + $0xe0] sm:$0xf]  ;;  %v5267_v1 = vor.u32 %v6522_v19, %v5264_v22  ;;  %v6515_v22 = vld [vmem:[#allocation13 + $0xb4] sm:$0xf0] }
 0x31b   : > { %1900 = vmatpush.bf16.msrb.mxu1 %v1891_v27  ;;  %v5256_v27 = vld [vmem:[#allocation13 + $0xe8] sm:$0xf0] }
 0x31c   : > { %v1605_v29 = vmul.f32 1.442695, %v1604_v26  ;;  %v6520_v26 = vld [vmem:[#allocation13 + $0xe4] sm:$0xf] }
 0x31e   : > { %6956 = vpow2.f32 %v1605_v29  ;;  %v5255_v29 = vor.u32 %v6521_v0, %v5254_v23  ;;  %v6514_v23 = vld [vmem:[#allocation13 + $0xb4] sm:$0xf] }
 0x324   : > { %v6957_v3 = vpop.eup %6956 }
 0x325   : > { %v1610_v32 = vpack.c.bf16 %v6957_v3, %v6957_v3  ;;  %v1607_v33 = vsel %vm1535_vm8, %v6957_v3, 0.0  ;;  %v5259_v3 = vor.u32 %v6520_v26, %v5256_v27  ;;  %v5302_v27 = vld [vmem:[#allocation13 + $0x40] sm:$0xf] }
 0x326   : > { %1608 = vadd.xlane.f32.xlu1 %v1607_v33 }
 0x327   : > { %5073 = vmatmul.msk.bf16.vlgmr.msrb.gmra.mxu3 %vm1535_vm8, %v1610_v32  ;;  %v5327_v32 = vor.u32 %v6507_v31, %v5326_v28  ;;  %v6501_v28 = vld [vmem:[#allocation13 + $0x44] sm:$0xf0] }
 0x328   : > { %1964 = vmatpush.bf16.msrb.mxu3 %v1955_v34  ;;  %v5246_v34 = vld [vmem:[#allocation13 + $0xd0] sm:$0xf]  ;;  %v5303_v31 = vor.u32 %v6501_v28, %v5302_v27 }
 0x38c   : > { %v1544_v35 = vpop.xlane.xlu0 %1543 }
 0x38d   : > { %6958 = vrcp.f32 %v1544_v35  ;;  %v6519_v35 = vld [vmem:[#allocation13 + $0xd4] sm:$0xf0] }
 0x393   : > { %v6959_v36 = vpop.eup %6958 }
 0x397   : > { %v1562_v37 = vpop.f32.mrf.mxu1 }
 0x398   : > { %v1567_v38 = vmul.f32 %v6959_v36, %v1562_v37  ;;  %v6518_v37 = vld [vmem:[#allocation13 + $0xd4] sm:$0xf] }
 0x399   : > { %v1609_v40 = vpop.xlane.xlu1 %1608 }
 0x39a   : > { %v1568_v39 = vpack.c.bf16 %v1567_v38, %v1567_v38  ;;  %6960 = vrcp.f32 %v1609_v40  ;;  %v5248_v38 = vld [vmem:[#allocation13 + $0xd8] sm:$0xf0] }
 0x39b   : > { %v5251_v41 = vor.u32 %v6518_v37, %v5248_v38  ;;  %v5294_v37 = vld [vmem:[#allocation13 + $0x30] sm:$0xf]  ;;  %v6499_v38 = vld [vmem:[#allocation13 + $0x34] sm:$0xf0] }
 0x39c   : > { %1843 = vmatmul.bf16.vlgmr.msra.gmra.mxu2 %v1568_v39  ;;  %1856 = vmatmul.bf16.vlgmr.msra.gmra.mxu3 %v1568_v39 }
 0x39d   : > { %2175 = vmatpush.bf16.msra.mxu2 %v5327_v32  ;;  %v6513_v32 = vld [vmem:[#allocation13 + $0xa4] sm:$0xf0] }
 0x39f   : > { %v1564_v4 = vpop.f32.mrf.mxu1 }
 0x3a0   : > { %v6961_v42 = vpop.eup %6960  ;;  %v5247_v4 = vor.u32 %v6519_v35, %v5246_v34  ;;  %v5224_v35 = vld [vmem:[#allocation13 + $0xa8] sm:$0xf0] }
 0x3aa   : > { %v1626_v44 = vpop.f32.mrf.mxu3 }
 0x3ab   : > { %v1631_v45 = vmul.f32 %v6961_v42, %v1626_v44 }
 0x3ac   : > { %1936 = vmatmul.bf16.vlgmr.msrb.gmra.mxu2 %v1925_v43 }
 0x3ad   : > { %v1632_v46 = vpack.c.bf16 %v1631_v45, %v1631_v45 }
 0x3af   : > { %1737 = vmatmul.bf16.vlgmr.msra.gmra.mxu0 %v1632_v46  ;;  %1750 = vmatmul.bf16.vlgmr.msra.gmra.mxu1 %v1632_v46 }
 0x3b0   : > { %2069 = vmatpush.bf16.msra.mxu0 %v5263_v20  ;;  %2082 = vmatpush.bf16.msra.mxu1 %v5267_v1  ;;  %v5230_v20 = vld [vmem:[#allocation13 + $0xb0] sm:$0xf]  ;;  %v5232_v1 = vld [vmem:[#allocation13 + $0xb8] sm:$0xf0] }
 0x3b1   : > { %v5231_v0 = vor.u32 %v6515_v22, %v5230_v20  ;;  %v5235_v26 = vor.u32 %v6514_v23, %v5232_v1 }
 0x3b2   : > { %v1628_v47 = vpop.f32.mrf.mxu3 }
 0x3b4   : > { %2070 = vmatpush.bf16.msra.mxu0 %v5255_v29  ;;  %2083 = vmatpush.bf16.msra.mxu1 %v5259_v3  ;;  %v6500_v29 = vld [vmem:[#allocation13 + $0x44] sm:$0xf]  ;;  %v5222_v3 = vld [vmem:[#allocation13 + $0xa0] sm:$0xf] }
 0x3b5   : > { %v5223_v34 = vor.u32 %v6513_v32, %v5222_v3 }
 0x3b8   : > { %2071 = vmatpush.bf16.msra.mxu0 %v5247_v4  ;;  %2084 = vmatpush.bf16.msra.mxu1 %v5251_v41  ;;  %v5295_v4 = vor.u32 %v6499_v38, %v5294_v37  ;;  %v7008_v37 = vld [vmem:[%s7736_s30 + $0x10] sm:$0xff] }
 0x3bf   : > { %1872 = vmatmul.bf16.vlgmr.msrb.gmra.mxu0 %v1861_v49 }
 0x41f   : > { %v1844_v50 = vpop.f32.mrf.mxu2  ;;  %v1857_v51 = vpop.f32.mrf.mxu3 }
 0x427   : > { %v1846_v52 = vpop.f32.mrf.mxu2  ;;  %v1859_v55 = vpop.f32.mrf.mxu3 }
 0x42c   : > { %v1738_v56 = vpop.f32.mrf.mxu0  ;;  %v1751_v57 = vpop.f32.mrf.mxu1 }
 0x42d   : > { %v1845_v58 = vadd.f32 %v1844_v50, %v1738_v56  ;;  %v1858_v59 = vadd.f32 %v1857_v51, %v1751_v57 }
 0x42f   : > { %v1937_v61 = vpop.f32.mrf.mxu2  ;;  %v2201_v25 = vadd.f32 %v7006_v63, %v1845_v58  ;;  %v2202_v2 = vadd.f32 %v7007_v54, %v1858_v59  ;;  %v6504_v63 = vld [vmem:[#allocation13 + $0x64] sm:$0xf]  ;;  %v5320_v54 = vld [vmem:[#allocation13 + $0x68] sm:$0xf0] }
 0x430   : > { %v1938_v24 = vadd.f32 %v1937_v61, %v7850_v30  ;;  %v5318_v61 = vld [vmem:[#allocation13 + $0x60] sm:$0xf] }
 0x431   : > { %v7884_v10 = vadd.f32 %v2207_v53, %v2201_v25  ;;  %v7888_v11 = vadd.f32 %v2208_v5, %v2202_v2  ;;  %v5238_v2 = vld [vmem:[#allocation13 + $0xc0] sm:$0xf] }
 0x432   : > { %v1941_v6 = vsel %vm1535_vm8, %v1938_v24, -inf }
 0x433   : > { %1942 = vmax.xlane.f32.xlu0 %v1941_v6  ;;  %v2217_v13 = vadd.f32 %v7888_v11, %v7884_v10  ;;  %v6517_v6 = vld [vmem:[#allocation13 + $0xc4] sm:$0xf0] }
 0x434   : > { %v1740_v8 = vpop.f32.mrf.mxu0  ;;  %v1753_v9 = vpop.f32.mrf.mxu1 }
 0x435   : > { %v5323_v8 = vor.u32 %v6504_v63, %v5320_v54  ;;  %v5239_v9 = vor.u32 %v6517_v6, %v5238_v2  ;;  %v5208_v63 = vld [vmem:[#allocation13 + $0x88] sm:$0xf0]  ;;  %v5278_v54 = vld [vmem:[#allocation13 + $0x10] sm:$0xf]  ;;  %v6495_v2 = vld [vmem:[#allocation13 + $0x14] sm:$0xf0] }
 0x436   : > { %v6494_v6 = vld [vmem:[#allocation13 + $0x14] sm:$0xf] }
 0x437   : > { %v1939_v12 = vpop.f32.mrf.mxu2  ;;  %2072 = vmatpush.bf16.msra.mxu0 %v5239_v9  ;;  %v5280_v9 = vld [vmem:[#allocation13 + $0x18] sm:$0xf0] }
 0x438   : > { %v6516_v12 = vld [vmem:[#allocation13 + $0xc4] sm:$0xf] }
 0x43b   : > { %2218 = vadd.xlane.f32.xlu0 %v2217_v13  ;;  %v5240_v13 = vld [vmem:[#allocation13 + $0xc8] sm:$0xf0]  ;;  %2073 = vmatpush.bf16.msra.mxu0 %v5231_v0 }
 0x43c   : > { %v1873_v14 = vpop.f32.mrf.mxu0 }
 0x43d   : > { %v1874_v15 = vadd.f32 %v1873_v14, %v7850_v30  ;;  %v5328_v30 = vld [vmem:[#allocation13 + $0x78] sm:$0xf0]  ;;  %v5310_v14 = vld [vmem:[#allocation13 + $0x50] sm:$0xf] }
 0x43e   : > { %v5331_v33 = vor.u32 %v6506_v21, %v5328_v30  ;;  %v5304_v21 = vld [vmem:[#allocation13 + $0x48] sm:$0xf0] }
 0x43f   : > { %v1877_v7 = vsel %vm1535_vm8, %v1874_v15, -inf  ;;  %v5307_v30 = vor.u32 %v6500_v29, %v5304_v21  ;;  %2074 = vmatpush.bf16.msra.mxu0 %v5223_v34 }
 0x440   : > { %1878 = vmax.xlane.f32.xlu2 %v1877_v7  ;;  %2188 = vmatpush.bf16.msra.mxu3 %v5331_v33  ;;  %v6503_v7 = vld [vmem:[#allocation13 + $0x54] sm:$0xf0]  ;;  %v6512_v33 = vld [vmem:[#allocation13 + $0xa4] sm:$0xf] }
 0x441   : > { %v5311_v18 = vor.u32 %v6503_v7, %v5310_v14  ;;  %v6493_v14 = vld [vmem:[#allocation13 + $0x4] sm:$0xf0] }
 0x444   : > { %v1875_v17 = vpop.f32.mrf.mxu0  ;;  %2189 = vmatpush.bf16.msra.mxu3 %v5323_v8  ;;  %v5279_v8 = vor.u32 %v6495_v2, %v5278_v54  ;;  %v6548_v54 = vld [vmem:[#allocation19 + $0x184] sm:$0xf] }
 0x445   : > { %v6502_v17 = vld [vmem:[#allocation13 + $0x54] sm:$0xf]  ;;  %v5432_v2 = vld [vmem:[#allocation19 + $0x1a0] sm:$0xf0] }
 0x446   : > { %v5315_v19 = vor.u32 %v6502_v17, %v5312_v16  ;;  %v5272_v17 = vld [vmem:[#allocation13 + $0x8] sm:$0xf0] }
 0x448   : > { %2190 = vmatpush.bf16.msra.mxu3 %v5315_v19 }
 0x44c   : > { %2191 = vmatpush.bf16.msra.mxu3 %v5307_v30 }
 0x4a6   : > { %v1943_v36 = vpop.xlane.xlu0 %1942 }
 0x4a7   : > { %v1944_v39 = vsub.f32 %v1938_v24, %v1943_v36  ;;  %v6505_v24 = vld [vmem:[#allocation13 + $0x64] sm:$0xf0]  ;;  %v5227_v36 = vor.u32 %v6512_v33, %v5224_v35 }
 0x4a8   : > { %v5319_v25 = vor.u32 %v6505_v24, %v5318_v61  ;;  %v6508_v61 = vld [vmem:[#allocation13 + $0x84] sm:$0xf] }
 0x4a9   : > { %v1945_v40 = vmul.f32 1.442695, %v1944_v39  ;;  %v6498_v39 = vld [vmem:[#allocation13 + $0x34] sm:$0xf] }
 0x4aa   : > { %2176 = vmatpush.bf16.msra.mxu2 %v5319_v25  ;;  %v5211_v25 = vor.u32 %v6508_v61, %v5208_v63  ;;  %v5558_v61 = vld [vmem:[#allocation19 + $0x380] sm:$0xf] }
 0x4ab   : > { %6962 = vpow2.f32 %v1945_v40  ;;  %v5296_v40 = vld [vmem:[#allocation13 + $0x38] sm:$0xf0] }
 0x4ac   : > { %v5299_v41 = vor.u32 %v6498_v39, %v5296_v40  ;;  %v7009_v39 = vld [vmem:[%s7736_s30 + $0x18] sm:$0xff]  ;;  %s8237_s30 = sld [smem:[#allocation40_spill]] }
 0x4ae   : > { %v2219_v42 = vpop.xlane.xlu0 %2218  ;;  %2177 = vmatpush.bf16.msra.mxu2 %v5311_v18  ;;  %2192 = vmatpush.bf16.msra.mxu3 %v5299_v41 }
 0x4af   : > { %v2223_v43 = vmul.f32 %v2219_v42, %v7789_v62  ;;  %v5214_v42 = vld [vmem:[#allocation13 + $0x90] sm:$0xf] }
 0x4b1   : > { %v6963_v44 = vpop.eup %6962  ;;  %v7896_v45 = vsub.f32 %v7884_v10, %v2223_v43  ;;  %v7899_v46 = vsub.f32 %v7888_v11, %v2223_v43  ;;  %v6511_v43 = vld [vmem:[#allocation13 + $0x94] sm:$0xf0] }
 0x4b2   : > { %v1950_v47 = vpack.c.bf16 %v6963_v44, %v6963_v44  ;;  %v1947_v48 = vsel %vm1535_vm8, %v6963_v44, 0.0  ;;  %2178 = vmatpush.bf16.msra.mxu2 %v5303_v31  ;;  %v6510_v44 = vld [vmem:[#allocation13 + $0x94] sm:$0xf]  ;;  %s4474_s2 = scalar_lea.hbm %s8237_s30, %s6781_s22  ;;  %s7390_s28 = scalar_lea.hbm %s8237_s30, 64 }
 0x4b3   : > { %v1879_v49 = vpop.xlane.xlu2 %1878  ;;  %1948 = vadd.xlane.f32.xlu2 %v1947_v48  ;;  %v2229_v51 = vmul.f32 %v7896_v45, %v7896_v45  ;;  %v2230_v52 = vmul.f32 %v7899_v46, %v7899_v46  ;;  %v5216_v48 = vld [vmem:[#allocation13 + $0x98] sm:$0xf0]  ;;  %s4477_s1 = sshll.u32 %s4474_s2, 4  ;;  %s4478_s1 = int_to_ptr.hbm [resolvable:$true] %s4477_s1 }
 0x4b4   : > { %v1880_v50 = vsub.f32 %v1874_v15, %v1879_v49  ;;  %5203 = vmatmul.msk.bf16.vlgmr.msrb.gmra.mxu3 %vm1535_vm8, %v1950_v47  ;;  %v5243_v15 = vor.u32 %v6516_v12, %v5240_v13  ;;  %v5215_v47 = vor.u32 %v6511_v43, %v5214_v42  ;;  %v5219_v49 = vor.u32 %v6510_v44, %v5216_v48  ;;  %v5270_v13 = vld [vmem:[#allocation13] sm:$0xf]  ;;  %v6554_v48 = vld [vmem:[#allocation19 + $0x1dc] sm:$0xf0]  ;;  %s7384_s14 = sshra.s32 %s4478_s1, 4  ;;  %s7385_s14 = int_to_ptr.hbm [resolvable:$true] %s7384_s14 }
 0x4b5   : > { %v2233_v56 = vadd.f32 %v2230_v52, %v2229_v51  ;;  %v6497_v51 = vld [vmem:[#allocation13 + $0x24] sm:$0xf0]  ;;  %v6496_v52 = vld [vmem:[#allocation13 + $0x24] sm:$0xf]  ;;  %v5283_v12 = vor.u32 %v6494_v6, %v5280_v9  ;;  %v5271_v7 = vor.u32 %v6493_v14, %v5270_v13  ;;  %s7386_s23 = scalar_lea.hbm %s7385_s14, 32  ;;  %p7391_p13 = scmp.lt.s32.totalorder %s7385_s14, %s8237_s30 }
 0x4b6   : > { %v1881_v55 = vmul.f32 1.442695, %v1880_v50  ;;  %2085 = vmatpush.bf16.msra.mxu1 %v5243_v15  ;;  %2179 = vmatpush.bf16.msra.mxu2 %v5295_v4  ;;  %v5286_v50 = vld [vmem:[#allocation13 + $0x20] sm:$0xf]  ;;  %v6492_v15 = vld [vmem:[#allocation13 + $0x4] sm:$0xf]  ;;  %p7387_p1 = scmp.ne.s32.totalorder %s7385_s14, %s7386_s23  ;;  %p7392_p7 = scmp.lt.s32.totalorder %s7390_s28, %s7386_s23 }
 0x4b7   : > { %2075 = vmatpush.bf16.msra.mxu0 %v5215_v47  ;;  %v5275_v16 = vor.u32 %v6492_v15, %v5272_v17  ;;  %v5446_v47 = vld [vmem:[#allocation19 + $0x1c0] sm:$0xf]  ;;  %v6580_v6 = vld [vmem:[#allocation19 + $0x384] sm:$0xf] }
 0x4b8   : > { %6964 = vpow2.f32 %v1881_v55  ;;  %v5287_v55 = vor.u32 %v6497_v51, %v5286_v50  ;;  %v5447_v50 = vor.u32 %v6554_v48, %v5446_v47  ;;  %v6586_v51 = vld [vmem:[#allocation19 + $0x3dc] sm:$0xf0]  ;;  %v5560_v9 = vld [vmem:[#allocation19 + $0x3a0] sm:$0xf0]  ;;  %p7388_p3 = pnand %p7387_p1, %p7697_p0  ;;  %p7393_p8 = por %p7392_p7, %p7391_p13 }
 0x4b9   : > { %v6546_v13 = vld [vmem:[#allocation19 + $0x15c] sm:$0xf0]  ;;  %v5563_v14 = vor.u32 %v6580_v6, %v5560_v9  ;;  %v6544_v17 = vld [vmem:[#allocation19 + $0x144] sm:$0xf] }
 0x4ba   : > { %2086 = vmatpush.bf16.msra.mxu1 %v5235_v26  ;;  %2180 = vmatpush.bf16.msra.mxu2 %v5287_v55  ;;  %v5448_v55 = vld [vmem:[#allocation19 + $0x1e0] sm:$0xf0]  ;;  %v5542_v15 = vld [vmem:[#allocation19 + $0x340] sm:$0xf]  ;;  %p7389_p4 = pneg %p7388_p3 }
 0x4bb   : > { %2234 = vadd.xlane.f32.xlu2 %v2233_v56  ;;  %v5288_v56 = vld [vmem:[#allocation13 + $0x28] sm:$0xf0] }
 0x4bc   : > { %v5352_v6 = vld [vmem:[#allocation19 + $0x60] sm:$0xf0]  ;;  %p7394_p9 = pnand %p7393_p8, %p7389_p4 }
 0x4bd   : > { %v5480_v9 = vld [vmem:[#allocation19 + $0x260] sm:$0xf0] }
 0x4be   : > { %v6965_v57 = vpop.eup %6964  ;;  %2087 = vmatpush.bf16.msra.mxu1 %v5227_v36  ;;  %2181 = vmatpush.bf16.msra.mxu2 %v5279_v8  ;;  %v5435_v8 = vor.u32 %v6548_v54, %v5432_v2  ;;  %v6562_v54 = vld [vmem:[#allocation19 + $0x25c] sm:$0xf0]  ;;  %v6528_v2 = vld [vmem:[#allocation19 + $0x44] sm:$0xf] }
 0x4bf   : > { %v1886_v58 = vpack.c.bf16 %v6965_v57, %v6965_v57  ;;  %v1883_v59 = vsel %vm1535_vm8, %v6965_v57, 0.0  ;;  %v5291_v57 = vor.u32 %v6496_v52, %v5288_v56  ;;  %v6552_v52 = vld [vmem:[#allocation19 + $0x1c4] sm:$0xf] }
 0x4c0   : > { %1884 = vadd.xlane.f32.xlu1 %v1883_v59  ;;  %v6509_v59 = vld [vmem:[#allocation13 + $0x84] sm:$0xf0] }
 0x4c1   : > { %5202 = vmatmul.msk.bf16.vlgmr.msrb.gmra.mxu1 %vm1535_vm8, %v1886_v58  ;;  %v5206_v58 = vld [vmem:[#allocation13 + $0x80] sm:$0xf]  ;;  %2193 = vmatpush.bf16.msra.mxu3 %v5291_v57  ;;  %v6584_v57 = vld [vmem:[#allocation19 + $0x3c4] sm:$0xf] }
 0x4c2   : > { %2088 = vmatpush.bf16.msra.mxu1 %v5219_v49  ;;  %v5207_v24 = vor.u32 %v6509_v59, %v5206_v58  ;;  %2182 = vmatpush.bf16.msra.mxu2 %v5271_v7  ;;  %v5574_v49 = vld [vmem:[#allocation19 + $0x3c0] sm:$0xf]  ;;  %v5576_v58 = vld [vmem:[#allocation19 + $0x3e0] sm:$0xf0] }
 0x4c3   : > { %v5575_v56 = vor.u32 %v6586_v51, %v5574_v49  ;;  %v6550_v59 = vld [vmem:[#allocation19 + $0x19c] sm:$0xf0] }
 0x4c4   : > { %2076 = vmatpush.bf16.msra.mxu0 %v5207_v24  ;;  %v6582_v24 = vld [vmem:[#allocation19 + $0x39c] sm:$0xf0]  ;;  %v5431_v63 = vor.u32 %v6550_v59, %v5430_v60 }
 0x4c5   : > { %2194 = vmatpush.bf16.msra.mxu3 %v5283_v12  ;;  %v5414_v12 = vld [vmem:[#allocation19 + $0x140] sm:$0xf] }
 0x4c6   : > { %2089 = vmatpush.bf16.msra.mxu1 %v5211_v25  ;;  %v5559_v25 = vor.u32 %v6582_v24, %v5558_v61  ;;  %v6578_v7 = vld [vmem:[#allocation19 + $0x35c] sm:$0xf0] }
 0x4c7   : > { %v5366_v49 = vld [vmem:[#allocation19 + $0x80] sm:$0xf] }
 0x4c8   : > { %2681 = vmatpush.bf16.msrb.mxu0 %v5447_v50  ;;  %v6534_v50 = vld [vmem:[#allocation19 + $0x9c] sm:$0xf0] }
 0x4c9   : > { %2195 = vmatpush.bf16.msra.mxu3 %v5275_v16  ;;  %v5415_v16 = vor.u32 %v6546_v13, %v5414_v12  ;;  %v5494_v51 = vld [vmem:[#allocation19 + $0x280] sm:$0xf]  ;;  %v5367_v60 = vor.u32 %v6534_v50, %v5366_v49 }
 0x4ca   : > { %2695 = vmatpush.bf16.msrb.mxu1 %v5575_v56  ;;  %v6532_v56 = vld [vmem:[#allocation19 + $0x84] sm:$0xf]  ;;  %v5350_v61 = vld [vmem:[#allocation19 + $0x40] sm:$0xf] }
 0x4cb   : > { %v6530_v24 = vld [vmem:[#allocation19 + $0x5c] sm:$0xf0] }
 0x4cc   : > { %2682 = vmatpush.bf16.msrb.mxu0 %v5431_v63  ;;  %v5478_v63 = vld [vmem:[#allocation19 + $0x240] sm:$0xf]  ;;  %v5351_v13 = vor.u32 %v6530_v24, %v5350_v61  ;;  %v5422_v61 = vld [vmem:[#allocation19 + $0x148] sm:$0xf] }
 0x4cd   : > { %v6547_v24 = vld [vmem:[#allocation19 + $0x164] sm:$0xf0] }
 0x4ce   : > { %2696 = vmatpush.bf16.msrb.mxu1 %v5559_v25 }
 0x4d0   : > { %2683 = vmatpush.bf16.msrb.mxu0 %v5415_v16 }
 0x526   : > { %v1949_v18 = vpop.xlane.xlu2 %1948 }
 0x527   : > { %6966 = vrcp.f32 %v1949_v18  ;;  %v5416_v18 = vld [vmem:[#allocation19 + $0x160] sm:$0xf0] }
 0x52d   : > { %v6967_v20 = vpop.eup %6966 }
 0x533   : > { %v1885_v19 = vpop.xlane.xlu1 %1884 }
 0x534   : > { %6968 = vrcp.f32 %v1885_v19  ;;  %v6576_v19 = vld [vmem:[#allocation19 + $0x344] sm:$0xf] }
 0x537   : > { %v1966_v22 = vpop.f32.mrf.mxu3 }
 0x538   : > { %v1971_v23 = vmul.f32 %v6967_v20, %v1966_v22  ;;  %v5544_v20 = vld [vmem:[#allocation19 + $0x360] sm:$0xf0]  ;;  %v5543_v22 = vor.u32 %v6578_v7, %v5542_v15  ;;  %v5479_v15 = vor.u32 %v6562_v54, %v5478_v63  ;;  %v5355_v7 = vor.u32 %v6528_v2, %v5352_v6  ;;  %v5550_v63 = vld [vmem:[#allocation19 + $0x348] sm:$0xf]  ;;  %v6545_v2 = vld [vmem:[#allocation19 + $0x14c] sm:$0xf] }
 0x539   : > { %v6579_v54 = vld [vmem:[#allocation19 + $0x364] sm:$0xf0]  ;;  %v5424_v6 = vld [vmem:[#allocation19 + $0x168] sm:$0xf0] }
 0x53a   : > { %v1972_v0 = vpack.c.bf16 %v1971_v23, %v1971_v23  ;;  %v6969_v1 = vpop.eup %6968  ;;  %v5419_v23 = vor.u32 %v6544_v17, %v5416_v18  ;;  %2697 = vmatpush.bf16.msrb.mxu1 %v5543_v22 }
 0x53c   : > { %2077 = vmatmul.bf16.vlgmr.msra.gmra.mxu0 %v1972_v0  ;;  %2090 = vmatmul.bf16.vlgmr.msra.gmra.mxu1 %v1972_v0  ;;  %v5398_v0 = vld [vmem:[#allocation19 + $0x100] sm:$0xf] }
 0x53e   : > { %v1902_v26 = vpop.f32.mrf.mxu1 }
 0x53f   : > { %v1907_v27 = vmul.f32 %v6969_v1, %v1902_v26  ;;  %v1968_v28 = vpop.f32.mrf.mxu3  ;;  %v6542_v1 = vld [vmem:[#allocation19 + $0x11c] sm:$0xf0] }
 0x540   : > { %v5526_v26 = vld [vmem:[#allocation19 + $0x300] sm:$0xf] }
 0x541   : > { %v1908_v29 = vpack.c.bf16 %v1907_v27, %v1907_v27  ;;  %v5547_v27 = vor.u32 %v6576_v19, %v5544_v20  ;;  %v6574_v28 = vld [vmem:[#allocation19 + $0x31c] sm:$0xf0] }
 0x543   : > { %2183 = vmatmul.bf16.vlgmr.msra.gmra.mxu2 %v1908_v29  ;;  %2196 = vmatmul.bf16.vlgmr.msra.gmra.mxu3 %v1908_v29  ;;  %v6540_v29 = vld [vmem:[#allocation19 + $0x104] sm:$0xf] }
 0x546   : > { %v1904_v31 = vpop.f32.mrf.mxu1 }
 0x547   : > { %v5400_v31 = vld [vmem:[#allocation19 + $0x120] sm:$0xf0] }
 0x5b9   : > { %v2078_v21 = vpop.f32.mrf.mxu0  ;;  %v2091_v30 = vpop.f32.mrf.mxu1 }
 0x5c1   : > { %v2080_v3 = vpop.f32.mrf.mxu0  ;;  %v2093_v32 = vpop.f32.mrf.mxu1 }
 0x5c2   : > { %v5399_v3 = vor.u32 %v6542_v1, %v5398_v0  ;;  %v5527_v32 = vor.u32 %v6574_v28, %v5526_v26  ;;  %v6526_v0 = vld [vmem:[#allocation19 + $0x1c] sm:$0xf0]  ;;  %v6524_v28 = vld [vmem:[#allocation19 + $0x4] sm:$0xf] }
 0x5c3   : > { %v5462_v1 = vld [vmem:[#allocation19 + $0x200] sm:$0xf] }
 0x5c4   : > { %2684 = vmatpush.bf16.msrb.mxu0 %v5399_v3  ;;  %2698 = vmatpush.bf16.msrb.mxu1 %v5527_v32  ;;  %v5464_v3 = vld [vmem:[#allocation19 + $0x220] sm:$0xf0]  ;;  %v5454_v32 = vld [vmem:[#allocation19 + $0x1c8] sm:$0xf] }
 0x5c6   : > { %v2184_v33 = vpop.f32.mrf.mxu2  ;;  %v2197_v34 = vpop.f32.mrf.mxu3 }
 0x5c7   : > { %v2185_v35 = vadd.f32 %v2184_v33, %v2078_v21  ;;  %v2198_v36 = vadd.f32 %v2197_v34, %v2091_v30  ;;  %v6572_v21 = vld [vmem:[#allocation19 + $0x304] sm:$0xf]  ;;  %v5403_v33 = vor.u32 %v6540_v29, %v5400_v31  ;;  %v5382_v34 = vld [vmem:[#allocation19 + $0xc0] sm:$0xf] }
 0x5c8   : > { %v5528_v30 = vld [vmem:[#allocation19 + $0x320] sm:$0xf0] }
 0x5c9   : > { %v2203_v38 = vadd.f32 %v7008_v37, %v2185_v35  ;;  %v2204_v4 = vadd.f32 %v7009_v39, %v2198_v36  ;;  %v6538_v35 = vld [vmem:[#allocation19 + $0xdc] sm:$0xf0]  ;;  %v5531_v37 = vor.u32 %v6572_v21, %v5528_v30  ;;  %v6536_v39 = vld [vmem:[#allocation19 + $0xc4] sm:$0xf] }
 0x5ca   : > { %v5510_v36 = vld [vmem:[#allocation19 + $0x2c0] sm:$0xf]  ;;  %v5336_v29 = vld [vmem:[#allocation19 + $0x20] sm:$0xf0] }
 0x5cb   : > { %v7913_v40 = vadd.f32 %v2207_v53, %v2203_v38  ;;  %v7917_v41 = vadd.f32 %v2208_v5, %v2204_v4  ;;  %v5451_v53 = vor.u32 %v6552_v52, %v5448_v55  ;;  %v5579_v5 = vor.u32 %v6584_v57, %v5576_v58  ;;  %v6570_v38 = vld [vmem:[#allocation19 + $0x2dc] sm:$0xf0]  ;;  %v5384_v4 = vld [vmem:[#allocation19 + $0xe0] sm:$0xf0] }
 0x5cc   : > { %v5511_v47 = vor.u32 %v6570_v38, %v5510_v36  ;;  %v5387_v48 = vor.u32 %v6536_v39, %v5384_v4  ;;  %v6566_v55 = vld [vmem:[#allocation19 + $0x29c] sm:$0xf0]  ;;  %v6564_v57 = vld [vmem:[#allocation19 + $0x284] sm:$0xf]  ;;  %v5339_v21 = vor.u32 %v6524_v28, %v5336_v29  ;;  %v6587_v36 = vld [vmem:[#allocation19 + $0x3e4] sm:$0xf0] }
 0x5cd   : > { %v2220_v42 = vadd.f32 %v7917_v41, %v7913_v40  ;;  %2709 = vmatpush.bf16.msrb.mxu2 %v5451_v53  ;;  %2723 = vmatpush.bf16.msrb.mxu3 %v5579_v5  ;;  %v5368_v53 = vld [vmem:[#allocation19 + $0xa0] sm:$0xf0]  ;;  %v5495_v5 = vor.u32 %v6566_v55, %v5494_v51  ;;  %v6553_v39 = vld [vmem:[#allocation19 + $0x1cc] sm:$0xf]  ;;  %v5566_v51 = vld [vmem:[#allocation19 + $0x388] sm:$0xf] }
 0x5ce   : > { %v2186_v43 = vpop.f32.mrf.mxu2  ;;  %v2199_v44 = vpop.f32.mrf.mxu3  ;;  %v5496_v58 = vld [vmem:[#allocation19 + $0x2a0] sm:$0xf0]  ;;  %2699 = vmatpush.bf16.msrb.mxu1 %v5511_v47  ;;  %v5371_v59 = vor.u32 %v6532_v56, %v5368_v53  ;;  %v5456_v4 = vld [vmem:[#allocation19 + $0x1e8] sm:$0xf0]  ;;  %v5438_v47 = vld [vmem:[#allocation19 + $0x188] sm:$0xf] }
 0x5cf   : > { %2221 = vadd.xlane.f32.xlu1 %v2220_v42  ;;  %v6568_v42 = vld [vmem:[#allocation19 + $0x2c4] sm:$0xf]  ;;  %v5383_v44 = vor.u32 %v6538_v35, %v5382_v34  ;;  %v5499_v25 = vor.u32 %v6564_v57, %v5496_v58  ;;  %v6555_v34 = vld [vmem:[#allocation19 + $0x1e4] sm:$0xf0]  ;;  %v6549_v55 = vld [vmem:[#allocation19 + $0x18c] sm:$0xf] }
 0x5d0   : > { %v5512_v43 = vld [vmem:[#allocation19 + $0x2e0] sm:$0xf0]  ;;  %v5582_v35 = vld [vmem:[#allocation19 + $0x3c8] sm:$0xf]  ;;  %v5440_v53 = vld [vmem:[#allocation19 + $0x1a8] sm:$0xf0] }
 0x5d1   : > { %2710 = vmatpush.bf16.msrb.mxu2 %v5435_v8  ;;  %2724 = vmatpush.bf16.msrb.mxu3 %v5563_v14  ;;  %v5515_v52 = vor.u32 %v6568_v42, %v5512_v43  ;;  %v6560_v8 = vld [vmem:[#allocation19 + $0x244] sm:$0xf]  ;;  %v5583_v38 = vor.u32 %v6587_v36, %v5582_v35  ;;  %v6585_v42 = vld [vmem:[#allocation19 + $0x3cc] sm:$0xf]  ;;  %v5459_v43 = vor.u32 %v6553_v39, %v5456_v4 }
 0x5d2   : > { %2685 = vmatpush.bf16.msrb.mxu0 %v5383_v44  ;;  %2700 = vmatpush.bf16.msrb.mxu1 %v5495_v5  ;;  %v5483_v17 = vor.u32 %v6560_v8, %v5480_v9  ;;  %v6556_v30 = vld [vmem:[#allocation19 + $0x204] sm:$0xf]  ;;  %v5584_v44 = vld [vmem:[#allocation19 + $0x3e8] sm:$0xf0]  ;;  %v5551_v8 = vor.u32 %v6579_v54, %v5550_v63  ;;  %v5427_v9 = vor.u32 %v6545_v2, %v5424_v6 }
 0x5d3   : > { %v5587_v49 = vor.u32 %v6585_v42, %v5584_v44  ;;  %v6581_v57 = vld [vmem:[#allocation19 + $0x38c] sm:$0xf]  ;;  %v5374_v42 = vld [vmem:[#allocation19 + $0x88] sm:$0xf] }
 0x5d4   : > { %v5568_v58 = vld [vmem:[#allocation19 + $0x3a8] sm:$0xf0]  ;;  %v5502_v44 = vld [vmem:[#allocation19 + $0x288] sm:$0xf] }
 0x5d5   : > { %2711 = vmatpush.bf16.msrb.mxu2 %v5419_v23  ;;  %2725 = vmatpush.bf16.msrb.mxu3 %v5547_v27  ;;  %v5334_v23 = vld [vmem:[#allocation19] sm:$0xf]  ;;  %v5571_v5 = vor.u32 %v6581_v57, %v5568_v58  ;;  %v5536_v28 = vld [vmem:[#allocation19 + $0x328] sm:$0xf0]  ;;  %v5358_v57 = vld [vmem:[#allocation19 + $0x48] sm:$0xf] }
 0x5d6   : > { %2686 = vmatpush.bf16.msrb.mxu0 %v5367_v60  ;;  %2701 = vmatpush.bf16.msrb.mxu1 %v5479_v15  ;;  %v5335_v26 = vor.u32 %v6526_v0, %v5334_v23  ;;  %v6558_v27 = vld [vmem:[#allocation19 + $0x21c] sm:$0xf0]  ;;  %v5443_v60 = vor.u32 %v6549_v55, %v5440_v53  ;;  %v6541_v23 = vld [vmem:[#allocation19 + $0x10c] sm:$0xf]  ;;  %v6531_v58 = vld [vmem:[#allocation19 + $0x64] sm:$0xf0] }
 0x5d7   : > { %v5463_v31 = vor.u32 %v6558_v27, %v5462_v1  ;;  %v5408_v0 = vld [vmem:[#allocation19 + $0x128] sm:$0xf0] }
 0x5d8   : > { %v6573_v27 = vld [vmem:[#allocation19 + $0x30c] sm:$0xf] }
 0x5d9   : > { %2712 = vmatpush.bf16.msrb.mxu2 %v5403_v33  ;;  %2726 = vmatpush.bf16.msrb.mxu3 %v5531_v37  ;;  %v5467_v33 = vor.u32 %v6556_v30, %v5464_v3  ;;  %v5455_v37 = vor.u32 %v6555_v34, %v5454_v32  ;;  %v6539_v30 = vld [vmem:[#allocation19 + $0xe4] sm:$0xf0]  ;;  %v6537_v34 = vld [vmem:[#allocation19 + $0xcc] sm:$0xf] }
 0x5da   : > { %2687 = vmatpush.bf16.msrb.mxu0 %v5351_v13  ;;  %2702 = vmatpush.bf16.msrb.mxu1 %v5463_v31  ;;  %v5552_v13 = vld [vmem:[#allocation19 + $0x368] sm:$0xf0]  ;;  %v5539_v31 = vor.u32 %v6573_v27, %v5536_v28  ;;  %v5518_v3 = vld [vmem:[#allocation19 + $0x2c8] sm:$0xf] }
 0x5db   : > { %v5392_v35 = vld [vmem:[#allocation19 + $0xe8] sm:$0xf0] }
 0x5dc   : > { %v5520_v39 = vld [vmem:[#allocation19 + $0x2e8] sm:$0xf0] }
 0x5dd   : > { %2713 = vmatpush.bf16.msrb.mxu2 %v5387_v48  ;;  %2727 = vmatpush.bf16.msrb.mxu3 %v5515_v52  ;;  %v6551_v48 = vld [vmem:[#allocation19 + $0x1a4] sm:$0xf0]  ;;  %v6565_v55 = vld [vmem:[#allocation19 + $0x28c] sm:$0xf] }
 0x5de   : > { %2688 = vmatpush.bf16.msrb.mxu0 %v5335_v26  ;;  %2751 = vmatpush.bf16.msra.mxu1 %v5583_v38  ;;  %v5439_v50 = vor.u32 %v6551_v48, %v5438_v47  ;;  %v6583_v52 = vld [vmem:[#allocation19 + $0x3a4] sm:$0xf0]  ;;  %v5411_v26 = vor.u32 %v6541_v23, %v5408_v0  ;;  %v6569_v38 = vld [vmem:[#allocation19 + $0x2cc] sm:$0xf] }
 0x5df   : > { %v5567_v56 = vor.u32 %v6583_v52, %v5566_v51  ;;  %v5523_v4 = vor.u32 %v6569_v38, %v5520_v39  ;;  %v6567_v48 = vld [vmem:[#allocation19 + $0x2a4] sm:$0xf0]  ;;  %v5360_v63 = vld [vmem:[#allocation19 + $0x68] sm:$0xf0]  ;;  %v2216_v38 = vld [vmem:[#allocation17] sm:$0x3] }
 0x5e0   : > { %v5503_v51 = vor.u32 %v6567_v48, %v5502_v44  ;;  %v6561_v2 = vld [vmem:[#allocation19 + $0x24c] sm:$0xf]  ;;  %v2278_v48 = vperm.slane %v2216_v38, 1 }
 0x5e1   : > { %2714 = vmatpush.bf16.msrb.mxu2 %v5371_v59  ;;  %2728 = vmatpush.bf16.msrb.mxu3 %v5499_v25  ;;  %v2235_v59 = vpop.xlane.xlu2 %2234  ;;  %v5423_v25 = vor.u32 %v6547_v24, %v5422_v61  ;;  %v6563_v61 = vld [vmem:[#allocation19 + $0x264] sm:$0xf0]  ;;  %v6529_v24 = vld [vmem:[#allocation19 + $0x4c] sm:$0xf] }
 0x5e2   : > { %2737 = vmatpush.bf16.msra.mxu0 %v5455_v37  ;;  %2752 = vmatpush.bf16.msra.mxu1 %v5567_v56  ;;  %v5395_v37 = vor.u32 %v6537_v34, %v5392_v35  ;;  %v5504_v56 = vld [vmem:[#allocation19 + $0x2a8] sm:$0xf0]  ;;  %v5363_v54 = vor.u32 %v6529_v24, %v5360_v63  ;;  %v2215_v35 = vld [vmem:[#allocation16] sm:$0x3]  ;;  %v5704_v24 = vld [vmem:[#allocation19 + $0x1f0] sm:$0xf0] }
 0x5e3   : > { %v5507_v53 = vor.u32 %v6565_v55, %v5504_v56  ;;  %v5488_v6 = vld [vmem:[#allocation19 + $0x268] sm:$0xf0]  ;;  %v2268_v39 = vperm.slane %v2215_v35, 0  ;;  %v6712_v63 = vld [vmem:[#allocation19 + $0x3d4] sm:$0xf] }
 0x5e4   : > { %v6557_v23 = vld [vmem:[#allocation19 + $0x20c] sm:$0xf] }
 0x5e5   : > { %2715 = vmatpush.bf16.msrb.mxu2 %v5355_v7  ;;  %2729 = vmatpush.bf16.msrb.mxu3 %v5483_v17  ;;  %v5406_v7 = vld [vmem:[#allocation19 + $0x108] sm:$0xf]  ;;  %v5472_v0 = vld [vmem:[#allocation19 + $0x228] sm:$0xf0] }
 0x5e6   : > { %2738 = vmatpush.bf16.msra.mxu0 %v5439_v50  ;;  %v6543_v17 = vld [vmem:[#allocation19 + $0x124] sm:$0xf0]  ;;  %2753 = vmatpush.bf16.msra.mxu1 %v5551_v8  ;;  %v5376_v50 = vld [vmem:[#allocation19 + $0xa8] sm:$0xf0]  ;;  %v5491_v8 = vor.u32 %v6561_v2, %v5488_v6  ;;  %v5686_v6 = vld [vmem:[#allocation19 + $0x190] sm:$0xf] }
 0x5e9   : > { %2716 = vmatpush.bf16.msrb.mxu2 %v5339_v21  ;;  %2730 = vmatpush.bf16.msrb.mxu3 %v5467_v33  ;;  %v5390_v21 = vld [vmem:[#allocation19 + $0xc8] sm:$0xf] }
 0x5ea   : > { %2739 = vmatpush.bf16.msra.mxu0 %v5423_v25  ;;  %v5391_v32 = vor.u32 %v6539_v30, %v5390_v21  ;;  %v6571_v33 = vld [vmem:[#allocation19 + $0x2e4] sm:$0xf0] }
 0x5eb   : > { %v5519_v36 = vor.u32 %v6571_v33, %v5518_v3 }
 0x5ed   : > { %2765 = vmatpush.bf16.msra.mxu2 %v5459_v43  ;;  %2779 = vmatpush.bf16.msra.mxu3 %v5587_v49  ;;  %v6535_v43 = vld [vmem:[#allocation19 + $0xa4] sm:$0xf0]  ;;  %v6533_v49 = vld [vmem:[#allocation19 + $0x8c] sm:$0xf] }
 0x5ee   : > { %v5375_v47 = vor.u32 %v6535_v43, %v5374_v42  ;;  %v5379_v52 = vor.u32 %v6533_v49, %v5376_v50 }
 0x5f1   : > { %2766 = vmatpush.bf16.msra.mxu2 %v5443_v60  ;;  %2780 = vmatpush.bf16.msra.mxu3 %v5571_v5  ;;  %v5486_v60 = vld [vmem:[#allocation19 + $0x248] sm:$0xf] }
 0x5f2   : > { %v5487_v25 = vor.u32 %v6563_v61, %v5486_v60  ;;  %v6680_v60 = vld [vmem:[#allocation19 + $0x1d4] sm:$0xf] }
 0x5f5   : > { %2767 = vmatpush.bf16.msra.mxu2 %v5427_v9 }
 0x5f9   : > { %2768 = vmatpush.bf16.msra.mxu2 %v5411_v26 }
 0x5fd   : > { %2769 = vmatpush.bf16.msra.mxu2 %v5395_v37 }
 0x601   : > { %2770 = vmatpush.bf16.msra.mxu2 %v5379_v52 }
 0x605   : > { %2771 = vmatpush.bf16.msra.mxu2 %v5363_v54 }
 0x642   : > { %v2222_v12 = vpop.xlane.xlu1 %2221 }
 0x643   : > { %v2224_v14 = vmul.f32 %v2222_v12, %v7789_v62  ;;  %v6577_v12 = vld [vmem:[#allocation19 + $0x34c] sm:$0xf] }
 0x644   : > { %v5555_v15 = vor.u32 %v6577_v12, %v5552_v13  ;;  %v5342_v12 = vld [vmem:[#allocation19 + $0x8] sm:$0xf] }
 0x645   : > { %v7923_v16 = vsub.f32 %v7913_v40, %v2224_v14  ;;  %v7926_v18 = vsub.f32 %v7917_v41, %v2224_v14  ;;  %v2239_v14 = vmul.f32 %v2235_v59, %v7789_v62  ;;  %v5359_v59 = vor.u32 %v6531_v58, %v5358_v57  ;;  %v6527_v13 = vld [vmem:[#allocation19 + $0x24] sm:$0xf0]  ;;  %v6682_v57 = vld [vmem:[#allocation19 + $0x1ec] sm:$0xf0] }
 0x646   : > { %2781 = vmatpush.bf16.msra.mxu3 %v5555_v15  ;;  %v5343_v15 = vor.u32 %v6527_v13, %v5342_v12  ;;  %v5830_v58 = vld [vmem:[#allocation19 + $0x3d0] sm:$0xf] }
 0x647   : > { %v2231_v19 = vmul.f32 %v7923_v16, %v7923_v16  ;;  %v2232_v20 = vmul.f32 %v7926_v18, %v7926_v18  ;;  %v7933_v29 = vadd.f32 1e-05, %v2239_v14  ;;  %v5470_v14 = vld [vmem:[#allocation19 + $0x208] sm:$0xf]  ;;  %v5814_v13 = vld [vmem:[#allocation19 + $0x390] sm:$0xf] }
 0x649   : > { %v2236_v22 = vadd.f32 %v2232_v20, %v2231_v19  ;;  %v5534_v19 = vld [vmem:[#allocation19 + $0x308] sm:$0xf]  ;;  %v5407_v20 = vor.u32 %v6543_v17, %v5406_v7  ;;  %6970 = vrsqrt.f32 %v7933_v29  ;;  %v6525_v17 = vld [vmem:[#allocation19 + $0xc] sm:$0xf]  ;;  %vm2249_vm10 = vweird.f32 %v7933_v29 }
 0x64a   : > { %2782 = vmatpush.bf16.msra.mxu3 %v5539_v31  ;;  %v6559_v7 = vld [vmem:[#allocation19 + $0x224] sm:$0xf0] }
 0x64b   : > { %2237 = vadd.xlane.f32.xlu0 %v2236_v22  ;;  %v6575_v22 = vld [vmem:[#allocation19 + $0x324] sm:$0xf0]  ;;  %2740 = vmatpush.bf16.msra.mxu0 %v5407_v20  ;;  %v5471_v20 = vor.u32 %v6559_v7, %v5470_v14  ;;  %v6710_v14 = vld [vmem:[#allocation19 + $0x3ac] sm:$0xf0]  ;;  %v5688_v7 = vld [vmem:[#allocation19 + $0x1b0] sm:$0xf0] }
 0x64c   : > { %v5535_v1 = vor.u32 %v6575_v22, %v5534_v19  ;;  %v5344_v19 = vld [vmem:[#allocation19 + $0x28] sm:$0xf0] }
 0x64d   : > { %v5347_v22 = vor.u32 %v6525_v17, %v5344_v19  ;;  %v6708_v17 = vld [vmem:[#allocation19 + $0x394] sm:$0xf] }
 0x64e   : > { %2754 = vmatpush.bf16.msra.mxu1 %v5535_v1  ;;  %2783 = vmatpush.bf16.msra.mxu3 %v5523_v4  ;;  %v5475_v1 = vor.u32 %v6557_v23, %v5472_v0  ;;  %v2269_v4 = vperm.slane %v2215_v35, 1  ;;  %v5816_v19 = vld [vmem:[#allocation19 + $0x3b0] sm:$0xf0]  ;;  %v5670_v23 = vld [vmem:[#allocation19 + $0x150] sm:$0xf] }
 0x64f   : > { %2741 = vmatpush.bf16.msra.mxu0 %v5391_v32  ;;  %v6971_v5 = vpop.eup %6970  ;;  %2772 = vmatpush.bf16.msra.mxu2 %v5347_v22  ;;  %v5815_v22 = vor.u32 %v6710_v14, %v5814_v13  ;;  %v6674_v0 = vld [vmem:[#allocation19 + $0x16c] sm:$0xf0] }
 0x650   : > { %v2244_v9 = vmul.f32 %v6971_v5, %v7933_v29  ;;  %vm2250_vm9 = vweird.f32 %v6971_v5  ;;  %v6670_v35 = vld [vmem:[#allocation19 + $0x12c] sm:$0xf0] }
 0x651   : > { %vm2251_vm11 = vmor %vm2249_vm10, %vm2250_vm9 }
 0x652   : > { %2755 = vmatpush.bf16.msra.mxu1 %v5519_v36  ;;  %2784 = vmatpush.bf16.msra.mxu3 %v5507_v53  ;;  %v2245_v26 = vmul.f32 %v6971_v5, %v2244_v9  ;;  %v5702_v53 = vld [vmem:[#allocation19 + $0x1d0] sm:$0xf]  ;;  %v5707_v9 = vor.u32 %v6680_v60, %v5704_v24 }
 0x653   : > { %2742 = vmatpush.bf16.msra.mxu0 %v5375_v47  ;;  %v2277_v47 = vperm.slane %v2216_v38, 0  ;;  %v6702_v38 = vld [vmem:[#allocation19 + $0x32c] sm:$0xf0] }
 0x654   : > { %v2246_v21 = vmul.f32 0.5, %v2245_v26  ;;  %v5819_v26 = vor.u32 %v6708_v17, %v5816_v19  ;;  %v5622_v60 = vld [vmem:[#allocation19 + $0x90] sm:$0xf]  ;;  %v6656_v17 = vld [vmem:[#allocation19 + $0x54] sm:$0xf] }
 0x655   : > { %v6694_v24 = vld [vmem:[#allocation19 + $0x2ac] sm:$0xf0]  ;;  %v5608_v19 = vld [vmem:[#allocation19 + $0x70] sm:$0xf0] }
 0x656   : > { %2756 = vmatpush.bf16.msra.mxu1 %v5503_v51  ;;  %2785 = vmatpush.bf16.msra.mxu3 %v5491_v8  ;;  %v2247_v30 = vsub.f32 1.5, %v2246_v21  ;;  %v6678_v8 = vld [vmem:[#allocation19 + $0x1ac] sm:$0xf0]  ;;  %v5672_v21 = vld [vmem:[#allocation19 + $0x170] sm:$0xf0] }
 0x657   : > { %2743 = vmatpush.bf16.msra.mxu0 %v5359_v59 }
 0x658   : > { %v2248_v32 = vmul.f32 %v6971_v5, %v2247_v30  ;;  %v6704_v30 = vld [vmem:[#allocation19 + $0x354] sm:$0xf] }
 0x65a   : > { %2757 = vmatpush.bf16.msra.mxu1 %v5487_v25  ;;  %2786 = vmatpush.bf16.msra.mxu3 %v5475_v1  ;;  %v2252_v36 = vsel %vm2251_vm11, %v6971_v5, %v2248_v32  ;;  %v5832_v25 = vld [vmem:[#allocation19 + $0x3f0] sm:$0xf0]  ;;  %v5671_v32 = vor.u32 %v6674_v0, %v5670_v23  ;;  %v5590_v23 = vld [vmem:[#allocation19 + $0x10] sm:$0xf] }
 0x65b   : > { %2744 = vmatpush.bf16.msra.mxu0 %v5343_v15  ;;  %v2263_v42 = vmul.f32 %v2252_v36, %v7896_v45  ;;  %v2264_v43 = vmul.f32 %v2252_v36, %v7899_v46  ;;  %v6714_v45 = vld [vmem:[#allocation19 + $0x3ec] sm:$0xf0]  ;;  %v5835_v12 = vor.u32 %v6712_v63, %v5832_v25  ;;  %v6676_v15 = vld [vmem:[#allocation19 + $0x194] sm:$0xf] }
 0x65c   : > { %v5691_v1 = vor.u32 %v6676_v15, %v5688_v7  ;;  %v6660_v63 = vld [vmem:[#allocation19 + $0x94] sm:$0xf]  ;;  %v5734_v15 = vld [vmem:[#allocation19 + $0x250] sm:$0xf] }
 0x65d   : > { %v2272_v49 = vmul.f32 %v2268_v39, %v2263_v42  ;;  %v2273_v50 = vmul.f32 %v2269_v4, %v2264_v43  ;;  %v6700_v42 = vld [vmem:[#allocation19 + $0x314] sm:$0xf]  ;;  %v6690_v7 = vld [vmem:[#allocation19 + $0x26c] sm:$0xf0] }
 0x65e   : > { %2758 = vmatpush.bf16.msra.mxu1 %v5471_v20  ;;  %v5687_v20 = vor.u32 %v6678_v8, %v5686_v6  ;;  %v5784_v43 = vld [vmem:[#allocation19 + $0x330] sm:$0xf0] }
 0x65f   : > { %v2281_v46 = vadd.f32 %v2277_v47, %v2272_v49  ;;  %v2282_v5 = vadd.f32 %v2278_v48, %v2273_v50  ;;  %v5787_v50 = vor.u32 %v6700_v42, %v5784_v43  ;;  %v5624_v25 = vld [vmem:[#allocation19 + $0xb0] sm:$0xf0]  ;;  %v6713_v42 = vld [vmem:[#allocation19 + $0x3dc] sm:$0xf] }
 0x660   : > { %v5627_v13 = vor.u32 %v6660_v63, %v5624_v25  ;;  %v5840_v43 = vld [vmem:[#allocation19 + $0x3f8] sm:$0xf0]  ;;  %v5806_v63 = vld [vmem:[#allocation19 + $0x358] sm:$0xf] }
 0x661   : > { %v6707_v25 = vld [vmem:[#allocation19 + $0x374] sm:$0xf0] }
 0x6be   : > { %v2238_v27 = vpop.xlane.xlu0 %2237 }
 0x6bf   : > { %v2240_v28 = vmul.f32 %v2238_v27, %v7789_v62  ;;  %v5798_v27 = vld [vmem:[#allocation19 + $0x350] sm:$0xf] }
 0x6c1   : > { %v2242_v31 = vadd.f32 1e-05, %v2240_v28  ;;  %v6706_v28 = vld [vmem:[#allocation19 + $0x36c] sm:$0xf0] }
 0x6c3   : > { %6972 = vrsqrt.f32 %v2242_v31  ;;  %vm2259_vm13 = vweird.f32 %v2242_v31 }
 0x6c9   : > { %v6973_v3 = vpop.eup %6972 }
 0x6ca   : > { %v2254_v33 = vmul.f32 %v6973_v3, %v2242_v31  ;;  %vm2260_vm12 = vweird.f32 %v6973_v3  ;;  %v6672_v31 = vld [vmem:[#allocation19 + $0x154] sm:$0xf] }
 0x6cb   : > { %vm2261_vm14 = vmor %vm2259_vm13, %vm2260_vm12  ;;  %v5675_v36 = vor.u32 %v6672_v31, %v5672_v21  ;;  %v5611_v31 = vor.u32 %v6656_v17, %v5608_v19  ;;  %v5790_v17 = vld [vmem:[#allocation19 + $0x318] sm:$0xf] }
 0x6cc   : > { %v2255_v34 = vmul.f32 %v6973_v3, %v2254_v33  ;;  %v5799_v33 = vor.u32 %v6706_v28, %v5798_v27  ;;  %v5718_v27 = vld [vmem:[#allocation19 + $0x210] sm:$0xf]  ;;  %v6703_v19 = vld [vmem:[#allocation19 + $0x334] sm:$0xf0] }
 0x6cd   : > { %v6686_v28 = vld [vmem:[#allocation19 + $0x22c] sm:$0xf0] }
 0x6ce   : > { %v2256_v37 = vmul.f32 0.5, %v2255_v34  ;;  %v5654_v34 = vld [vmem:[#allocation19 + $0x110] sm:$0xf] }
 0x6d0   : > { %v2257_v62 = vsub.f32 1.5, %v2256_v37 }
 0x6d2   : > { %v2258_v44 = vmul.f32 %v6973_v3, %v2257_v62  ;;  %v5782_v62 = vld [vmem:[#allocation19 + $0x310] sm:$0xf] }
 0x6d4   : > { %v2262_v29 = vsel %vm2261_vm14, %v6973_v3, %v2258_v44  ;;  %v5800_v3 = vld [vmem:[#allocation19 + $0x370] sm:$0xf0]  ;;  %v5655_v44 = vor.u32 %v6670_v35, %v5654_v34  ;;  %v5710_v34 = vld [vmem:[#allocation19 + $0x1d8] sm:$0xf] }
 0x6d5   : > { %v2265_v51 = vmul.f32 %v2262_v29, %v7923_v16  ;;  %v2266_v52 = vmul.f32 %v2262_v29, %v7926_v18  ;;  %v5703_v16 = vor.u32 %v6682_v57, %v5702_v53  ;;  %v5831_v18 = vor.u32 %v6714_v45, %v5830_v58  ;;  %v6666_v29 = vld [vmem:[#allocation19 + $0xec] sm:$0xf0]  ;;  %v6696_v53 = vld [vmem:[#allocation19 + $0x2d4] sm:$0xf]  ;;  %v6683_v35 = vld [vmem:[#allocation19 + $0x1f4] sm:$0xf0] }
 0x6d6   : > { %v5803_v37 = vor.u32 %v6704_v30, %v5800_v3  ;;  %v5768_v57 = vld [vmem:[#allocation19 + $0x2f0] sm:$0xf0] }
 0x6d7   : > { %v2274_v55 = vmul.f32 %v2268_v39, %v2265_v51  ;;  %v2275_v56 = vmul.f32 %v2269_v4, %v2266_v52  ;;  %v6668_v39 = vld [vmem:[#allocation19 + $0x114] sm:$0xf]  ;;  %v5766_v51 = vld [vmem:[#allocation19 + $0x2d0] sm:$0xf] }
 0x6d8   : > { %v5656_v4 = vld [vmem:[#allocation19 + $0x130] sm:$0xf0]  ;;  %v6698_v52 = vld [vmem:[#allocation19 + $0x2ec] sm:$0xf0] }
 0x6d9   : > { %v2283_v59 = vadd.f32 %v2277_v47, %v2274_v55  ;;  %v2284_v61 = vadd.f32 %v2278_v48, %v2275_v56  ;;  %v5783_v47 = vor.u32 %v6702_v38, %v5782_v62  ;;  %v5638_v48 = vld [vmem:[#allocation19 + $0xd0] sm:$0xf]  ;;  %v5659_v49 = vor.u32 %v6668_v39, %v5656_v4  ;;  %v6664_v55 = vld [vmem:[#allocation19 + $0xd4] sm:$0xf]  ;;  %v6681_v62 = vld [vmem:[#allocation19 + $0x1dc] sm:$0xf] }
 0x6da   : > { %v5640_v56 = vld [vmem:[#allocation19 + $0xf0] sm:$0xf0]  ;;  %v5639_v58 = vor.u32 %v6666_v29, %v5638_v48  ;;  %v5767_v45 = vor.u32 %v6698_v52, %v5766_v51  ;;  %v5719_v39 = vor.u32 %v6686_v28, %v5718_v27  ;;  %v5712_v4 = vld [vmem:[#allocation19 + $0x1f8] sm:$0xf0]  ;;  %v5711_v48 = vor.u32 %v6683_v35, %v5710_v34  ;;  %v5646_v27 = vld [vmem:[#allocation19 + $0xd8] sm:$0xf] }
 0x6db   : > { %v7943_v54 = vpack.c.bf16 %v2283_v59, %v2281_v46  ;;  %v7945_v2 = vpack.c.bf16 %v2284_v61, %v2282_v5  ;;  %v6662_v46 = vld [vmem:[#allocation19 + $0xac] sm:$0xf0]  ;;  %v5643_v5 = vor.u32 %v6664_v55, %v5640_v56  ;;  %v5771_v59 = vor.u32 %v6696_v53, %v5768_v57  ;;  %v6652_v30 = vld [vmem:[#allocation19 + $0x14] sm:$0xf]  ;;  %v5822_v55 = vld [vmem:[#allocation19 + $0x398] sm:$0xf] }
 0x6dc   : > { %v5750_v61 = vld [vmem:[#allocation19 + $0x290] sm:$0xf]  ;;  %v5623_v6 = vor.u32 %v6662_v46, %v5622_v60  ;;  %v5592_v3 = vld [vmem:[#allocation19 + $0x30] sm:$0xf0]  ;;  %v5715_v51 = vor.u32 %v6681_v62, %v5712_v4  ;;  %v5843_v52 = vor.u32 %v6713_v42, %v5840_v43  ;;  %v6711_v56 = vld [vmem:[#allocation19 + $0x3b4] sm:$0xf0] }
 0x6dd   : > { %2689 = vmatmul.bf16.vlgmr.msrb.gmra.mxu0 %v7943_v54  ;;  %2703 = vmatmul.bf16.vlgmr.msrb.gmra.mxu1 %v7945_v2  ;;  %v5751_v8 = vor.u32 %v6694_v24, %v5750_v61  ;;  %v6677_v53 = vld [vmem:[#allocation19 + $0x19c] sm:$0xf]  ;;  %v5823_v46 = vor.u32 %v6711_v56, %v5822_v55  ;;  %v6667_v28 = vld [vmem:[#allocation19 + $0xf4] sm:$0xf0] }
 0x6de   : > { %2717 = vmatmul.bf16.vlgmr.msrb.gmra.mxu2 %v7943_v54  ;;  %2731 = vmatmul.bf16.vlgmr.msrb.gmra.mxu3 %v7945_v2  ;;  %v5696_v57 = vld [vmem:[#allocation19 + $0x1b8] sm:$0xf0]  ;;  %v5630_v62 = vld [vmem:[#allocation19 + $0x98] sm:$0xf] }
 0x6df   : > { %3327 = vmatpush.bf16.msrb.mxu0 %v5703_v16  ;;  %3341 = vmatpush.bf16.msrb.mxu1 %v5831_v18  ;;  %v6692_v16 = vld [vmem:[#allocation19 + $0x294] sm:$0xf]  ;;  %v5699_v61 = vor.u32 %v6677_v53, %v5696_v57  ;;  %v6697_v34 = vld [vmem:[#allocation19 + $0x2dc] sm:$0xf]  ;;  %v5758_v42 = vld [vmem:[#allocation19 + $0x298] sm:$0xf] }
 0x6e0   : > { %3355 = vmatpush.bf16.msrb.mxu2 %v5707_v9  ;;  %3369 = vmatpush.bf16.msrb.mxu3 %v5835_v12  ;;  %v5752_v18 = vld [vmem:[#allocation19 + $0x2b0] sm:$0xf0]  ;;  %v5606_v9 = vld [vmem:[#allocation19 + $0x50] sm:$0xf]  ;;  %v5776_v35 = vld [vmem:[#allocation19 + $0x2f8] sm:$0xf0] }
 0x6e1   : > { %v6658_v12 = vld [vmem:[#allocation19 + $0x6c] sm:$0xf0]  ;;  %v5755_v14 = vor.u32 %v6692_v16, %v5752_v18  ;;  %v6673_v16 = vld [vmem:[#allocation19 + $0x15c] sm:$0xf]  ;;  %v5779_v4 = vor.u32 %v6697_v34, %v5776_v35  ;;  %v6695_v43 = vld [vmem:[#allocation19 + $0x2b4] sm:$0xf0] }
 0x6e2   : > { %v5607_v0 = vor.u32 %v6658_v12, %v5606_v9  ;;  %v5680_v18 = vld [vmem:[#allocation19 + $0x178] sm:$0xf0]  ;;  %v5807_v12 = vor.u32 %v6707_v25, %v5806_v63  ;;  %v5742_v53 = vld [vmem:[#allocation19 + $0x258] sm:$0xf]  ;;  %v5950_v34 = vld [vmem:[#allocation20 + $0x2d0] sm:$0xf] }
 0x6e3   : > { %3328 = vmatpush.bf16.msrb.mxu0 %v5687_v20  ;;  %3342 = vmatpush.bf16.msrb.mxu1 %v5815_v22  ;;  %v6688_v20 = vld [vmem:[#allocation19 + $0x254] sm:$0xf]  ;;  %v6691_v57 = vld [vmem:[#allocation19 + $0x274] sm:$0xf0] }
 0x6e4   : > { %3356 = vmatpush.bf16.msrb.mxu2 %v5691_v1  ;;  %3370 = vmatpush.bf16.msrb.mxu3 %v5819_v26  ;;  %v5736_v22 = vld [vmem:[#allocation19 + $0x270] sm:$0xf0]  ;;  %v5735_v1 = vor.u32 %v6690_v7, %v5734_v15  ;;  %v6654_v26 = vld [vmem:[#allocation19 + $0x2c] sm:$0xf0]  ;;  %v5683_v15 = vor.u32 %v6673_v16, %v5680_v18  ;;  %v5726_v16 = vld [vmem:[#allocation19 + $0x218] sm:$0xf] }
 0x6e5   : > { %v5739_v21 = vor.u32 %v6688_v20, %v5736_v22  ;;  %v5591_v38 = vor.u32 %v6654_v26, %v5590_v23  ;;  %v6669_v20 = vld [vmem:[#allocation19 + $0x11c] sm:$0xf]  ;;  %v5791_v26 = vor.u32 %v6703_v19, %v5790_v17  ;;  %v6687_v18 = vld [vmem:[#allocation19 + $0x234] sm:$0xf0]  ;;  %v5902_v17 = vld [vmem:[#allocation20 + $0x270] sm:$0xf] }
 0x6e6   : > { %v5664_v22 = vld [vmem:[#allocation19 + $0x138] sm:$0xf0]  ;;  %v6731_v19 = vld [vmem:[#allocation20 + $0x274] sm:$0xf0] }
 0x6e7   : > { %3329 = vmatpush.bf16.msrb.mxu0 %v5671_v32  ;;  %3343 = vmatpush.bf16.msrb.mxu1 %v5799_v33  ;;  %v6684_v32 = vld [vmem:[#allocation19 + $0x214] sm:$0xf]  ;;  %v6701_v23 = vld [vmem:[#allocation19 + $0x31c] sm:$0xf]  ;;  %v6743_v35 = vld [vmem:[#allocation20 + $0x2d4] sm:$0xf0] }
 0x6e8   : > { %3357 = vmatpush.bf16.msrb.mxu2 %v5675_v36  ;;  %3371 = vmatpush.bf16.msrb.mxu3 %v5803_v37  ;;  %v5720_v33 = vld [vmem:[#allocation19 + $0x230] sm:$0xf0]  ;;  %v5838_v36 = vld [vmem:[#allocation19 + $0x3d8] sm:$0xf] }
 0x6e9   : > { %v6715_v37 = vld [vmem:[#allocation19 + $0x3f4] sm:$0xf0] }
 0x6ea   : > { %v5839_v29 = vor.u32 %v6715_v37, %v5838_v36  ;;  %v5647_v36 = vor.u32 %v6667_v28, %v5646_v27  ;;  %v5886_v28 = vld [vmem:[#allocation20 + $0x250] sm:$0xf] }
 0x6eb   : > { %3330 = vmatpush.bf16.msrb.mxu0 %v5655_v44  ;;  %3344 = vmatpush.bf16.msrb.mxu1 %v5783_v47  ;;  %v5595_v44 = vor.u32 %v6652_v30, %v5592_v3  ;;  %v5723_v47 = vor.u32 %v6684_v32, %v5720_v33  ;;  %v5774_v30 = vld [vmem:[#allocation19 + $0x2d8] sm:$0xf]  ;;  %v6665_v32 = vld [vmem:[#allocation19 + $0xdc] sm:$0xf] }
 0x6ec   : > { %3358 = vmatpush.bf16.msrb.mxu2 %v5659_v49  ;;  %3372 = vmatpush.bf16.msrb.mxu3 %v5787_v50  ;;  %v5694_v49 = vld [vmem:[#allocation19 + $0x198] sm:$0xf]  ;;  %v5648_v33 = vld [vmem:[#allocation19 + $0xf8] sm:$0xf0] }
 0x6ed   : > { %2745 = vmatmul.bf16.vlgmr.msra.gmra.mxu0 %v7943_v54  ;;  %2759 = vmatmul.bf16.vlgmr.msra.gmra.mxu1 %v7945_v2  ;;  %v6679_v50 = vld [vmem:[#allocation19 + $0x1b4] sm:$0xf0] }
 0x6ee   : > { %2773 = vmatmul.bf16.vlgmr.msra.gmra.mxu2 %v7943_v54  ;;  %2787 = vmatmul.bf16.vlgmr.msra.gmra.mxu3 %v7945_v2  ;;  %v5695_v60 = vor.u32 %v6679_v50, %v5694_v49  ;;  %v6699_v3 = vld [vmem:[#allocation19 + $0x2f4] sm:$0xf0]  ;;  %v5759_v50 = vor.u32 %v6695_v43, %v5758_v42  ;;  %v5942_v42 = vld [vmem:[#allocation20 + $0x2c0] sm:$0xf]  ;;  %v6741_v43 = vld [vmem:[#allocation20 + $0x2c4] sm:$0xf0] }
 0x6ef   : > { %3331 = vmatpush.bf16.msrb.mxu0 %v5639_v58  ;;  %3345 = vmatpush.bf16.msrb.mxu1 %v5767_v45  ;;  %v6709_v58 = vld [vmem:[#allocation19 + $0x39c] sm:$0xf]  ;;  %v5775_v37 = vor.u32 %v6699_v3, %v5774_v30  ;;  %v5958_v30 = vld [vmem:[#allocation20 + $0x2e0] sm:$0xf]  ;;  %v6745_v3 = vld [vmem:[#allocation20 + $0x2e4] sm:$0xf0] }
 0x6f0   : > { %3359 = vmatpush.bf16.msrb.mxu2 %v5643_v5  ;;  %3373 = vmatpush.bf16.msrb.mxu3 %v5771_v59  ;;  %v5824_v45 = vld [vmem:[#allocation19 + $0x3b8] sm:$0xf0]  ;;  %v5678_v5 = vld [vmem:[#allocation19 + $0x158] sm:$0xf] }
 0x6f1   : > { %v6675_v59 = vld [vmem:[#allocation19 + $0x174] sm:$0xf0]  ;;  %v5827_v24 = vor.u32 %v6709_v58, %v5824_v45  ;;  %v6657_v58 = vld [vmem:[#allocation19 + $0x5c] sm:$0xf] }
 0x6f2   : > { %v5679_v9 = vor.u32 %v6675_v59, %v5678_v5  ;;  %v5616_v45 = vld [vmem:[#allocation19 + $0x78] sm:$0xf0]  ;;  %v5743_v59 = vor.u32 %v6691_v57, %v5742_v53  ;;  %v5854_v57 = vld [vmem:[#allocation20 + $0x210] sm:$0xf] }
 0x6f3   : > { %3332 = vmatpush.bf16.msrb.mxu0 %v5623_v6  ;;  %3346 = vmatpush.bf16.msrb.mxu1 %v5751_v8  ;;  %v6705_v6 = vld [vmem:[#allocation19 + $0x35c] sm:$0xf]  ;;  %v5619_v63 = vor.u32 %v6657_v58, %v5616_v45  ;;  %v6719_v58 = vld [vmem:[#allocation20 + $0x214] sm:$0xf0] }
 0x6f4   : > { %3360 = vmatpush.bf16.msrb.mxu2 %v5627_v13  ;;  %3374 = vmatpush.bf16.msrb.mxu3 %v5755_v14  ;;  %v5808_v8 = vld [vmem:[#allocation19 + $0x378] sm:$0xf0]  ;;  %v5662_v13 = vld [vmem:[#allocation19 + $0x118] sm:$0xf] }
 0x6f5   : > { %v6671_v14 = vld [vmem:[#allocation19 + $0x134] sm:$0xf0]  ;;  %v5811_v7 = vor.u32 %v6705_v6, %v5808_v8  ;;  %v6653_v6 = vld [vmem:[#allocation19 + $0x1c] sm:$0xf] }
 0x6f6   : > { %v5600_v8 = vld [vmem:[#allocation19 + $0x38] sm:$0xf0] }
 0x6f7   : > { %3333 = vmatpush.bf16.msrb.mxu0 %v5607_v0  ;;  %3347 = vmatpush.bf16.msrb.mxu1 %v5735_v1  ;;  %v5792_v0 = vld [vmem:[#allocation19 + $0x338] sm:$0xf0]  ;;  %v5663_v1 = vor.u32 %v6671_v14, %v5662_v13  ;;  %v5727_v14 = vor.u32 %v6687_v18, %v5726_v16  ;;  %v5846_v16 = vld [vmem:[#allocation20 + $0x200] sm:$0xf]  ;;  %v6717_v18 = vld [vmem:[#allocation20 + $0x204] sm:$0xf0] }
 0x6f8   : > { %3361 = vmatpush.bf16.msrb.mxu2 %v5611_v31  ;;  %3375 = vmatpush.bf16.msrb.mxu3 %v5739_v21  ;;  %v5667_v31 = vor.u32 %v6669_v20, %v5664_v22  ;;  %v5795_v21 = vor.u32 %v6701_v23, %v5792_v0  ;;  %v5903_v20 = vor.u32 %v6731_v19, %v5902_v17  ;;  %v5894_v22 = vld [vmem:[#allocation20 + $0x260] sm:$0xf]  ;;  %v6729_v23 = vld [vmem:[#allocation20 + $0x264] sm:$0xf0] }
 0x6f9   : > { %v5895_v0 = vor.u32 %v6729_v23, %v5894_v22  ;;  %v5918_v22 = vld [vmem:[#allocation20 + $0x290] sm:$0xf] }
 0x6fb   : > { %3334 = vmatpush.bf16.msrb.mxu0 %v5591_v38  ;;  %3348 = vmatpush.bf16.msrb.mxu1 %v5719_v39  ;;  %v6663_v38 = vld [vmem:[#allocation19 + $0xb4] sm:$0xf0]  ;;  %v5651_v39 = vor.u32 %v6665_v32, %v5648_v33  ;;  %v6725_v32 = vld [vmem:[#allocation20 + $0x244] sm:$0xf0] }
 0x6fc   : > { %3362 = vmatpush.bf16.msrb.mxu2 %v5595_v44  ;;  %3376 = vmatpush.bf16.msrb.mxu3 %v5723_v47  ;;  %v6661_v44 = vld [vmem:[#allocation19 + $0x9c] sm:$0xf]  ;;  %v5631_v49 = vor.u32 %v6663_v38, %v5630_v62  ;;  %v5870_v62 = vld [vmem:[#allocation20 + $0x230] sm:$0xf]  ;;  %v6723_v38 = vld [vmem:[#allocation20 + $0x234] sm:$0xf0] }
 0x6fd   : > { %v5632_v47 = vld [vmem:[#allocation19 + $0xb8] sm:$0xf0] }
 0x6fe   : > { %3335 = vmatmul.bf16.vlgmr.msrb.gmra.mxu0 %v7943_v54  ;;  %3349 = vmatmul.bf16.vlgmr.msrb.gmra.mxu1 %v7945_v2  ;;  %v5635_v55 = vor.u32 %v6661_v44, %v5632_v47  ;;  %v5943_v44 = vor.u32 %v6741_v43, %v5942_v42  ;;  %v5862_v47 = vld [vmem:[#allocation20 + $0x220] sm:$0xf] }
 0x6ff   : > { %3383 = vmatpush.bf16.msra.mxu0 %v5711_v48  ;;  %3397 = vmatpush.bf16.msra.mxu1 %v5839_v29  ;;  %v6693_v48 = vld [vmem:[#allocation19 + $0x29c] sm:$0xf] }
 0x700   : > { %3411 = vmatpush.bf16.msra.mxu2 %v5715_v51  ;;  %3425 = vmatpush.bf16.msra.mxu3 %v5843_v52  ;;  %v5760_v29 = vld [vmem:[#allocation19 + $0x2b8] sm:$0xf0]  ;;  %v5614_v51 = vld [vmem:[#allocation19 + $0x58] sm:$0xf] }
 0x701   : > { %3363 = vmatmul.bf16.vlgmr.msrb.gmra.mxu2 %v7943_v54  ;;  %3377 = vmatmul.bf16.vlgmr.msrb.gmra.mxu3 %v7945_v2  ;;  %v6659_v52 = vld [vmem:[#allocation19 + $0x74] sm:$0xf0]  ;;  %v5763_v56 = vor.u32 %v6693_v48, %v5760_v29  ;;  %v6721_v48 = vld [vmem:[#allocation20 + $0x224] sm:$0xf0] }
 0x702   : > { %v5615_v5 = vor.u32 %v6659_v52, %v5614_v51  ;;  %v5934_v52 = vld [vmem:[#allocation20 + $0x2b0] sm:$0xf] }
 0x703   : > { %3384 = vmatpush.bf16.msra.mxu0 %v5695_v60  ;;  %3398 = vmatpush.bf16.msra.mxu1 %v5823_v46  ;;  %v6689_v60 = vld [vmem:[#allocation19 + $0x25c] sm:$0xf] }
 0x704   : > { %3412 = vmatpush.bf16.msra.mxu2 %v5699_v61  ;;  %3426 = vmatpush.bf16.msra.mxu3 %v5827_v24  ;;  %v5744_v46 = vld [vmem:[#allocation19 + $0x278] sm:$0xf0]  ;;  %v5598_v61 = vld [vmem:[#allocation19 + $0x18] sm:$0xf] }
 0x705   : > { %v6655_v24 = vld [vmem:[#allocation19 + $0x34] sm:$0xf0]  ;;  %v5747_v25 = vor.u32 %v6689_v60, %v5744_v46  ;;  %v5855_v60 = vor.u32 %v6719_v58, %v5854_v57 }
 0x706   : > { %v5599_v13 = vor.u32 %v6655_v24, %v5598_v61  ;;  %v6759_v58 = vld [vmem:[#allocation20 + $0x354] sm:$0xf0] }
 0x707   : > { %3385 = vmatpush.bf16.msra.mxu0 %v5679_v9  ;;  %3399 = vmatpush.bf16.msra.mxu1 %v5807_v12  ;;  %v6685_v9 = vld [vmem:[#allocation19 + $0x21c] sm:$0xf] }
 0x708   : > { %3413 = vmatpush.bf16.msra.mxu2 %v5683_v15  ;;  %3427 = vmatpush.bf16.msra.mxu3 %v5811_v7  ;;  %v5728_v12 = vld [vmem:[#allocation19 + $0x238] sm:$0xf0]  ;;  %v5603_v15 = vor.u32 %v6653_v6, %v5600_v8  ;;  %v6030_v6 = vld [vmem:[#allocation20 + $0x370] sm:$0xf] }
 0x709   : > { %v5731_v7 = vor.u32 %v6685_v9, %v5728_v12 }
 0x70b   : > { %3386 = vmatpush.bf16.msra.mxu0 %v5663_v1  ;;  %3400 = vmatpush.bf16.msra.mxu1 %v5791_v26  ;;  %v5966_v1 = vld [vmem:[#allocation20 + $0x2f0] sm:$0xf]  ;;  %v6747_v26 = vld [vmem:[#allocation20 + $0x2f4] sm:$0xf0] }
 0x70c   : > { %3414 = vmatpush.bf16.msra.mxu2 %v5667_v31  ;;  %3428 = vmatpush.bf16.msra.mxu3 %v5795_v21  ;;  %v5967_v27 = vor.u32 %v6747_v26, %v5966_v1  ;;  %v6727_v31 = vld [vmem:[#allocation20 + $0x254] sm:$0xf0] }
 0x70d   : > { %v5887_v21 = vor.u32 %v6727_v31, %v5886_v28  ;;  %v6735_v1 = vld [vmem:[#allocation20 + $0x294] sm:$0xf0]  ;;  %v6022_v31 = vld [vmem:[#allocation20 + $0x360] sm:$0xf] }
 0x70e   : > { %v5919_v28 = vor.u32 %v6735_v1, %v5918_v22  ;;  %v6724_v22 = vld [vmem:[#allocation20 + $0x244] sm:$0xf] }
 0x70f   : > { %3387 = vmatpush.bf16.msra.mxu0 %v5647_v36  ;;  %3401 = vmatpush.bf16.msra.mxu1 %v5775_v37  ;;  %v7966_v36 = vld [vmem:[%s8235_s29] sm:$0xf]  ;;  %v5951_v37 = vor.u32 %v6743_v35, %v5950_v34 }
 0x710   : > { %3415 = vmatpush.bf16.msra.mxu2 %v5651_v39  ;;  %3429 = vmatpush.bf16.msra.mxu3 %v5779_v4  ;;  %v5871_v39 = vor.u32 %v6723_v38, %v5870_v62  ;;  %v2353_v4 = vperm.slane %v7966_v36, 0  ;;  %v2354_v45 = vperm.slane %v7966_v36, 1  ;;  %v2355_v34 = vperm.slane %v7966_v36, 2  ;;  %v6733_v38 = vld [vmem:[#allocation20 + $0x284] sm:$0xf0] }
 0x713   : > { %3388 = vmatpush.bf16.msra.mxu0 %v5631_v49  ;;  %3402 = vmatpush.bf16.msra.mxu1 %v5759_v50  ;;  %v5863_v50 = vor.u32 %v6721_v48, %v5862_v47 }
 0x714   : > { %3416 = vmatpush.bf16.msra.mxu2 %v5635_v55  ;;  %3430 = vmatpush.bf16.msra.mxu3 %v5763_v56  ;;  %v6739_v55 = vld [vmem:[#allocation20 + $0x2b4] sm:$0xf0] }
 0x715   : > { %v5935_v56 = vor.u32 %v6739_v55, %v5934_v52 }
 0x717   : > { %3389 = vmatpush.bf16.msra.mxu0 %v5615_v5  ;;  %3403 = vmatpush.bf16.msra.mxu1 %v5743_v59  ;;  %v5926_v5 = vld [vmem:[#allocation20 + $0x2a0] sm:$0xf]  ;;  %v6737_v59 = vld [vmem:[#allocation20 + $0x2a4] sm:$0xf0] }
 0x718   : > { %3417 = vmatpush.bf16.msra.mxu2 %v5619_v63  ;;  %3431 = vmatpush.bf16.msra.mxu3 %v5747_v25  ;;  %v5927_v61 = vor.u32 %v6737_v59, %v5926_v5 }
 0x71b   : > { %3390 = vmatpush.bf16.msra.mxu0 %v5599_v13  ;;  %3404 = vmatpush.bf16.msra.mxu1 %v5727_v14  ;;  %v5847_v13 = vor.u32 %v6717_v18, %v5846_v16  ;;  %v6763_v14 = vld [vmem:[#allocation20 + $0x374] sm:$0xf0]  ;;  %v6777_v16 = vld [vmem:[#allocation20 + $0x3e4] sm:$0xf0]  ;;  %v6744_v18 = vld [vmem:[#allocation20 + $0x2e4] sm:$0xf] }
 0x71c   : > { %3418 = vmatpush.bf16.msra.mxu2 %v5603_v15  ;;  %3432 = vmatpush.bf16.msra.mxu3 %v5731_v7  ;;  %v6730_v15 = vld [vmem:[#allocation20 + $0x274] sm:$0xf]  ;;  %v5904_v7 = vld [vmem:[#allocation20 + $0x278] sm:$0xf0] }
 0x71e   : > { %3391 = vmatmul.bf16.vlgmr.msra.gmra.mxu0 %v7943_v54  ;;  %3405 = vmatmul.bf16.vlgmr.msra.gmra.mxu1 %v7945_v2 }
 0x71f   : > { %3419 = vmatmul.bf16.vlgmr.msra.gmra.mxu2 %v7943_v54  ;;  %3433 = vmatmul.bf16.vlgmr.msra.gmra.mxu3 %v7945_v2  ;;  %v5959_v54 = vor.u32 %v6745_v3, %v5958_v30  ;;  %v5878_v2 = vld [vmem:[#allocation20 + $0x240] sm:$0xf] }
 0x720   : > { %3899 = vmatpush.bf16.msrb.mxu0 %v5903_v20  ;;  %3913 = vmatpush.bf16.msrb.mxu1 %v5967_v27  ;;  %v5879_v33 = vor.u32 %v6725_v32, %v5878_v2  ;;  %v6031_v20 = vor.u32 %v6763_v14, %v6030_v6  ;;  %v5896_v2 = vld [vmem:[#allocation20 + $0x268] sm:$0xf0]  ;;  %v6006_v14 = vld [vmem:[#allocation20 + $0x340] sm:$0xf] }
 0x721   : > { %v5960_v6 = vld [vmem:[#allocation20 + $0x2e8] sm:$0xf0] }
 0x722   : > { %3927 = vmatpush.bf16.msrb.mxu2 %v6031_v20 }
 0x724   : > { %3900 = vmatpush.bf16.msrb.mxu0 %v5895_v0  ;;  %3914 = vmatpush.bf16.msrb.mxu1 %v5959_v54  ;;  %v5907_v0 = vor.u32 %v6730_v15, %v5904_v7  ;;  %v6728_v54 = vld [vmem:[#allocation20 + $0x264] sm:$0xf]  ;;  %v6757_v15 = vld [vmem:[#allocation20 + $0x344] sm:$0xf0] }
 0x725   : > { %v5899_v35 = vor.u32 %v6728_v54, %v5896_v2  ;;  %v6007_v20 = vor.u32 %v6757_v15, %v6006_v14  ;;  %v6775_v54 = vld [vmem:[#allocation20 + $0x3d4] sm:$0xf0] }
 0x728   : > { %3901 = vmatpush.bf16.msrb.mxu0 %v5887_v21  ;;  %3915 = vmatpush.bf16.msrb.mxu1 %v5951_v37  ;;  %v6761_v21 = vld [vmem:[#allocation20 + $0x364] sm:$0xf0]  ;;  %v5910_v37 = vld [vmem:[#allocation20 + $0x280] sm:$0xf] }
 0x729   : > { %v6023_v3 = vor.u32 %v6761_v21, %v6022_v31  ;;  %v5911_v47 = vor.u32 %v6733_v38, %v5910_v37  ;;  %v5952_v38 = vld [vmem:[#allocation20 + $0x2d8] sm:$0xf0] }
 0x72b   : > { %3928 = vmatpush.bf16.msrb.mxu2 %v6023_v3  ;;  %v6078_v3 = vld [vmem:[#allocation20 + $0x3d0] sm:$0xf] }
 0x72c   : > { %3902 = vmatpush.bf16.msrb.mxu0 %v5879_v33  ;;  %3916 = vmatpush.bf16.msrb.mxu1 %v5943_v44  ;;  %v6079_v37 = vor.u32 %v6775_v54, %v6078_v3 }
 0x730   : > { %3903 = vmatpush.bf16.msrb.mxu0 %v5871_v39  ;;  %3917 = vmatpush.bf16.msrb.mxu1 %v5935_v56  ;;  %v6094_v39 = vld [vmem:[#allocation20 + $0x3f0] sm:$0xf] }
 0x734   : > { %3904 = vmatpush.bf16.msrb.mxu0 %v5863_v50  ;;  %3918 = vmatpush.bf16.msrb.mxu1 %v5927_v61  ;;  %v6014_v50 = vld [vmem:[#allocation20 + $0x350] sm:$0xf]  ;;  %v5888_v61 = vld [vmem:[#allocation20 + $0x258] sm:$0xf0] }
 0x735   : > { %v6015_v59 = vor.u32 %v6759_v58, %v6014_v50 }
 0x737   : > { %3929 = vmatpush.bf16.msrb.mxu2 %v6015_v59 }
 0x738   : > { %3905 = vmatpush.bf16.msrb.mxu0 %v5855_v60  ;;  %3919 = vmatpush.bf16.msrb.mxu1 %v5919_v28  ;;  %v6726_v60 = vld [vmem:[#allocation20 + $0x254] sm:$0xf]  ;;  %v5880_v28 = vld [vmem:[#allocation20 + $0x248] sm:$0xf0] }
 0x73b   : > { %3930 = vmatpush.bf16.msrb.mxu2 %v6007_v20 }
 0x73c   : > { %3906 = vmatpush.bf16.msrb.mxu0 %v5847_v13  ;;  %3920 = vmatpush.bf16.msrb.mxu1 %v5911_v47  ;;  %v5963_v13 = vor.u32 %v6744_v18, %v5960_v6 }
 0x740   : > { %3955 = vmatpush.bf16.msra.mxu0 %v5907_v0 }
 0x744   : > { %3956 = vmatpush.bf16.msra.mxu0 %v5899_v35  ;;  %v8007_v35 = vld [vmem:[%s8235_s29 + $0x4] sm:$0xf] }
 0x75a   : > { %v2690_v29 = vpop.f32.mrf.mxu0  ;;  %v2704_v49 = vpop.f32.mrf.mxu1 }
 0x75b   : > { %v2691_v51 = vadd.f32 %v2690_v29, %v2353_v4  ;;  %v6746_v29 = vld [vmem:[#allocation20 + $0x2f4] sm:$0xf] }
 0x75d   : > { %v7969_v53 = vadd.f32 %v2704_v49, %v2691_v51  ;;  %v5968_v49 = vld [vmem:[#allocation20 + $0x2f8] sm:$0xf0] }
 0x75e   : > { %v5971_v57 = vor.u32 %v6746_v29, %v5968_v49  ;;  %v6722_v29 = vld [vmem:[#allocation20 + $0x234] sm:$0xf] }
 0x75f   : > { %v2801_v46 = vmul.f32 %v7969_v53, %v7969_v53  ;;  %v2793_v15 = vmul.f32 0.5, %v7969_v53 }
 0x760   : > { %3969 = vmatpush.bf16.msra.mxu1 %v5971_v57 }
 0x761   : > { %v2809_v24 = vmul.f32 %v2801_v46, %v7969_v53  ;;  %v2718_v63 = vpop.f32.mrf.mxu2  ;;  %v2732_v25 = vpop.f32.mrf.mxu3 }
 0x762   : > { %v2719_v8 = vadd.f32 %v2718_v63, %v2354_v45  ;;  %v2692_v9 = vpop.f32.mrf.mxu0  ;;  %v2706_v12 = vpop.f32.mrf.mxu1 }
 0x763   : > { %v2817_v17 = vmul.f32 0.044715, %v2809_v24  ;;  %v2693_v19 = vadd.f32 %v2692_v9, %v2353_v4  ;;  %v6779_v4 = vld [vmem:[#allocation20 + $0x3f4] sm:$0xf0]  ;;  %v6086_v24 = vld [vmem:[#allocation20 + $0x3e0] sm:$0xf] }
 0x764   : > { %v7975_v23 = vadd.f32 %v2732_v25, %v2719_v8  ;;  %v6095_v48 = vor.u32 %v6779_v4, %v6094_v39  ;;  %3970 = vmatpush.bf16.msra.mxu1 %v5963_v13  ;;  %v5998_v39 = vld [vmem:[#allocation20 + $0x330] sm:$0xf]  ;;  %v6720_v13 = vld [vmem:[#allocation20 + $0x224] sm:$0xf] }
 0x765   : > { %v2825_v26 = vadd.f32 %v2817_v17, %v7969_v53  ;;  %v7978_v27 = vadd.f32 %v2706_v12, %v2693_v19  ;;  %v6087_v12 = vor.u32 %v6777_v16, %v6086_v24  ;;  %v2356_v19 = vperm.slane %v7966_v36, 3  ;;  %v6769_v36 = vld [vmem:[#allocation20 + $0x3a4] sm:$0xf0] }
 0x766   : > { %v2802_v30 = vmul.f32 %v7975_v23, %v7975_v23  ;;  %3941 = vmatpush.bf16.msrb.mxu3 %v6095_v48  ;;  %v6755_v48 = vld [vmem:[#allocation20 + $0x334] sm:$0xf0] }
 0x767   : > { %v2833_v32 = vmul.f32 0.7978845, %v2825_v26  ;;  %v2805_v33 = vmul.f32 %v7978_v27, %v7978_v27 }
 0x768   : > { %v2810_v62 = vmul.f32 %v2802_v30, %v7975_v23  ;;  %v5883_v30 = vor.u32 %v6724_v22, %v5880_v28  ;;  %v5864_v22 = vld [vmem:[#allocation20 + $0x228] sm:$0xf0]  ;;  %v6062_v28 = vld [vmem:[#allocation20 + $0x3b0] sm:$0xf] }
 0x769   : > { %6974 = vtanh.f32 %v2833_v32  ;;  %v2813_v42 = vmul.f32 %v2805_v33, %v7978_v27  ;;  %v2720_v43 = vpop.f32.mrf.mxu2  ;;  %v2734_v44 = vpop.f32.mrf.mxu3 }
 0x76a   : > { %v2818_v51 = vmul.f32 0.044715, %v2810_v62  ;;  %v2721_v52 = vadd.f32 %v2720_v43, %v2354_v45  ;;  %v2746_v55 = vpop.f32.mrf.mxu0  ;;  %v2760_v56 = vpop.f32.mrf.mxu1  ;;  %v5891_v45 = vor.u32 %v6726_v60, %v5888_v61  ;;  %3942 = vmatpush.bf16.msrb.mxu3 %v6087_v12  ;;  %v6742_v62 = vld [vmem:[#allocation20 + $0x2d4] sm:$0xf]  ;;  %v6773_v60 = vld [vmem:[#allocation20 + $0x3c4] sm:$0xf0] }
 0x76b   : > { %v2821_v46 = vmul.f32 0.044715, %v2813_v42  ;;  %v2747_v5 = vadd.f32 %v2746_v55, %v2355_v34  ;;  %v5955_v47 = vor.u32 %v6742_v62, %v5952_v38  ;;  %v6070_v55 = vld [vmem:[#allocation20 + $0x3c0] sm:$0xf] }
 0x76c   : > { %v2826_v63 = vadd.f32 %v2818_v51, %v7975_v23  ;;  %v7990_v25 = vadd.f32 %v2734_v44, %v2721_v52  ;;  %3957 = vmatpush.bf16.msra.mxu0 %v5891_v45  ;;  %v5999_v51 = vor.u32 %v6755_v48, %v5998_v39  ;;  %v5872_v52 = vld [vmem:[#allocation20 + $0x238] sm:$0xf0]  ;;  %v6071_v24 = vor.u32 %v6773_v60, %v6070_v55  ;;  %v6753_v45 = vld [vmem:[#allocation20 + $0x324] sm:$0xf0]  ;;  %v5982_v39 = vld [vmem:[#allocation20 + $0x310] sm:$0xf] }
 0x76d   : > { %v2829_v8 = vadd.f32 %v2821_v46, %v7978_v27  ;;  %v7993_v9 = vadd.f32 %v2760_v56, %v2747_v5  ;;  %3971 = vmatpush.bf16.msra.mxu1 %v5955_v47  ;;  %v5875_v58 = vor.u32 %v6722_v29, %v5872_v52  ;;  %v6740_v46 = vld [vmem:[#allocation20 + $0x2c4] sm:$0xf]  ;;  %v5944_v5 = vld [vmem:[#allocation20 + $0x2c8] sm:$0xf0]  ;;  %v5856_v47 = vld [vmem:[#allocation20 + $0x218] sm:$0xf0] }
 0x76e   : > { %v2834_v7 = vmul.f32 0.7978845, %v2826_v63  ;;  %v2806_v17 = vmul.f32 %v7990_v25, %v7990_v25  ;;  %3943 = vmatpush.bf16.msrb.mxu3 %v6079_v37  ;;  %3931 = vmatpush.bf16.msrb.mxu2 %v5999_v51  ;;  %v5990_v63 = vld [vmem:[#allocation20 + $0x320] sm:$0xf] }
 0x76f   : > { %v6975_v0 = vpop.eup %6974  ;;  %v2837_v1 = vmul.f32 0.7978845, %v2829_v8  ;;  %v2803_v26 = vmul.f32 %v7993_v9, %v7993_v9  ;;  %v2999_v8 = vperm.slane %v8007_v35, 0  ;;  %v5991_v12 = vor.u32 %v6753_v45, %v5990_v63  ;;  %v6054_v52 = vld [vmem:[#allocation20 + $0x3a0] sm:$0xf] }
 0x770   : > { %v8000_v31 = vadd.f32 1.0, %v6975_v0  ;;  %6976 = vtanh.f32 %v2834_v7  ;;  %v2814_v21 = vmul.f32 %v2806_v17, %v7990_v25  ;;  %3958 = vmatpush.bf16.msra.mxu0 %v5883_v30  ;;  %v2797_v7 = vmul.f32 0.5, %v7978_v27 }
 0x771   : > { %6978 = vtanh.f32 %v2837_v1  ;;  %v2811_v2 = vmul.f32 %v2803_v26, %v7993_v9  ;;  %v2774_v32 = vpop.f32.mrf.mxu2  ;;  %v2788_v33 = vpop.f32.mrf.mxu3  ;;  %v5867_v26 = vor.u32 %v6720_v13, %v5864_v22  ;;  %v6055_v60 = vor.u32 %v6769_v36, %v6054_v52  ;;  %v6762_v22 = vld [vmem:[#allocation20 + $0x374] sm:$0xf] }
 0x772   : > { %v2822_v4 = vmul.f32 0.044715, %v2814_v21  ;;  %v2775_v42 = vadd.f32 %v2774_v32, %v2356_v19  ;;  %v2748_v43 = vpop.f32.mrf.mxu0  ;;  %v2762_v44 = vpop.f32.mrf.mxu1  ;;  %3944 = vmatpush.bf16.msrb.mxu3 %v6071_v24  ;;  %v6771_v21 = vld [vmem:[#allocation20 + $0x3b4] sm:$0xf0]  ;;  %v2857_v30 = vmul.f32 %v8000_v31, %v2793_v15  ;;  %3932 = vmatpush.bf16.msrb.mxu2 %v5991_v12  ;;  %v5936_v32 = vld [vmem:[#allocation20 + $0x2b8] sm:$0xf0] }
 0x773   : > { %v2819_v49 = vmul.f32 0.044715, %v2811_v2  ;;  %v2749_v50 = vadd.f32 %v2748_v43, %v2355_v34  ;;  %v5947_v34 = vor.u32 %v6740_v46, %v5944_v5  ;;  %v6738_v2 = vld [vmem:[#allocation20 + $0x2b4] sm:$0xf]  ;;  %v6063_v38 = vor.u32 %v6771_v21, %v6062_v28  ;;  %v5928_v46 = vld [vmem:[#allocation20 + $0x2a8] sm:$0xf0] }
 0x774   : > { %v2830_v56 = vadd.f32 %v2822_v4, %v7990_v25  ;;  %v8014_v57 = vadd.f32 %v2788_v33, %v2775_v42  ;;  %3959 = vmatpush.bf16.msra.mxu0 %v5875_v58  ;;  %v6751_v4 = vld [vmem:[#allocation20 + $0x314] sm:$0xf0]  ;;  %v5939_v31 = vor.u32 %v6738_v2, %v5936_v32  ;;  %v5974_v5 = vld [vmem:[#allocation20 + $0x300] sm:$0xf]  ;;  %v3000_v45 = vperm.slane %v8007_v35, 1 }
 0x775   : > { %v2827_v59 = vadd.f32 %v2819_v49, %v7993_v9  ;;  %v8017_v61 = vadd.f32 %v2762_v44, %v2749_v50  ;;  %3972 = vmatpush.bf16.msra.mxu1 %v5947_v34  ;;  %v5983_v43 = vor.u32 %v6751_v4, %v5982_v39  ;;  %v6718_v44 = vld [vmem:[#allocation20 + $0x214] sm:$0xf]  ;;  %v2794_v34 = vmul.f32 0.5, %v7975_v23  ;;  %v6767_v21 = vld [vmem:[#allocation20 + $0x394] sm:$0xf0] }
 0x776   : > { %v6977_v16 = vpop.eup %6976  ;;  %v2838_v18 = vmul.f32 0.7978845, %v2830_v56  ;;  %v2804_v6 = vmul.f32 %v8014_v57, %v8014_v57  ;;  %3945 = vmatpush.bf16.msrb.mxu3 %v6063_v38  ;;  %v5859_v51 = vor.u32 %v6718_v44, %v5856_v47  ;;  %v2798_v12 = vmul.f32 0.5, %v7990_v25  ;;  %v6046_v25 = vld [vmem:[#allocation20 + $0x390] sm:$0xf] }
 0x777   : > { %v6979_v14 = vpop.eup %6978  ;;  %v2835_v17 = vmul.f32 0.7978845, %v2827_v59  ;;  %v2807_v20 = vmul.f32 %v8017_v61, %v8017_v61  ;;  %v2850_v3 = vadd.f32 1.0, %v6977_v16  ;;  %3933 = vmatpush.bf16.msrb.mxu2 %v5983_v43  ;;  %v6749_v59 = vld [vmem:[#allocation20 + $0x304] sm:$0xf0] }
 0x778   : > { %v2853_v0 = vadd.f32 1.0, %v6979_v14  ;;  %6980 = vtanh.f32 %v2838_v18  ;;  %v2812_v1 = vmul.f32 %v2804_v6, %v8014_v57  ;;  %3960 = vmatpush.bf16.msra.mxu0 %v5867_v26  ;;  %v6716_v18 = vld [vmem:[#allocation20 + $0x204] sm:$0xf]  ;;  %v5975_v23 = vor.u32 %v6749_v59, %v5974_v5  ;;  %v6024_v44 = vld [vmem:[#allocation20 + $0x368] sm:$0xf0] }
 0x779   : > { %6982 = vtanh.f32 %v2835_v17  ;;  %v2815_v53 = vmul.f32 %v2807_v20, %v8017_v61  ;;  %v2776_v27 = vpop.f32.mrf.mxu2  ;;  %v2790_v54 = vpop.f32.mrf.mxu3  ;;  %3973 = vmatpush.bf16.msra.mxu1 %v5939_v31  ;;  %v6760_v38 = vld [vmem:[#allocation20 + $0x364] sm:$0xf]  ;;  %v6038_v47 = vld [vmem:[#allocation20 + $0x380] sm:$0xf]  ;;  %v2795_v5 = vmul.f32 0.5, %v7993_v9 }
 0x77a   : > { %v2861_v33 = vmul.f32 %v2853_v0, %v2797_v7  ;;  %v2820_v37 = vmul.f32 0.044715, %v2812_v1  ;;  %v2777_v62 = vadd.f32 %v2776_v27, %v2356_v19  ;;  %v6736_v19 = vld [vmem:[#allocation20 + $0x2a4] sm:$0xf]  ;;  %v5848_v7 = vld [vmem:[#allocation20 + $0x208] sm:$0xf0]  ;;  %3946 = vmatpush.bf16.msrb.mxu3 %v6055_v60  ;;  %v2858_v1 = vmul.f32 %v2850_v3, %v2794_v34 }
 0x77b   : > { %v2823_v42 = vmul.f32 0.044715, %v2815_v53  ;;  %v3336_v49 = vpop.f32.mrf.mxu0  ;;  %v3350_v50 = vpop.f32.mrf.mxu1  ;;  %v5931_v16 = vor.u32 %v6736_v19, %v5928_v46  ;;  %v6032_v0 = vld [vmem:[#allocation20 + $0x378] sm:$0xf0]  ;;  %3934 = vmatpush.bf16.msrb.mxu2 %v5975_v23  ;;  %v5851_v27 = vor.u32 %v6716_v18, %v5848_v7  ;;  %v5912_v60 = vld [vmem:[#allocation20 + $0x288] sm:$0xf0] }
 0x77c   : > { %v2828_v48 = vadd.f32 %v2820_v37, %v8014_v57  ;;  %v8032_v29 = vadd.f32 %v2790_v54, %v2777_v62  ;;  %v8034_v55 = vpack.c.bf16 %v2861_v33, %v2857_v30  ;;  %v3337_v58 = vadd.f32 %v3336_v49, %v2999_v8  ;;  %3961 = vmatpush.bf16.msra.mxu0 %v5859_v51  ;;  %v6734_v62 = vld [vmem:[#allocation20 + $0x294] sm:$0xf]  ;;  %v5920_v3 = vld [vmem:[#allocation20 + $0x298] sm:$0xf0] }
 0x77d   : > { %v2831_v56 = vadd.f32 %v2823_v42, %v8017_v61  ;;  %3974 = vmatpush.bf16.msra.mxu1 %v5931_v16  ;;  %v6035_v54 = vor.u32 %v6762_v22, %v6032_v0  ;;  %v6047_v37 = vor.u32 %v6767_v21, %v6046_v25  ;;  %v5923_v43 = vor.u32 %v6734_v62, %v5920_v3  ;;  %v6758_v9 = vld [vmem:[#allocation20 + $0x354] sm:$0xf]  ;;  %v6016_v23 = vld [vmem:[#allocation20 + $0x358] sm:$0xf0] }
 0x77e   : > { %v6981_v24 = vpop.eup %6980  ;;  %v2808_v63 = vmul.f32 %v8032_v29, %v8032_v29  ;;  %v8044_v15 = vadd.f32 %v3350_v50, %v3337_v58  ;;  %v2836_v17 = vmul.f32 0.7978845, %v2828_v48  ;;  %v6765_v48 = vld [vmem:[#allocation20 + $0x384] sm:$0xf0]  ;;  %v6027_v51 = vor.u32 %v6760_v38, %v6024_v44  ;;  %v6732_v58 = vld [vmem:[#allocation20 + $0x284] sm:$0xf] }
 0x77f   : > { %v6983_v6 = vpop.eup %6982  ;;  %v2854_v13 = vadd.f32 1.0, %v6981_v24  ;;  %v2839_v14 = vmul.f32 0.7978845, %v2831_v56  ;;  %3983 = vmatpush.bf16.msra.mxu2 %v6035_v54  ;;  %3947 = vmatpush.bf16.msrb.mxu3 %v6047_v37  ;;  %v6039_v52 = vor.u32 %v6765_v48, %v6038_v47  ;;  %v5915_v34 = vor.u32 %v6732_v58, %v5912_v60  ;;  %v6072_v60 = vld [vmem:[#allocation20 + $0x3c8] sm:$0xf0] }
 0x780   : > { %v2816_v20 = vmul.f32 %v2808_v63, %v8032_v29  ;;  %v3447_v28 = vmul.f32 %v8044_v15, %v8044_v15  ;;  %v2851_v30 = vadd.f32 1.0, %v6983_v6  ;;  %3962 = vmatpush.bf16.msra.mxu0 %v5851_v27  ;;  %v6778_v63 = vld [vmem:[#allocation20 + $0x3f4] sm:$0xf]  ;;  %v2799_v16 = vmul.f32 0.5, %v8017_v61 }
 0x781   : > { %v2862_v26 = vmul.f32 %v2854_v13, %v2798_v12  ;;  %6984 = vtanh.f32 %v2839_v14  ;;  %3975 = vmatpush.bf16.msra.mxu1 %v5923_v43  ;;  %v2796_v62 = vmul.f32 0.5, %v8014_v57 }
 0x782   : > { %v2824_v53 = vmul.f32 0.044715, %v2816_v20  ;;  %v3455_v2 = vmul.f32 %v3447_v28, %v8044_v15  ;;  %6986 = vtanh.f32 %v2836_v17  ;;  %v2859_v14 = vmul.f32 %v2851_v30, %v2795_v5  ;;  %v6088_v28 = vld [vmem:[#allocation20 + $0x3e8] sm:$0xf0]  ;;  %v6756_v30 = vld [vmem:[#allocation20 + $0x344] sm:$0xf] }
 0x783   : > { %v8050_v39 = vpack.c.bf16 %v2862_v26, %v2858_v1  ;;  %v3338_v31 = vpop.f32.mrf.mxu0  ;;  %v3352_v56 = vpop.f32.mrf.mxu1  ;;  %3984 = vmatpush.bf16.msra.mxu2 %v6027_v51  ;;  %3948 = vmatpush.bf16.msrb.mxu3 %v6039_v52  ;;  %v6019_v1 = vor.u32 %v6758_v9, %v6016_v23  ;;  %v6776_v26 = vld [vmem:[#allocation20 + $0x3e4] sm:$0xf]  ;;  %v6000_v52 = vld [vmem:[#allocation20 + $0x338] sm:$0xf0] }
 0x784   : > { %v3364_v32 = vpop.f32.mrf.mxu2  ;;  %v3378_v33 = vpop.f32.mrf.mxu3  ;;  %v2832_v4 = vadd.f32 %v2824_v53, %v8032_v29  ;;  %v3463_v49 = vmul.f32 0.044715, %v3455_v2  ;;  %v3339_v50 = vadd.f32 %v3338_v31, %v2999_v8  ;;  %v6096_v8 = vld [vmem:[#allocation20 + $0x3f8] sm:$0xf0]  ;;  %v6091_v53 = vor.u32 %v6776_v26, %v6088_v28  ;;  %v6768_v28 = vld [vmem:[#allocation20 + $0x3a4] sm:$0xf] }
 0x785   : > { %v3365_v42 = vadd.f32 %v3364_v32, %v3000_v45  ;;  %3976 = vmatpush.bf16.msra.mxu1 %v5915_v34  ;;  %v6099_v20 = vor.u32 %v6778_v63, %v6096_v8  ;;  %v2800_v31 = vmul.f32 0.5, %v8032_v29  ;;  %v6772_v29 = vld [vmem:[#allocation20 + $0x3c4] sm:$0xf]  ;;  %v5992_v63 = vld [vmem:[#allocation20 + $0x328] sm:$0xf0] }
 0x786   : > { %v2840_v36 = vmul.f32 0.7978845, %v2832_v4  ;;  %v3471_v59 = vadd.f32 %v3463_v49, %v8044_v15  ;;  %v8061_v24 = vadd.f32 %v3352_v56, %v3339_v50  ;;  %v6754_v49 = vld [vmem:[#allocation20 + $0x334] sm:$0xf]  ;;  %v6752_v34 = vld [vmem:[#allocation20 + $0x324] sm:$0xf] }
 0x787   : > { %v8057_v19 = vadd.f32 %v3378_v33, %v3365_v42  ;;  %v6985_v46 = vpop.eup %6984  ;;  %3997 = vmatpush.bf16.msra.mxu3 %v6099_v20  ;;  %3985 = vmatpush.bf16.msra.mxu2 %v6019_v1  ;;  %v6008_v33 = vld [vmem:[#allocation20 + $0x348] sm:$0xf0]  ;;  %v6774_v42 = vld [vmem:[#allocation20 + $0x3d4] sm:$0xf]  ;;  %v6003_v58 = vor.u32 %v6754_v49, %v6000_v52  ;;  %v6064_v9 = vld [vmem:[#allocation20 + $0x3b8] sm:$0xf0] }
 0x788   : > { %v2855_v18 = vadd.f32 1.0, %v6985_v46  ;;  %6988 = vtanh.f32 %v2840_v36  ;;  %v3451_v12 = vmul.f32 %v8061_v24, %v8061_v24  ;;  %v6987_v13 = vpop.eup %6986  ;;  %v3479_v61 = vmul.f32 0.7978845, %v3471_v59  ;;  %v6158_v1 = vld [vmem:[#allocation20 + $0x70] sm:$0xf] }
 0x789   : > { %v3448_v6 = vmul.f32 %v8057_v19, %v8057_v19  ;;  %v2852_v54 = vadd.f32 1.0, %v6987_v13  ;;  %v6011_v4 = vor.u32 %v6756_v30, %v6008_v33  ;;  %v6075_v59 = vor.u32 %v6772_v29, %v6072_v60  ;;  %v6750_v13 = vld [vmem:[#allocation20 + $0x314] sm:$0xf] }
 0x78a   : > { %v2863_v7 = vmul.f32 %v2855_v18, %v2799_v16  ;;  %v3459_v22 = vmul.f32 %v3451_v12, %v8061_v24  ;;  %6990 = vtanh.f32 %v3479_v61  ;;  %v5995_v16 = vor.u32 %v6752_v34, %v5992_v63  ;;  %v6770_v18 = vld [vmem:[#allocation20 + $0x3b4] sm:$0xf]  ;;  %v6764_v63 = vld [vmem:[#allocation20 + $0x384] sm:$0xf] }
 0x78b   : > { %v3456_v17 = vmul.f32 %v3448_v6, %v8057_v19  ;;  %3998 = vmatpush.bf16.msra.mxu3 %v6091_v53  ;;  %v2860_v57 = vmul.f32 %v2852_v54, %v2796_v62  ;;  %3986 = vmatpush.bf16.msra.mxu2 %v6011_v4  ;;  %v3001_v12 = vperm.slane %v8007_v35, 2  ;;  %v6067_v23 = vor.u32 %v6770_v18, %v6064_v9  ;;  %v6603_v54 = vld [vmem:[#allocation20 + $0x74] sm:$0xf0]  ;;  %v6142_v18 = vld [vmem:[#allocation20 + $0x50] sm:$0xf] }
 0x78c   : > { %v3366_v0 = vpop.f32.mrf.mxu2  ;;  %v8072_v27 = vpack.c.bf16 %v2863_v7, %v2859_v14  ;;  %v3467_v2 = vmul.f32 0.044715, %v3459_v22  ;;  %v3380_v32 = vpop.f32.mrf.mxu3  ;;  %v5984_v14 = vld [vmem:[#allocation20 + $0x318] sm:$0xf0]  ;;  %v3439_v7 = vmul.f32 0.5, %v8044_v15  ;;  %v3002_v4 = vperm.slane %v8007_v35, 3 }
 0x78d   : > { %v3464_v25 = vmul.f32 0.044715, %v3456_v17  ;;  %v3367_v21 = vadd.f32 %v3366_v0, %v3000_v45  ;;  %v6080_v45 = vld [vmem:[#allocation20 + $0x3d8] sm:$0xf0]  ;;  %v5987_v26 = vor.u32 %v6750_v13, %v5984_v14  ;;  %v5976_v15 = vld [vmem:[#allocation20 + $0x308] sm:$0xf0] }
 0x78e   : > { %v6989_v37 = vpop.eup %6988  ;;  %v3475_v44 = vadd.f32 %v3467_v2, %v8061_v24  ;;  %v6083_v48 = vor.u32 %v6774_v42, %v6080_v45  ;;  %v6748_v2 = vld [vmem:[#allocation20 + $0x304] sm:$0xf]  ;;  %v6159_v42 = vor.u32 %v6603_v54, %v6158_v1  ;;  %v6617_v1 = vld [vmem:[#allocation20 + $0xe4] sm:$0xf0] }
 0x78f   : > { %v3472_v3 = vadd.f32 %v3464_v25, %v8057_v19  ;;  %v8076_v38 = vadd.f32 %v3380_v32, %v3367_v21  ;;  %v2856_v43 = vadd.f32 1.0, %v6989_v37  ;;  %3987 = vmatpush.bf16.msra.mxu2 %v6003_v58  ;;  %v6056_v25 = vld [vmem:[#allocation20 + $0x3a8] sm:$0xf0]  ;;  %v3443_v21 = vmul.f32 0.5, %v8061_v24  ;;  %v6048_v24 = vld [vmem:[#allocation20 + $0x398] sm:$0xf0] }
 0x790   : > { %v3483_v51 = vmul.f32 0.7978845, %v3475_v44  ;;  %3999 = vmatpush.bf16.msra.mxu3 %v6083_v48  ;;  %v6991_v8 = vpop.eup %6990  ;;  %v5979_v45 = vor.u32 %v6748_v2, %v5976_v15  ;;  %v6601_v48 = vld [vmem:[#allocation20 + $0x64] sm:$0xf0] }
 0x791   : > { %v3452_v47 = vmul.f32 %v8076_v38, %v8076_v38  ;;  %v2864_v50 = vmul.f32 %v2856_v43, %v2800_v31  ;;  %v3480_v36 = vmul.f32 0.7978845, %v3472_v3  ;;  %v3495_v17 = vadd.f32 1.0, %v6991_v8  ;;  %v6766_v31 = vld [vmem:[#allocation20 + $0x394] sm:$0xf] }
 0x792   : > { %6992 = vtanh.f32 %v3483_v51  ;;  %v6059_v3 = vor.u32 %v6768_v28, %v6056_v25  ;;  %v6051_v58 = vor.u32 %v6766_v31, %v6048_v24  ;;  %v3444_v29 = vmul.f32 0.5, %v8076_v38  ;;  %v6134_v28 = vld [vmem:[#allocation20 + $0x40] sm:$0xf]  ;;  %v6597_v25 = vld [vmem:[#allocation20 + $0x44] sm:$0xf0] }
 0x793   : > { %v3460_v56 = vmul.f32 %v3452_v47, %v8076_v38  ;;  %v8083_v46 = vpack.c.bf16 %v2864_v50, %v2860_v57  ;;  %6994 = vtanh.f32 %v3480_v36  ;;  %3988 = vmatpush.bf16.msra.mxu2 %v5995_v16  ;;  %v3503_v37 = vmul.f32 %v3495_v17, %v3439_v7  ;;  %v6150_v47 = vld [vmem:[#allocation20 + $0x60] sm:$0xf]  ;;  %v6222_v36 = vld [vmem:[#allocation20 + $0xf0] sm:$0xf]  ;;  %v6595_v24 = vld [vmem:[#allocation20 + $0x34] sm:$0xf0] }
 0x794   : > { %4000 = vmatpush.bf16.msra.mxu3 %v6075_v59  ;;  %v3440_v50 = vmul.f32 0.5, %v8057_v19  ;;  %v6151_v34 = vor.u32 %v6601_v48, %v6150_v47  ;;  %v6040_v19 = vld [vmem:[#allocation20 + $0x388] sm:$0xf0]  ;;  %v6126_v31 = vld [vmem:[#allocation20 + $0x30] sm:$0xf] }
 0x795   : > { %v3468_v5 = vmul.f32 0.044715, %v3460_v56  ;;  %v6619_v56 = vld [vmem:[#allocation20 + $0xf4] sm:$0xf0] }
 0x797   : > { %v3476_v6 = vadd.f32 %v3468_v5, %v8076_v38  ;;  %3989 = vmatpush.bf16.msra.mxu2 %v5987_v26 }
 0x798   : > { %v6993_v61 = vpop.eup %6992  ;;  %4001 = vmatpush.bf16.msra.mxu3 %v6067_v23  ;;  %v6043_v23 = vor.u32 %v6764_v63, %v6040_v19  ;;  %v6110_v19 = vld [vmem:[#allocation20 + $0x10] sm:$0xf] }
 0x799   : > { %v3484_v20 = vmul.f32 0.7978845, %v3476_v6  ;;  %v3499_v53 = vadd.f32 1.0, %v6993_v61  ;;  %v6995_v32 = vpop.eup %6994  ;;  %v6599_v6 = vld [vmem:[#allocation20 + $0x54] sm:$0xf0] }
 0x79a   : > { %v3496_v49 = vadd.f32 1.0, %v6995_v32 }
 0x79b   : > { %v3392_v22 = vpop.f32.mrf.mxu0  ;;  %v3406_v0 = vpop.f32.mrf.mxu1  ;;  %6996 = vtanh.f32 %v3484_v20  ;;  %v3507_v62 = vmul.f32 %v3499_v53, %v3443_v21  ;;  %3990 = vmatpush.bf16.msra.mxu2 %v5979_v45  ;;  %v6223_v20 = vor.u32 %v6619_v56, %v6222_v36  ;;  %v6593_v36 = vld [vmem:[#allocation20 + $0x24] sm:$0xf0] }
 0x79c   : > { %v3393_v30 = vadd.f32 %v3392_v22, %v3001_v12  ;;  %4002 = vmatpush.bf16.msra.mxu3 %v6059_v3  ;;  %v3504_v14 = vmul.f32 %v3496_v49, %v3440_v50  ;;  %v6615_v3 = vld [vmem:[#allocation20 + $0xd4] sm:$0xf0]  ;;  %v6198_v50 = vld [vmem:[#allocation20 + $0xc0] sm:$0xf] }
 0x79d   : > { %v8094_v44 = vpack.c.bf16 %v3507_v62, %v3503_v37  ;;  %v6135_v37 = vor.u32 %v6597_v25, %v6134_v28  ;;  %v6206_v62 = vld [vmem:[#allocation20 + $0xd0] sm:$0xf]  ;;  %v6160_v25 = vld [vmem:[#allocation20 + $0x78] sm:$0xf0] }
 0x79e   : > { %v8089_v33 = vadd.f32 %v3406_v0, %v3393_v30  ;;  %v6214_v0 = vld [vmem:[#allocation20 + $0xe0] sm:$0xf]  ;;  %v6207_v49 = vor.u32 %v6615_v3, %v6206_v62 }
 0x79f   : > { %3907 = vmatmul.bf16.vlgmr.msrb.gmra.mxu0 %v8094_v44  ;;  %v6215_v2 = vor.u32 %v6617_v1, %v6214_v0  ;;  %v6602_v0 = vld [vmem:[#allocation20 + $0x74] sm:$0xf]  ;;  %v6278_v3 = vld [vmem:[#allocation20 + $0x160] sm:$0xf] }
 0x7a0   : > { %v3449_v43 = vmul.f32 %v8089_v33, %v8089_v33  ;;  %4331 = vmatpush.bf16.msrb.mxu0 %v6159_v42  ;;  %4003 = vmatpush.bf16.msra.mxu3 %v6051_v58  ;;  %v3441_v1 = vmul.f32 0.5, %v8089_v33  ;;  %v6163_v62 = vor.u32 %v6602_v0, %v6160_v25  ;;  %v6208_v25 = vld [vmem:[#allocation20 + $0xd8] sm:$0xf0] }
 0x7a1   : > { %v6997_v57 = vpop.eup %6996 }
 0x7a2   : > { %v3457_v51 = vmul.f32 %v3449_v43, %v8089_v33  ;;  %v3420_v52 = vpop.f32.mrf.mxu2  ;;  %v3434_v35 = vpop.f32.mrf.mxu3  ;;  %v3500_v60 = vadd.f32 1.0, %v6997_v57  ;;  %v6127_v57 = vor.u32 %v6595_v24, %v6126_v31  ;;  %v6166_v31 = vld [vmem:[#allocation20 + $0x80] sm:$0xf] }
 0x7a3   : > { %v3421_v5 = vadd.f32 %v3420_v52, %v3002_v4  ;;  %v3394_v59 = vpop.f32.mrf.mxu0  ;;  %v3408_v13 = vpop.f32.mrf.mxu1 }
 0x7a4   : > { %v3465_v8 = vmul.f32 0.044715, %v3457_v51  ;;  %v3395_v16 = vadd.f32 %v3394_v59, %v3001_v12  ;;  %v3508_v7 = vmul.f32 %v3500_v60, %v3444_v29  ;;  %4332 = vmatpush.bf16.msrb.mxu0 %v6151_v34  ;;  %v6143_v12 = vor.u32 %v6599_v6, %v6142_v18  ;;  %4004 = vmatpush.bf16.msra.mxu3 %v6043_v23  ;;  %v6613_v51 = vld [vmem:[#allocation20 + $0xc4] sm:$0xf0]  ;;  %v6190_v59 = vld [vmem:[#allocation20 + $0xb0] sm:$0xf] }
 0x7a5   : > { %v8100_v9 = vadd.f32 %v3434_v35, %v3421_v5  ;;  %v6118_v35 = vld [vmem:[#allocation20 + $0x20] sm:$0xf]  ;;  %v6199_v29 = vor.u32 %v6613_v51, %v6198_v50  ;;  %v6611_v34 = vld [vmem:[#allocation20 + $0xb4] sm:$0xf0]  ;;  %v6618_v50 = vld [vmem:[#allocation20 + $0xf4] sm:$0xf] }
 0x7a6   : > { %v3473_v17 = vadd.f32 %v3465_v8, %v8089_v33  ;;  %v8103_v38 = vadd.f32 %v3408_v13, %v3395_v16  ;;  %v8107_v22 = vpack.c.bf16 %v3508_v7, %v3504_v14  ;;  %v6119_v5 = vor.u32 %v6593_v36, %v6118_v35  ;;  %v6591_v8 = vld [vmem:[#allocation20 + $0x14] sm:$0xf0]  ;;  %v6182_v6 = vld [vmem:[#allocation20 + $0xa0] sm:$0xf]  ;;  %v6609_v13 = vld [vmem:[#allocation20 + $0xa4] sm:$0xf0] }
 0x7a7   : > { %v3450_v61 = vmul.f32 %v8100_v9, %v8100_v9  ;;  %v6191_v18 = vor.u32 %v6611_v34, %v6190_v59  ;;  %v6102_v14 = vld [vmem:[#allocation20] sm:$0xf]  ;;  %v6633_v33 = vld [vmem:[#allocation20 + $0x164] sm:$0xf0]  ;;  %v6224_v51 = vld [vmem:[#allocation20 + $0xf8] sm:$0xf0] }
 0x7a8   : > { %v3453_v26 = vmul.f32 %v8103_v38, %v8103_v38  ;;  %3921 = vmatmul.bf16.vlgmr.msrb.gmra.mxu1 %v8107_v22  ;;  %v3481_v53 = vmul.f32 0.7978845, %v3473_v17  ;;  %4333 = vmatpush.bf16.msrb.mxu0 %v6143_v12  ;;  %v6635_v12 = vld [vmem:[#allocation20 + $0x174] sm:$0xf0] }
 0x7a9   : > { %v3458_v21 = vmul.f32 %v3450_v61, %v8100_v9  ;;  %4345 = vmatpush.bf16.msrb.mxu1 %v6223_v20  ;;  %v6589_v20 = vld [vmem:[#allocation20 + $0x4] sm:$0xf0]  ;;  %v6286_v61 = vld [vmem:[#allocation20 + $0x170] sm:$0xf] }
 0x7aa   : > { %v3461_v30 = vmul.f32 %v3453_v26, %v8103_v38  ;;  %v3422_v54 = vpop.f32.mrf.mxu2  ;;  %v3436_v45 = vpop.f32.mrf.mxu3  ;;  %6998 = vtanh.f32 %v3481_v53  ;;  %v3445_v26 = vmul.f32 0.5, %v8103_v38 }
 0x7ab   : > { %v3466_v15 = vmul.f32 0.044715, %v3458_v21  ;;  %v3423_v32 = vadd.f32 %v3422_v54, %v3002_v4  ;;  %v6183_v21 = vor.u32 %v6609_v13, %v6182_v6  ;;  %v6616_v13 = vld [vmem:[#allocation20 + $0xe4] sm:$0xf] }
 0x7ac   : > { %v3469_v42 = vmul.f32 0.044715, %v3461_v30  ;;  %4334 = vmatpush.bf16.msrb.mxu0 %v6135_v37  ;;  %v6287_v37 = vor.u32 %v6635_v12, %v6286_v61  ;;  %v6334_v12 = vld [vmem:[#allocation20 + $0x1d0] sm:$0xf] }
 0x7ad   : > { %v3474_v43 = vadd.f32 %v3466_v15, %v8100_v9  ;;  %v8115_v47 = vadd.f32 %v3436_v45, %v3423_v32  ;;  %4346 = vmatpush.bf16.msrb.mxu1 %v6215_v2  ;;  %v6103_v2 = vor.u32 %v6589_v20, %v6102_v14  ;;  %v6174_v15 = vld [vmem:[#allocation20 + $0x90] sm:$0xf]  ;;  %v6607_v32 = vld [vmem:[#allocation20 + $0x94] sm:$0xf0]  ;;  %v6152_v45 = vld [vmem:[#allocation20 + $0x68] sm:$0xf0] }
 0x7ae   : > { %v3477_v48 = vadd.f32 %v3469_v42, %v8103_v38  ;;  %v6600_v38 = vld [vmem:[#allocation20 + $0x64] sm:$0xf]  ;;  %v6175_v24 = vor.u32 %v6607_v32, %v6174_v15  ;;  %v6216_v14 = vld [vmem:[#allocation20 + $0xe8] sm:$0xf0]  ;;  %v6326_v32 = vld [vmem:[#allocation20 + $0x1c0] sm:$0xf] }
 0x7af   : > { %v3454_v4 = vmul.f32 %v8115_v47, %v8115_v47  ;;  %v3482_v56 = vmul.f32 0.7978845, %v3474_v43  ;;  %3963 = vmatmul.bf16.vlgmr.msra.gmra.mxu0 %v8094_v44  ;;  %v6111_v44 = vor.u32 %v6591_v8, %v6110_v19  ;;  %v6605_v43 = vld [vmem:[#allocation20 + $0x84] sm:$0xf0]  ;;  %v3446_v35 = vmul.f32 0.5, %v8115_v47 }
 0x7b0   : > { %v3485_v52 = vmul.f32 0.7978845, %v3477_v48  ;;  %4335 = vmatpush.bf16.msrb.mxu0 %v6127_v57  ;;  %v6999_v63 = vpop.eup %6998  ;;  %v6350_v48 = vld [vmem:[#allocation20 + $0x1f0] sm:$0xf]  ;;  %v6651_v57 = vld [vmem:[#allocation20 + $0x1f4] sm:$0xf0]  ;;  %v6227_v8 = vor.u32 %v6618_v50, %v6224_v51  ;;  %v6219_v61 = vor.u32 %v6616_v13, %v6216_v14 }
 0x7b1   : > { %v3462_v58 = vmul.f32 %v3454_v4, %v8115_v47  ;;  %4347 = vmatpush.bf16.msrb.mxu1 %v6207_v49  ;;  %v3497_v7 = vadd.f32 1.0, %v6999_v63  ;;  %v6279_v4 = vor.u32 %v6633_v33, %v6278_v3  ;;  %v6167_v63 = vor.u32 %v6605_v43, %v6166_v31  ;;  %v6136_v20 = vld [vmem:[#allocation20 + $0x48] sm:$0xf0]  ;;  %v6612_v3 = vld [vmem:[#allocation20 + $0xc4] sm:$0xf] }
 0x7b2   : > { %7000 = vtanh.f32 %v3485_v52  ;;  %v3442_v52 = vmul.f32 0.5, %v8100_v9  ;;  %v6351_v19 = vor.u32 %v6651_v57, %v6350_v48  ;;  %v6649_v9 = vld [vmem:[#allocation20 + $0x1e4] sm:$0xf0]  ;;  %v6200_v33 = vld [vmem:[#allocation20 + $0xc8] sm:$0xf0] }
 0x7b3   : > { %v3470_v60 = vmul.f32 0.044715, %v3462_v58  ;;  %7002 = vtanh.f32 %v3482_v56  ;;  %v3505_v30 = vmul.f32 %v3497_v7, %v3441_v1  ;;  %v6155_v56 = vor.u32 %v6600_v38, %v6152_v45  ;;  %v6270_v58 = vld [vmem:[#allocation20 + $0x150] sm:$0xf]  ;;  %v6262_v7 = vld [vmem:[#allocation20 + $0x140] sm:$0xf] }
 0x7b4   : > { %4336 = vmatpush.bf16.msrb.mxu0 %v6119_v5  ;;  %v6144_v5 = vld [vmem:[#allocation20 + $0x58] sm:$0xf0]  ;;  %v6592_v45 = vld [vmem:[#allocation20 + $0x24] sm:$0xf]  ;;  %v6120_v31 = vld [vmem:[#allocation20 + $0x28] sm:$0xf0]  ;;  %v6203_v48 = vor.u32 %v6612_v3, %v6200_v33 }
 0x7b5   : > { %v3478_v16 = vadd.f32 %v3470_v60, %v8115_v47  ;;  %4348 = vmatpush.bf16.msrb.mxu1 %v6199_v29  ;;  %v6631_v29 = vld [vmem:[#allocation20 + $0x154] sm:$0xf0]  ;;  %v6598_v60 = vld [vmem:[#allocation20 + $0x54] sm:$0xf]  ;;  %v6192_v51 = vld [vmem:[#allocation20 + $0xb8] sm:$0xf0] }
 0x7b6   : > { %v6147_v6 = vor.u32 %v6598_v60, %v6144_v5  ;;  %v6643_v57 = vld [vmem:[#allocation20 + $0x1b4] sm:$0xf0]  ;;  %v6610_v50 = vld [vmem:[#allocation20 + $0xb4] sm:$0xf]  ;;  %v6310_v5 = vld [vmem:[#allocation20 + $0x1a0] sm:$0xf] }
 0x7b7   : > { %v3486_v17 = vmul.f32 0.7978845, %v3478_v16  ;;  %v6342_v16 = vld [vmem:[#allocation20 + $0x1e0] sm:$0xf]  ;;  %v6195_v60 = vor.u32 %v6610_v50, %v6192_v51  ;;  %v6634_v14 = vld [vmem:[#allocation20 + $0x174] sm:$0xf] }
 0x7b8   : > { %v7001_v23 = vpop.eup %7000  ;;  %3977 = vmatmul.bf16.vlgmr.msra.gmra.mxu1 %v8107_v22  ;;  %4337 = vmatpush.bf16.msrb.mxu0 %v6111_v44  ;;  %v6596_v44 = vld [vmem:[#allocation20 + $0x44] sm:$0xf]  ;;  %v6272_v3 = vld [vmem:[#allocation20 + $0x158] sm:$0xf0] }
 0x7b9   : > { %v3501_v28 = vadd.f32 1.0, %v7001_v23  ;;  %7004 = vtanh.f32 %v3486_v17  ;;  %4349 = vmatpush.bf16.msrb.mxu1 %v6191_v18  ;;  %v7003_v53 = vpop.eup %7002  ;;  %v6271_v18 = vor.u32 %v6631_v29, %v6270_v58  ;;  %v6629_v17 = vld [vmem:[#allocation20 + $0x144] sm:$0xf0]  ;;  %v6343_v23 = vor.u32 %v6649_v9, %v6342_v16  ;;  %v6623_v58 = vld [vmem:[#allocation20 + $0x114] sm:$0xf0] }
 0x7ba   : > { %v3498_v22 = vadd.f32 1.0, %v7003_v53  ;;  %v6263_v0 = vor.u32 %v6629_v17, %v6262_v7  ;;  %v6139_v1 = vor.u32 %v6596_v44, %v6136_v20  ;;  %v6128_v53 = vld [vmem:[#allocation20 + $0x38] sm:$0xf0]  ;;  %v6104_v16 = vld [vmem:[#allocation20 + $0x8] sm:$0xf0] }
 0x7bb   : > { %v3509_v54 = vmul.f32 %v3501_v28, %v3445_v26  ;;  %v6647_v26 = vld [vmem:[#allocation20 + $0x1d4] sm:$0xf0]  ;;  %v6614_v28 = vld [vmem:[#allocation20 + $0xd4] sm:$0xf]  ;;  %v6230_v9 = vld [vmem:[#allocation20 + $0x100] sm:$0xf] }
 0x7bc   : > { %4338 = vmatpush.bf16.msrb.mxu0 %v6103_v2  ;;  %v3506_v59 = vmul.f32 %v3498_v22, %v3442_v52  ;;  %v6335_v2 = vor.u32 %v6647_v26, %v6334_v12  ;;  %v6211_v15 = vor.u32 %v6614_v28, %v6208_v25  ;;  %v6246_v22 = vld [vmem:[#allocation20 + $0x120] sm:$0xf]  ;;  %v6288_v7 = vld [vmem:[#allocation20 + $0x178] sm:$0xf0]  ;;  %v6302_v17 = vld [vmem:[#allocation20 + $0x190] sm:$0xf] }
 0x7bd   : > { %v8126_v42 = vpack.c.bf16 %v3509_v54, %v3505_v30  ;;  %4350 = vmatpush.bf16.msrb.mxu1 %v6183_v21  ;;  %v6594_v21 = vld [vmem:[#allocation20 + $0x34] sm:$0xf]  ;;  %v6254_v30 = vld [vmem:[#allocation20 + $0x130] sm:$0xf]  ;;  %v6627_v54 = vld [vmem:[#allocation20 + $0x134] sm:$0xf0] }
 0x7be   : > { %v6255_v38 = vor.u32 %v6627_v54, %v6254_v30  ;;  %v6639_v20 = vld [vmem:[#allocation20 + $0x194] sm:$0xf0]  ;;  %v6632_v26 = vld [vmem:[#allocation20 + $0x164] sm:$0xf]  ;;  %v6280_v28 = vld [vmem:[#allocation20 + $0x168] sm:$0xf0] }
 0x7bf   : > { %v7005_v49 = vpop.eup %7004  ;;  %3935 = vmatmul.bf16.vlgmr.msrb.gmra.mxu2 %v8126_v42  ;;  %4339 = vmatmul.bf16.vlgmr.msrb.gmra.mxu0 %v8034_v55  ;;  %v6294_v25 = vld [vmem:[#allocation20 + $0x180] sm:$0xf]  ;;  %v6168_v30 = vld [vmem:[#allocation20 + $0x88] sm:$0xf0]  ;;  %v6650_v54 = vld [vmem:[#allocation20 + $0x1f4] sm:$0xf] }
 0x7c0   : > { %v3502_v36 = vadd.f32 1.0, %v7005_v49  ;;  %4359 = vmatpush.bf16.msrb.mxu2 %v6287_v37  ;;  %4387 = vmatpush.bf16.msra.mxu0 %v6163_v62  ;;  %v6131_v37 = vor.u32 %v6594_v21, %v6128_v53  ;;  %v6645_v62 = vld [vmem:[#allocation20 + $0x1c4] sm:$0xf0]  ;;  %v6318_v49 = vld [vmem:[#allocation20 + $0x1b0] sm:$0xf] }
 0x7c1   : > { %4351 = vmatpush.bf16.msrb.mxu1 %v6175_v24  ;;  %v6625_v24 = vld [vmem:[#allocation20 + $0x124] sm:$0xf0]  ;;  %v6327_v43 = vor.u32 %v6645_v62, %v6326_v32  ;;  %v6319_v29 = vor.u32 %v6643_v57, %v6318_v49  ;;  %v6604_v53 = vld [vmem:[#allocation20 + $0x84] sm:$0xf]  ;;  %v6630_v62 = vld [vmem:[#allocation20 + $0x154] sm:$0xf] }
 0x7c2   : > { %v3510_v34 = vmul.f32 %v3502_v36, %v3446_v35  ;;  %v6247_v52 = vor.u32 %v6625_v24, %v6246_v22  ;;  %v6590_v35 = vld [vmem:[#allocation20 + $0x14] sm:$0xf]  ;;  %v6112_v36 = vld [vmem:[#allocation20 + $0x18] sm:$0xf0]  ;;  %v6637_v21 = vld [vmem:[#allocation20 + $0x184] sm:$0xf0] }
 0x7c3   : > { %v6295_v32 = vor.u32 %v6637_v21, %v6294_v25  ;;  %v6628_v22 = vld [vmem:[#allocation20 + $0x144] sm:$0xf]  ;;  %v6264_v24 = vld [vmem:[#allocation20 + $0x148] sm:$0xf0]  ;;  %v6336_v49 = vld [vmem:[#allocation20 + $0x1d8] sm:$0xf0] }
 0x7c4   : > { %4360 = vmatpush.bf16.msrb.mxu2 %v6279_v4  ;;  %4388 = vmatpush.bf16.msra.mxu0 %v6155_v56  ;;  %v8132_v47 = vpack.c.bf16 %v3510_v34, %v3506_v59  ;;  %v6123_v4 = vor.u32 %v6592_v45, %v6120_v31  ;;  %v6238_v56 = vld [vmem:[#allocation20 + $0x110] sm:$0xf]  ;;  %v6115_v59 = vor.u32 %v6590_v35, %v6112_v36  ;;  %v6641_v34 = vld [vmem:[#allocation20 + $0x1a4] sm:$0xf0]  ;;  %v6344_v45 = vld [vmem:[#allocation20 + $0x1e8] sm:$0xf0] }
 0x7c5   : > { %4352 = vmatpush.bf16.msrb.mxu1 %v6167_v63  ;;  %v6184_v63 = vld [vmem:[#allocation20 + $0xa8] sm:$0xf0]  ;;  %v6275_v31 = vor.u32 %v6630_v62, %v6272_v3  ;;  %v6256_v57 = vld [vmem:[#allocation20 + $0x138] sm:$0xf0]  ;;  %v6644_v51 = vld [vmem:[#allocation20 + $0x1c4] sm:$0xf] }
 0x7c6   : > { %3949 = vmatmul.bf16.vlgmr.msrb.gmra.mxu3 %v8132_v47  ;;  %v6624_v36 = vld [vmem:[#allocation20 + $0x124] sm:$0xf] }
 0x7c7   : > { %4373 = vmatpush.bf16.msrb.mxu3 %v6351_v19  ;;  %v6239_v19 = vor.u32 %v6623_v58, %v6238_v56  ;;  %v6248_v56 = vld [vmem:[#allocation20 + $0x128] sm:$0xf0] }
 0x7c8   : > { %4361 = vmatpush.bf16.msrb.mxu2 %v6271_v18  ;;  %4389 = vmatpush.bf16.msra.mxu0 %v6147_v6  ;;  %v6621_v18 = vld [vmem:[#allocation20 + $0x104] sm:$0xf0]  ;;  %v6311_v6 = vor.u32 %v6641_v34, %v6310_v5  ;;  %v6251_v5 = vor.u32 %v6624_v36, %v6248_v56  ;;  %v6240_v34 = vld [vmem:[#allocation20 + $0x118] sm:$0xf0] }
 0x7c9   : > { %4401 = vmatpush.bf16.msra.mxu1 %v6227_v8  ;;  %v6588_v8 = vld [vmem:[#allocation20 + $0x4] sm:$0xf]  ;;  %v6231_v12 = vor.u32 %v6621_v18, %v6230_v9  ;;  %v6638_v18 = vld [vmem:[#allocation20 + $0x194] sm:$0xf] }
 0x7ca   : > { %4353 = vmatmul.bf16.vlgmr.msrb.gmra.mxu1 %v8050_v39  ;;  %v6107_v44 = vor.u32 %v6588_v8, %v6104_v16  ;;  %v6620_v8 = vld [vmem:[#allocation20 + $0x104] sm:$0xf]  ;;  %v6232_v16 = vld [vmem:[#allocation20 + $0x108] sm:$0xf0] }
 0x7cb   : > { %4374 = vmatpush.bf16.msrb.mxu3 %v6343_v23  ;;  %v6606_v23 = vld [vmem:[#allocation20 + $0x94] sm:$0xf] }
 0x7cc   : > { %4362 = vmatpush.bf16.msrb.mxu2 %v6263_v0  ;;  %4390 = vmatpush.bf16.msra.mxu0 %v6139_v1  ;;  %v6291_v0 = vor.u32 %v6634_v14, %v6288_v7  ;;  %v6636_v7 = vld [vmem:[#allocation20 + $0x184] sm:$0xf] }
 0x7cd   : > { %4402 = vmatpush.bf16.msra.mxu1 %v6219_v61  ;;  %v6176_v61 = vld [vmem:[#allocation20 + $0x98] sm:$0xf0] }
 0x7ce   : > { %v6179_v1 = vor.u32 %v6606_v23, %v6176_v61 }
 0x7cf   : > { %4375 = vmatpush.bf16.msrb.mxu3 %v6335_v2  ;;  %3991 = vmatmul.bf16.vlgmr.msra.gmra.mxu2 %v8126_v42  ;;  %v6608_v42 = vld [vmem:[#allocation20 + $0xa4] sm:$0xf]  ;;  %v6352_v2 = vld [vmem:[#allocation20 + $0x1f8] sm:$0xf0] }
 0x7d0   : > { %4391 = vmatpush.bf16.msra.mxu0 %v6131_v37  ;;  %4363 = vmatpush.bf16.msrb.mxu2 %v6255_v38  ;;  %v6187_v13 = vor.u32 %v6608_v42, %v6184_v63  ;;  %v6171_v37 = vor.u32 %v6604_v53, %v6168_v30  ;;  %v6355_v33 = vor.u32 %v6650_v54, %v6352_v2  ;;  %v6648_v38 = vld [vmem:[#allocation20 + $0x1e4] sm:$0xf]  ;;  %v6312_v63 = vld [vmem:[#allocation20 + $0x1a8] sm:$0xf0] }
 0x7d1   : > { %4403 = vmatpush.bf16.msra.mxu1 %v6211_v15  ;;  %v6283_v15 = vor.u32 %v6632_v26, %v6280_v28  ;;  %v6640_v42 = vld [vmem:[#allocation20 + $0x1a4] sm:$0xf] }
 0x7d2   : > { %v6315_v9 = vor.u32 %v6640_v42, %v6312_v63 }
 0x7d3   : > { %4376 = vmatpush.bf16.msrb.mxu3 %v6327_v43  ;;  %v6347_v43 = vor.u32 %v6648_v38, %v6344_v45 }
 0x7d4   : > { %4392 = vmatpush.bf16.msra.mxu0 %v6123_v4  ;;  %4364 = vmatpush.bf16.msrb.mxu2 %v6247_v52  ;;  %v6267_v4 = vor.u32 %v6628_v22, %v6264_v24  ;;  %v6328_v52 = vld [vmem:[#allocation20 + $0x1c8] sm:$0xf0]  ;;  %v4447_v24 = vld [vmem:[%s8236_s17] sm:$0x3] }
 0x7d5   : > { %4404 = vmatpush.bf16.msra.mxu1 %v6203_v48  ;;  %v6646_v48 = vld [vmem:[#allocation20 + $0x1d4] sm:$0xf]  ;;  %v6331_v58 = vor.u32 %v6644_v51, %v6328_v52 }
 0x7d6   : > { %4005 = vmatmul.bf16.vlgmr.msra.gmra.mxu3 %v8132_v47  ;;  %v6303_v47 = vor.u32 %v6639_v20, %v6302_v17  ;;  %v6339_v50 = vor.u32 %v6646_v48, %v6336_v49  ;;  %v6296_v17 = vld [vmem:[#allocation20 + $0x188] sm:$0xf0] }
 0x7d7   : > { %4377 = vmatpush.bf16.msrb.mxu3 %v6319_v29  ;;  %v6642_v29 = vld [vmem:[#allocation20 + $0x1b4] sm:$0xf] }
 0x7d8   : > { %4393 = vmatpush.bf16.msra.mxu0 %v6115_v59  ;;  %4365 = vmatpush.bf16.msrb.mxu2 %v6239_v19  ;;  %v6622_v59 = vld [vmem:[#allocation20 + $0x114] sm:$0xf] }
 0x7d9   : > { %4405 = vmatpush.bf16.msra.mxu1 %v6195_v60  ;;  %v6320_v60 = vld [vmem:[#allocation20 + $0x1b8] sm:$0xf0]  ;;  %v6243_v19 = vor.u32 %v6622_v59, %v6240_v34 }
 0x7db   : > { %4378 = vmatpush.bf16.msrb.mxu3 %v6311_v6  ;;  %v6304_v6 = vld [vmem:[#allocation20 + $0x198] sm:$0xf0] }
 0x7dc   : > { %4394 = vmatpush.bf16.msra.mxu0 %v6107_v44  ;;  %4366 = vmatpush.bf16.msrb.mxu2 %v6231_v12  ;;  %v6307_v14 = vor.u32 %v6638_v18, %v6304_v6  ;;  %v6299_v44 = vor.u32 %v6636_v7, %v6296_v17  ;;  %v4450_v7 = vperm.slane %v4447_v24, 1 }
 0x7dd   : > { %4406 = vmatpush.bf16.msra.mxu1 %v6187_v13  ;;  %v6235_v13 = vor.u32 %v6620_v8, %v6232_v16 }
 0x7df   : > { %4379 = vmatpush.bf16.msrb.mxu3 %v6303_v47  ;;  %4367 = vmatmul.bf16.vlgmr.msrb.gmra.mxu2 %v8072_v27 }
 0x7e0   : > { %4415 = vmatpush.bf16.msra.mxu2 %v6291_v0  ;;  %4395 = vmatmul.bf16.vlgmr.msra.gmra.mxu0 %v8034_v55  ;;  %v6626_v55 = vld [vmem:[#allocation20 + $0x134] sm:$0xf] }
 0x7e1   : > { %4407 = vmatpush.bf16.msra.mxu1 %v6179_v1  ;;  %v6259_v35 = vor.u32 %v6626_v55, %v6256_v57  ;;  %v4449_v57 = vperm.slane %v4447_v24, 0 }
 0x7e3   : > { %4380 = vmatpush.bf16.msrb.mxu3 %v6295_v32 }
 0x7e4   : > { %4416 = vmatpush.bf16.msra.mxu2 %v6283_v15 }
 0x7e5   : > { %4408 = vmatpush.bf16.msra.mxu1 %v6171_v37 }
 0x7e6   : > { %4381 = vmatmul.bf16.vlgmr.msrb.gmra.mxu3 %v8083_v46 }
 0x7e7   : > { %4429 = vmatpush.bf16.msra.mxu3 %v6355_v33 }
 0x7e8   : > { %4417 = vmatpush.bf16.msra.mxu2 %v6275_v31  ;;  %4409 = vmatmul.bf16.vlgmr.msra.gmra.mxu1 %v8050_v39  ;;  %v6323_v39 = vor.u32 %v6642_v29, %v6320_v60 }
 0x7eb   : > { %4430 = vmatpush.bf16.msra.mxu3 %v6347_v43 }
 0x7ec   : > { %4418 = vmatpush.bf16.msra.mxu2 %v6267_v4 }
 0x7ef   : > { %4431 = vmatpush.bf16.msra.mxu3 %v6339_v50 }
 0x7f0   : > { %4419 = vmatpush.bf16.msra.mxu2 %v6259_v35 }
 0x7f3   : > { %4432 = vmatpush.bf16.msra.mxu3 %v6331_v58 }
 0x7f4   : > { %4420 = vmatpush.bf16.msra.mxu2 %v6251_v5 }
 0x7f7   : > { %4433 = vmatpush.bf16.msra.mxu3 %v6323_v39 }
 0x7f8   : > { %4421 = vmatpush.bf16.msra.mxu2 %v6243_v19 }
 0x7fb   : > { %4434 = vmatpush.bf16.msra.mxu3 %v6315_v9 }
 0x7fc   : > { %4422 = vmatpush.bf16.msra.mxu2 %v6235_v13 }
 0x7ff   : > { %4435 = vmatpush.bf16.msra.mxu3 %v6307_v14  ;;  %4423 = vmatmul.bf16.vlgmr.msra.gmra.mxu2 %v8072_v27 }
 0x803   : > { %4436 = vmatpush.bf16.msra.mxu3 %v6299_v44 }
 0x806   : > { %4437 = vmatmul.bf16.vlgmr.msra.gmra.mxu3 %v8083_v46 }
 0x81c   : > { %v3908_v20 = vpop.f32.mrf.mxu0 }
 0x824   : > { %v3910_v61 = vpop.f32.mrf.mxu0 }
 0x825   : > { %v3922_v23 = vpop.f32.mrf.mxu1 }
 0x826   : > { %v3923_v2 = vadd.f32 %v3922_v23, %v3908_v20 }
 0x82c   : > { %v3964_v26 = vpop.f32.mrf.mxu0 }
 0x82d   : > { %v3924_v0 = vpop.f32.mrf.mxu1 }
 0x82e   : > { %v3925_v62 = vadd.f32 %v3924_v0, %v3910_v61 }
 0x834   : > { %v3966_v53 = vpop.f32.mrf.mxu0 }
 0x835   : > { %v3978_v28 = vpop.f32.mrf.mxu1 }
 0x836   : > { %v3979_v59 = vadd.f32 %v3978_v28, %v3964_v26 }
 0x83c   : > { %v4340_v37 = vpop.f32.mrf.mxu0 }
 0x83d   : > { %v3980_v30 = vpop.f32.mrf.mxu1 }
 0x83e   : > { %v3981_v8 = vadd.f32 %v3980_v30, %v3966_v53 }
 0x842   : > { %v3936_v12 = vpop.f32.mrf.mxu2 }
 0x843   : > { %v3937_v27 = vadd.f32 %v3936_v12, %v3923_v2 }
 0x844   : > { %v4342_v48 = vpop.f32.mrf.mxu0 }
 0x847   : > { %v4354_v33 = vpop.f32.mrf.mxu1 }
 0x849   : > { %v3950_v47 = vpop.f32.mrf.mxu3 }
 0x84a   : > { %v3938_v1 = vpop.f32.mrf.mxu2  ;;  %v3951_v32 = vadd.f32 %v3950_v47, %v3937_v27 }
 0x84b   : > { %v3939_v45 = vadd.f32 %v3938_v1, %v3925_v62 }
 0x84c   : > { %v4341_v3 = vadd.f32 %v4340_v37, %v3951_v32 }
 0x84e   : > { %v4355_v22 = vadd.f32 %v4354_v33, %v4341_v3 }
 0x84f   : > { %v4356_v51 = vpop.f32.mrf.mxu1 }
 0x851   : > { %v3952_v25 = vpop.f32.mrf.mxu3 }
 0x852   : > { %v3992_v21 = vpop.f32.mrf.mxu2  ;;  %v3953_v31 = vadd.f32 %v3952_v25, %v3939_v45 }
 0x854   : > { %v4343_v4 = vadd.f32 %v4342_v48, %v3953_v31 }
 0x856   : > { %v4357_v36 = vadd.f32 %v4356_v51, %v4343_v4 }
 0x859   : > { %v4006_v54 = vpop.f32.mrf.mxu3 }
 0x85a   : > { %v3994_v15 = vpop.f32.mrf.mxu2 }
 0x85b   : > { %v3995_v9 = vadd.f32 %v3994_v15, %v3981_v8 }
 0x85d   : > { %v4396_v34 = vpop.f32.mrf.mxu0 }
 0x861   : > { %v4008_v46 = vpop.f32.mrf.mxu3 }
 0x862   : > { %v4368_v38 = vpop.f32.mrf.mxu2  ;;  %v4009_v14 = vadd.f32 %v4008_v46, %v3995_v9 }
 0x863   : > { %v4369_v43 = vadd.f32 %v4368_v38, %v4355_v22 }
 0x865   : > { %v4410_v39 = vpop.f32.mrf.mxu1  ;;  %v4398_v6 = vpop.f32.mrf.mxu0 }
 0x866   : > { %v4399_v44 = vadd.f32 %v4398_v6, %v4009_v14 }
 0x869   : > { %v4382_v49 = vpop.f32.mrf.mxu3 }
 0x86a   : > { %v4383_v55 = vadd.f32 %v4382_v49, %v4369_v43  ;;  %v4370_v52 = vpop.f32.mrf.mxu2 }
 0x86b   : > { %v4371_v56 = vadd.f32 %v4370_v52, %v4357_v36 }
 0x86c   : > { %v4443_v50 = vadd.f32 %v4383_v55, %v7884_v10  ;;  %v3993_v10 = vadd.f32 %v3992_v21, %v3979_v59 }
 0x86d   : > { %v4412_v17 = vpop.f32.mrf.mxu1 }
 0x86e   : > { %v4453_v35 = vadd.f32 %v4449_v57, %v4443_v50  ;;  %v4007_v42 = vadd.f32 %v4006_v54, %v3993_v10  ;;  %v4413_v61 = vadd.f32 %v4412_v17, %v4399_v44 }
 0x870   : > { %4457 = vst [vmem:[%s8150_s12] sm:$0xff] %v4453_v35  ;;  %v4397_v19 = vadd.f32 %v4396_v34, %v4007_v42 }
 0x871   : > { %v4384_v58 = vpop.f32.mrf.mxu3 }
 0x872   : > { %v4385_v29 = vadd.f32 %v4384_v58, %v4371_v56  ;;  %v4411_v16 = vadd.f32 %v4410_v39, %v4397_v19 }
 0x874   : > { %v4445_v60 = vadd.f32 %v4385_v29, %v7913_v40 }
 0x876   : > { %v4455_v5 = vadd.f32 %v4449_v57, %v4445_v60 }
 0x878   : > { %4459 = vst [vmem:[%s8150_s12 + $0x10] sm:$0xff] %v4455_v5 }
 0x882   : > { %v4424_v63 = vpop.f32.mrf.mxu2 }
 0x883   : > { %v4425_v18 = vadd.f32 %v4424_v63, %v4411_v16 }
 0x889   : > { %v4438_v13 = vpop.f32.mrf.mxu3 }
 0x88a   : > { %v4439_v40 = vadd.f32 %v4438_v13, %v4425_v18  ;;  %v4426_v23 = vpop.f32.mrf.mxu2 }
 0x88b   : > { %v4427_v0 = vadd.f32 %v4426_v23, %v4413_v61 }
 0x88c   : > { %v4444_v20 = vadd.f32 %v4439_v40, %v7888_v11 }
 0x88e   : > { %v4454_v12 = vadd.f32 %v4450_v7, %v4444_v20 }
 0x890   : > { %4458 = vst [vmem:[%s8150_s12 + $0x8] sm:$0xff] %v4454_v12 }
 0x891   : > { %v4440_v47 = vpop.f32.mrf.mxu3 }
 0x892   : > { %v4441_v1 = vadd.f32 %v4440_v47, %v4427_v0 }
 0x894   : > { %v4446_v11 = vadd.f32 %v4441_v1, %v7917_v41 }
 0x896   : > { %v4456_v26 = vadd.f32 %v4450_v7, %v4446_v11 }
 0x898   : > { %4460 = vst [vmem:[%s8150_s12 + $0x18] sm:$0xff] %v4456_v26 }
 0x899   : > { %7397 = shalt.err (!%p7394_p9)
}
 0x89a   : > { %s7480_s24 = smov 256   ;;  %s7481_s12 = smov 16  }
 0x89b   : > { %6828 = dma.vmem_to_hbm [thread:$0]  (%p7697_p0), %s4476_s26, 512, %s4478_s1, %s4462_s25, %s7480_s24, %s7480_s24, %s7481_s12  }
 0x89c PF: > { %s4492_s5 = sand.u32 1, %s7448_s18   ;;  %p8238_p10 = scmp.ge.s32.totalorder %s7460_s21, 2 }
 0x89d   : > { %s4493_s7 = scalar_lea.sflag [#allocation4], %s4492_s5 }
 0x89e   : > { %p6869_p11 = pnand %p8238_p10, %p7703_p6 }
 0x8a0   : > { %p6870_p12 = pneg %p6869_p11 }
 0x8a2   : > { %7443 = dma.done.wait (%p6870_p12), %s4493_s7, 512  }
 0x8a3   : > { %7445 = vsyncadd (%p6870_p12), %s4493_s7, 4294966784  ;;  %p34_p2 = scmp.ge.s32.totalorder %s7673_s16, 4   ;;  %s8239_s18 = smov %s7452_s19 }
 0x8a4   : > { %s8240_s19 = smov %s7456_s20  ;;  %s8241_s20 = smov %s7685_s6 }
 0x8a5   : > { %s8242_s21 = smov %s7673_s16  ;;  %36 = sbr.rel (!%p34_p2) target bundleno = 22 (0x16), region = 169 }
 0x8aa   :  { %4499 = vsyncpa [#allocation3], 1 }
 0x8ab   :  { %4501 = vsyncpa [#allocation3 + $0x1], 1 }
 0x8ac   :  { %4502 = vsyncpa [#allocation6], 1 }
 0x8ad   :  { %4503 = vsyncpa [#allocation9], 1 }
 0x8ae   :  { %4504 = vsyncpa [#allocation12], 1 }
 0x8af   :  { %4505 = vsyncpa [#allocation15], 1 }
 0x8b0   :  { %4506 = vsyncpa [#allocation18], 1 }
 0x8b1   :  { %4507 = vsyncpa [#allocation21], 1 }
 0x8b2   :  { %4508 = vsyncpa [#allocation4], 1 }
 0x8b3   :  { %4510 = vsyncpa [#allocation4 + $0x1], 1 }

</bundles_post_ra>
